<compile_context>
chip_gen: v5e
topology: v5e:2x2
jax: 0.10.0
libtpu: 0.0.40
codegen_flags: <defaults>
</compile_context>

<pallas_src>
import functools

import numpy as np

import jax
import jax.numpy as jnp
from jax.experimental import pallas as pl
from jax.experimental.pallas import tpu as pltpu


def _round_up(x, m):
    return (x + m - 1) // m * m


# ----------------------------------------------------------------------------
# Pallas kernel: one bidirectional LSTM layer (both directions fused)
# ----------------------------------------------------------------------------
def _bilstm_layer_kernel(x_ref, lens_ref, wih_ref, whhf_ref, whhb_ref, b_ref,
                         out_ref, hfin_ref, gx_ref, *, T, Bp, H):
    """One LSTM layer, forward + backward direction in one program.

    x_ref:    (T*Bp, D)    time-major flattened input (row = t*Bp + b), bf16
    lens_ref: (Bp, 1)      sequence lengths, int32 (0 for padded batch rows)
    wih_ref:  (D, 8H)      input->gate weights, [fwd 4H | bwd 4H], bf16
    whhf_ref: (H, 4H)      hidden->gate weights, forward direction, bf16
    whhb_ref: (H, 4H)      hidden->gate weights, backward direction, bf16
    b_ref:    (1, 8H)      combined bias (b_ih + b_hh), [fwd | bwd], f32
    out_ref:  (T*Bp, 2H)   per-step hidden outputs, [fwd | bwd] lanes, bf16
    hfin_ref: (Bp, 2H)     final hidden (packed-sequence semantics), f32
    gx_ref:   (T*Bp, 8H)   scratch: hoisted input projection, f32
    """
    G = 4 * H  # per-direction gate width (== 128 lanes for H == 32)

    # Hoisted input projection for BOTH directions: one big MXU matmul over
    # the whole sequence, off the serial recurrence path.
    gx_ref[...] = (jnp.dot(x_ref[...], wih_ref[...],
                           preferred_element_type=jnp.float32) + b_ref[...])

    # (H, 4H) bf16 = 2 vregs per direction: safe to keep resident (no spill).
    whh_f = whhf_ref[...]
    whh_b = whhb_ref[...]
    lens = lens_ref[...]                        # (Bp, 1) int32

    h_f = jnp.zeros((Bp, H), jnp.float32)
    c_f = jnp.zeros((Bp, H), jnp.float32)
    h_b = jnp.zeros((Bp, H), jnp.float32)
    c_b = jnp.zeros((Bp, H), jnp.float32)

    def cell(gates, c_prev):
        # PyTorch gate order (i, f, g, o), each H lanes wide.
        i_g = jax.nn.sigmoid(gates[:, 0:H])
        f_g = jax.nn.sigmoid(gates[:, H:2 * H])
        g_g = jnp.tanh(gates[:, 2 * H:3 * H])
        o_g = jax.nn.sigmoid(gates[:, 3 * H:4 * H])
        c_new = f_g * c_prev + i_g * g_g
        h_new = o_g * jnp.tanh(c_new)
        return h_new, c_new

    # Static unroll: every gx load / out store has a compile-time row offset.
    # (Fine for tiny T; see module-level TODO for production T.)
    for i in range(T):
        tf, tb = i, T - 1 - i                   # fwd / bwd timestep this step
        rf, rb = tf * Bp, tb * Bp

        # Per-direction small matmuls on the serial path; the two directions
        # are independent so the scheduler can overlap their MXU/EUP work.
        gates_f = gx_ref[rf:rf + Bp, 0:G] + jnp.dot(
            h_f.astype(jnp.bfloat16), whh_f, preferred_element_type=jnp.float32)
        gates_b = gx_ref[rb:rb + Bp, G:2 * G] + jnp.dot(
            h_b.astype(jnp.bfloat16), whh_b, preferred_element_type=jnp.float32)

        h_f_new, c_f_new = cell(gates_f, c_f)
        h_b_new, c_b_new = cell(gates_b, c_b)

        # Unmasked stores; rows at padded timesteps hold values that never
        # reach hn (masked recurrence below) or the head.
        out_ref[rf:rf + Bp, 0:H] = h_f_new.astype(out_ref.dtype)
        out_ref[rb:rb + Bp, H:2 * H] = h_b_new.astype(out_ref.dtype)

        # Packed-sequence semantics: single select per state, no mask array.
        m_f = lens > tf                         # (Bp, 1) bool
        m_b = lens > tb
        h_f = jnp.where(m_f, h_f_new, h_f)
        c_f = jnp.where(m_f, c_f_new, c_f)
        h_b = jnp.where(m_b, h_b_new, h_b)
        c_b = jnp.where(m_b, c_b_new, c_b)

    hfin_ref[:, 0:H] = h_f
    hfin_ref[:, H:2 * H] = h_b


def bilstm_layer(x2d, lens_col, w_ih, w_hh_f, w_hh_b, b, *, T, Bp, H):
    """x2d (T*Bp, D) bf16 -> (out (T*Bp, 2H) bf16, hfin (Bp, 2H) f32)."""
    D = x2d.shape[1]
    assert 4 * H % 128 == 0, "per-direction gate block must be lane-aligned"
    kernel = functools.partial(_bilstm_layer_kernel, T=T, Bp=Bp, H=H)
    out, hfin = pl.pallas_call(
        kernel,
        out_shape=(jax.ShapeDtypeStruct((T * Bp, 2 * H), jnp.bfloat16),
                   jax.ShapeDtypeStruct((Bp, 2 * H), jnp.float32)),
        grid_spec=pltpu.PrefetchScalarGridSpec(
            num_scalar_prefetch=0,
            grid=(1,),
            in_specs=[
                pl.BlockSpec((T * Bp, D), lambda i: (0, 0)),      # x (bf16)
                pl.BlockSpec((Bp, 1), lambda i: (0, 0)),          # lengths
                pl.BlockSpec((D, 8 * H), lambda i: (0, 0)),       # W_ih [f|b]
                pl.BlockSpec((H, 4 * H), lambda i: (0, 0)),       # W_hh fwd
                pl.BlockSpec((H, 4 * H), lambda i: (0, 0)),       # W_hh bwd
                pl.BlockSpec((1, 8 * H), lambda i: (0, 0)),       # bias [f|b]
            ],
            out_specs=(
                pl.BlockSpec((T * Bp, 2 * H), lambda i: (0, 0)),  # out seq
                pl.BlockSpec((Bp, 2 * H), lambda i: (0, 0)),      # h final
            ),
            scratch_shapes=[pltpu.VMEM((T * Bp, 8 * H), jnp.float32)],
        ),
        compiler_params=pltpu.CompilerParams(
            dimension_semantics=("arbitrary",)),
    )(x2d, lens_col, w_ih, w_hh_f, w_hh_b, b)
    return out, hfin


# ----------------------------------------------------------------------------
# Parameters (logical) + packing for the kernel
# ----------------------------------------------------------------------------
def init_params(key, vocab_size, embed_dim, hidden_size, num_labels):
    k = 1.0 / float(hidden_size) ** 0.5
    keys = iter(jax.random.split(key, 32))

    def uni(shape):
        return jax.random.uniform(next(keys), shape, jnp.float32, -k, k)

    params = {
        "embedding": jax.random.normal(next(keys), (vocab_size, embed_dim),
                                       jnp.float32) * 0.1,
        "linear_w": uni((2 * hidden_size, num_labels)),
        "linear_b": uni((1, num_labels)),
    }
    for layer in range(2):
        d_in = embed_dim if layer == 0 else 2 * hidden_size
        for direction in range(2):                  # 0 = fwd, 1 = bwd
            # NOTE: real PyTorch weights are (4H, D) rows with gate order
            # (i, f, g, o) and two separate biases; importing them requires a
            # transpose and b = b_ih + b_hh here (see review correctness note).
            params[f"l{layer}_d{direction}"] = {
                "w_ih": uni((d_in, 4 * hidden_size)),
                "w_hh": uni((hidden_size, 4 * hidden_size)),
                "b": uni((1, 4 * hidden_size)),
            }
    return params


def prepare_kernel_params(params, hidden):
    """Pack per-direction weights for the fused kernel (no gate padding)."""
    del hidden  # layout is fully determined by the logical shapes
    kp = {"embedding": params["embedding"],
          "linear_w": params["linear_w"],
          "linear_b": params["linear_b"]}
    for layer in range(2):
        qf = params[f"l{layer}_d0"]
        qb = params[f"l{layer}_d1"]
        kp[f"layer{layer}"] = {
            # [fwd 4H | bwd 4H] gate columns -> single (D, 8H) projection.
            "w_ih": jnp.concatenate([qf["w_ih"], qb["w_ih"]],
                                    axis=1).astype(jnp.bfloat16),
            "w_hh_f": qf["w_hh"].astype(jnp.bfloat16),
            "w_hh_b": qb["w_hh"].astype(jnp.bfloat16),
            "b": jnp.concatenate([qf["b"], qb["b"]], axis=1).astype(jnp.float32),
        }
    return kp


# ----------------------------------------------------------------------------
# Forward pass (matches the PyTorch module)
# ----------------------------------------------------------------------------
@functools.partial(jax.jit, static_argnames=("hidden",))
def bilstm_forward(kp, padded_texts, lengths, *, hidden):
    B, T = padded_texts.shape
    H = hidden
    Bp = _round_up(B, 8)                               # sublane-pad batch

    # Embedding gather + layout glue left to XLA.
    emb = kp["embedding"][padded_texts]                # (B, T, E) f32
    x = jnp.transpose(emb, (1, 0, 2))                  # (T, B, E)
    x = jnp.pad(x, ((0, 0), (0, Bp - B), (0, 0)))      # (T, Bp, E)
    x2d = x.reshape(T * Bp, -1).astype(jnp.bfloat16)   # row = t*Bp + b

    lens_col = jnp.pad(lengths.astype(jnp.int32), (0, Bp - B)).reshape(Bp, 1)

    layer_in = x2d
    hfin = None
    for layer in range(2):
        lw = kp[f"layer{layer}"]
        out, hfin = bilstm_layer(layer_in, lens_col, lw["w_ih"], lw["w_hh_f"],
                                 lw["w_hh_b"], lw["b"], T=T, Bp=Bp, H=H)
        layer_in = out   # (T*Bp, 2H) bf16 [fwd|bwd]: next layer's x, no concat

    # PyTorch hn layout [l0_fwd, l0_bwd, l1_fwd, l1_bwd];
    # module computes cat(hn[-1], hn[-2]) = cat(layer-1 bwd, layer-1 fwd).
    concat_hidden = jnp.concatenate([hfin[:B, H:2 * H], hfin[:B, 0:H]], axis=1)

    # Tiny head left to XLA.
    return concat_hidden @ kp["linear_w"] + kp["linear_b"]


# ----------------------------------------------------------------------------
# Pure-JAX f32 reference (packed-sequence semantics) for a silent self-check
# ----------------------------------------------------------------------------
def reference_forward(params, padded_texts, lengths, *, hidden):
    H = hidden
    emb = params["embedding"][padded_texts]            # (B, T, E)
    B, T, _ = emb.shape
    lens = lengths.astype(jnp.int32)

    def run_direction(x_seq, q, reverse):
        h = jnp.zeros((B, H), jnp.float32)
        c = jnp.zeros((B, H), jnp.float32)
        outs = [None] * T
        steps = range(T - 1, -1, -1) if reverse else range(T)
        for t in steps:
            g = x_seq[:, t, :] @ q["w_ih"] + h @ q["w_hh"] + q["b"]
            i_g = jax.nn.sigmoid(g[:, 0:H])
            f_g = jax.nn.sigmoid(g[:, H:2 * H])
            g_g = jnp.tanh(g[:, 2 * H:3 * H])
            o_g = jax.nn.sigmoid(g[:, 3 * H:4 * H])
            c_new = f_g * c + i_g * g_g
            h_new = o_g * jnp.tanh(c_new)
            m = (lens > t)[:, None]
            h = jnp.where(m, h_new, h)
            c = jnp.where(m, c_new, c)
            outs[t] = h
        return jnp.stack(outs, axis=1), h

    x = emb
    hf = hb = None
    for layer in range(2):
        of, hf = run_direction(x, params[f"l{layer}_d0"], reverse=False)
        ob, hb = run_direction(x, params[f"l{layer}_d1"], reverse=True)
        x = jnp.concatenate([of, ob], axis=-1)
    concat_hidden = jnp.concatenate([hb, hf], axis=1)
    return concat_hidden @ params["linear_w"] + params["linear_b"]


# ----------------------------------------------------------------------------
# Main
# ----------------------------------------------------------------------------
if __name__ == "__main__":
    VOCAB = 50
    EMBED = 32
    HIDDEN = 32
    NUM_LABELS = 2
    B, T = 2, 8

    key = jax.random.PRNGKey(0)
    k_param, k_tok = jax.random.split(key)

    params = init_params(k_param, VOCAB, EMBED, HIDDEN, NUM_LABELS)
    kparams = prepare_kernel_params(params, HIDDEN)

    padded_texts = jax.random.randint(k_tok, (B, T), 0, VOCAB, dtype=jnp.int32)
    lengths = jnp.array([8, 5], dtype=jnp.int32)

    logits = bilstm_forward(kparams, padded_texts, lengths, hidden=HIDDEN)
    jax.block_until_ready(logits)
    assert logits.shape == (B, NUM_LABELS)

    # Silent check against a pure-JAX f32 reference (kernel uses bf16 matmul
    # inputs, so tolerance is loose; see review correctness note).
    ref = reference_forward(params, padded_texts, lengths, hidden=HIDDEN)
    np.testing.assert_allclose(np.asarray(logits), np.asarray(ref),
                               rtol=0, atol=3e-2)

    print("KERNEL_OK")
</pallas_src>

<mosaic_0001>
module attributes {stable_mosaic.version = 11 : i64} {
  func.func @_bilstm_layer_kernel(%arg0: i32, %arg1: memref<64x32xbf16, #tpu.memory_space<vmem>>, %arg2: memref<8x1xi32, #tpu.memory_space<vmem>>, %arg3: memref<32x256xbf16, #tpu.memory_space<vmem>>, %arg4: memref<32x128xbf16, #tpu.memory_space<vmem>>, %arg5: memref<32x128xbf16, #tpu.memory_space<vmem>>, %arg6: memref<1x256xf32, #tpu.memory_space<vmem>>, %arg7: memref<64x64xbf16, #tpu.memory_space<vmem>>, %arg8: memref<8x64xf32, #tpu.memory_space<vmem>>, %arg9: memref<64x256xf32, #tpu.memory_space<vmem>>) attributes {dimension_semantics = [#tpu.dimension_semantics<arbitrary>], iteration_bounds = array<i64: 1>, scalar_prefetch = 0 : i64, scratch_operands = 1 : i64, tpu.core_type = #tpu.core_type<tc>, window_params = [{pipeline_mode = #tpu.pipeline_mode<synchronous>, transform_indices = @transform_0, window_bounds = array<i64: 64, 32>}, {pipeline_mode = #tpu.pipeline_mode<synchronous>, transform_indices = @transform_1, window_bounds = array<i64: 8, 1>}, {pipeline_mode = #tpu.pipeline_mode<synchronous>, transform_indices = @transform_2, window_bounds = array<i64: 32, 256>}, {pipeline_mode = #tpu.pipeline_mode<synchronous>, transform_indices = @transform_3, window_bounds = array<i64: 32, 128>}, {pipeline_mode = #tpu.pipeline_mode<synchronous>, transform_indices = @transform_4, window_bounds = array<i64: 32, 128>}, {pipeline_mode = #tpu.pipeline_mode<synchronous>, transform_indices = @transform_5, window_bounds = array<i64: 1, 256>}, {pipeline_mode = #tpu.pipeline_mode<synchronous>, transform_indices = @transform_6, window_bounds = array<i64: 64, 64>}, {pipeline_mode = #tpu.pipeline_mode<synchronous>, transform_indices = @transform_7, window_bounds = array<i64: 8, 64>}]} {
    %c0 = arith.constant 0 : index
    %c0_0 = arith.constant 0 : index
    %0 = vector.load %arg1[%c0, %c0_0] : memref<64x32xbf16, #tpu.memory_space<vmem>>, vector<64x32xbf16>
    %c0_1 = arith.constant 0 : index
    %c0_2 = arith.constant 0 : index
    %1 = vector.load %arg3[%c0_1, %c0_2] : memref<32x256xbf16, #tpu.memory_space<vmem>>, vector<32x256xbf16>
    %cst = arith.constant dense<0.000000e+00> : vector<64x256xf32>
    %2 = tpu.matmul %0, %1, %cst {dimension_numbers = #tpu.dot_dimension_numbers<[1], [0], [0], [1], [0, 0, 1, 1], [], []>} : vector<64x32xbf16>, vector<32x256xbf16>, vector<64x256xf32> -> vector<64x256xf32>
    %c0_3 = arith.constant 0 : index
    %c0_4 = arith.constant 0 : index
    %3 = vector.load %arg6[%c0_3, %c0_4] : memref<1x256xf32, #tpu.memory_space<vmem>>, vector<1x256xf32>
    %4 = vector.broadcast %3 : vector<1x256xf32> to vector<64x256xf32>
    %5 = arith.addf %2, %4 : vector<64x256xf32>
    %c0_5 = arith.constant 0 : index
    %c0_6 = arith.constant 0 : index
    %6 = vector.load %arg9[%c0_5, %c0_6] : memref<64x256xf32, #tpu.memory_space<vmem>>, vector<64x256xf32>
    tpu.vector_store %arg9[%c0_5, %c0_6], %5 {strides = array<i32>} : memref<64x256xf32, #tpu.memory_space<vmem>>, vector<64x256xf32>,
    %c0_7 = arith.constant 0 : index
    %c0_8 = arith.constant 0 : index
    %7 = vector.load %arg4[%c0_7, %c0_8] : memref<32x128xbf16, #tpu.memory_space<vmem>>, vector<32x128xbf16>
    %c0_9 = arith.constant 0 : index
    %c0_10 = arith.constant 0 : index
    %8 = vector.load %arg5[%c0_9, %c0_10] : memref<32x128xbf16, #tpu.memory_space<vmem>>, vector<32x128xbf16>
    %c0_11 = arith.constant 0 : index
    %c0_12 = arith.constant 0 : index
    %9 = vector.load %arg2[%c0_11, %c0_12] : memref<8x1xi32, #tpu.memory_space<vmem>>, vector<8x1xi32>
    %cst_13 = arith.constant 0.000000e+00 : f32
    %10 = vector.broadcast %cst_13 : f32 to vector<8x32xf32>
    %cst_14 = arith.constant 0.000000e+00 : f32
    %11 = vector.broadcast %cst_14 : f32 to vector<8x32xf32>
    %cst_15 = arith.constant 0.000000e+00 : f32
    %12 = vector.broadcast %cst_15 : f32 to vector<8x32xf32>
    %cst_16 = arith.constant 0.000000e+00 : f32
    %13 = vector.broadcast %cst_16 : f32 to vector<8x32xf32>
    %c0_17 = arith.constant 0 : index
    %c0_18 = arith.constant 0 : index
    %14 = vector.load %arg9[%c0_17, %c0_18] : memref<64x256xf32, #tpu.memory_space<vmem>>, vector<8x128xf32>
    %15 = arith.truncf %10 : vector<8x32xf32> to vector<8x32xbf16>
    %cst_19 = arith.constant dense<0.000000e+00> : vector<8x128xf32>
    %16 = tpu.matmul %15, %7, %cst_19 {dimension_numbers = #tpu.dot_dimension_numbers<[1], [0], [0], [1], [0, 0, 1, 1], [], []>} : vector<8x32xbf16>, vector<32x128xbf16>, vector<8x128xf32> -> vector<8x128xf32>
    %17 = arith.addf %14, %16 : vector<8x128xf32>
    %c56 = arith.constant 56 : index
    %c128 = arith.constant 128 : index
    %18 = vector.load %arg9[%c56, %c128] : memref<64x256xf32, #tpu.memory_space<vmem>>, vector<8x128xf32>
    %19 = arith.truncf %12 : vector<8x32xf32> to vector<8x32xbf16>
    %cst_20 = arith.constant dense<0.000000e+00> : vector<8x128xf32>
    %20 = tpu.matmul %19, %8, %cst_20 {dimension_numbers = #tpu.dot_dimension_numbers<[1], [0], [0], [1], [0, 0, 1, 1], [], []>} : vector<8x32xbf16>, vector<32x128xbf16>, vector<8x128xf32> -> vector<8x128xf32>
    %21 = arith.addf %18, %20 : vector<8x128xf32>
    %22 = vector.extract_strided_slice %17 {offsets = [0, 0], sizes = [8, 32], strides = [1, 1]} : vector<8x128xf32> to vector<8x32xf32>
    %23 = arith.negf %22 : vector<8x32xf32>
    %24 = math.exp %23 : vector<8x32xf32>
    %cst_21 = arith.constant 1.000000e+00 : f32
    %25 = vector.broadcast %cst_21 : f32 to vector<8x32xf32>
    %26 = arith.addf %25, %24 : vector<8x32xf32>
    %27 = arith.divf %25, %26 : vector<8x32xf32>
    %28 = vector.extract_strided_slice %17 {offsets = [0, 32], sizes = [8, 32], strides = [1, 1]} : vector<8x128xf32> to vector<8x32xf32>
    %29 = arith.negf %28 : vector<8x32xf32>
    %30 = math.exp %29 : vector<8x32xf32>
    %cst_22 = arith.constant 1.000000e+00 : f32
    %31 = vector.broadcast %cst_22 : f32 to vector<8x32xf32>
    %32 = arith.addf %31, %30 : vector<8x32xf32>
    %33 = arith.divf %31, %32 : vector<8x32xf32>
    %34 = vector.extract_strided_slice %17 {offsets = [0, 64], sizes = [8, 32], strides = [1, 1]} : vector<8x128xf32> to vector<8x32xf32>
    %35 = math.tanh %34 : vector<8x32xf32>
    %36 = vector.extract_strided_slice %17 {offsets = [0, 96], sizes = [8, 32], strides = [1, 1]} : vector<8x128xf32> to vector<8x32xf32>
    %37 = arith.negf %36 : vector<8x32xf32>
    %38 = math.exp %37 : vector<8x32xf32>
    %cst_23 = arith.constant 1.000000e+00 : f32
    %39 = vector.broadcast %cst_23 : f32 to vector<8x32xf32>
    %40 = arith.addf %39, %38 : vector<8x32xf32>
    %41 = arith.divf %39, %40 : vector<8x32xf32>
    %42 = arith.mulf %33, %11 : vector<8x32xf32>
    %43 = arith.mulf %27, %35 : vector<8x32xf32>
    %44 = arith.addf %42, %43 : vector<8x32xf32>
    %45 = math.tanh %44 : vector<8x32xf32>
    %46 = arith.mulf %41, %45 : vector<8x32xf32>
    %47 = vector.extract_strided_slice %21 {offsets = [0, 0], sizes = [8, 32], strides = [1, 1]} : vector<8x128xf32> to vector<8x32xf32>
    %48 = arith.negf %47 : vector<8x32xf32>
    %49 = math.exp %48 : vector<8x32xf32>
    %cst_24 = arith.constant 1.000000e+00 : f32
    %50 = vector.broadcast %cst_24 : f32 to vector<8x32xf32>
    %51 = arith.addf %50, %49 : vector<8x32xf32>
    %52 = arith.divf %50, %51 : vector<8x32xf32>
    %53 = vector.extract_strided_slice %21 {offsets = [0, 32], sizes = [8, 32], strides = [1, 1]} : vector<8x128xf32> to vector<8x32xf32>
    %54 = arith.negf %53 : vector<8x32xf32>
    %55 = math.exp %54 : vector<8x32xf32>
    %cst_25 = arith.constant 1.000000e+00 : f32
    %56 = vector.broadcast %cst_25 : f32 to vector<8x32xf32>
    %57 = arith.addf %56, %55 : vector<8x32xf32>
    %58 = arith.divf %56, %57 : vector<8x32xf32>
    %59 = vector.extract_strided_slice %21 {offsets = [0, 64], sizes = [8, 32], strides = [1, 1]} : vector<8x128xf32> to vector<8x32xf32>
    %60 = math.tanh %59 : vector<8x32xf32>
    %61 = vector.extract_strided_slice %21 {offsets = [0, 96], sizes = [8, 32], strides = [1, 1]} : vector<8x128xf32> to vector<8x32xf32>
    %62 = arith.negf %61 : vector<8x32xf32>
    %63 = math.exp %62 : vector<8x32xf32>
    %cst_26 = arith.constant 1.000000e+00 : f32
    %64 = vector.broadcast %cst_26 : f32 to vector<8x32xf32>
    %65 = arith.addf %64, %63 : vector<8x32xf32>
    %66 = arith.divf %64, %65 : vector<8x32xf32>
    %67 = arith.mulf %58, %13 : vector<8x32xf32>
    %68 = arith.mulf %52, %60 : vector<8x32xf32>
    %69 = arith.addf %67, %68 : vector<8x32xf32>
    %70 = math.tanh %69 : vector<8x32xf32>
    %71 = arith.mulf %66, %70 : vector<8x32xf32>
    %72 = arith.truncf %46 : vector<8x32xf32> to vector<8x32xbf16>
    %c0_27 = arith.constant 0 : index
    %c0_28 = arith.constant 0 : index
    %73 = vector.load %arg7[%c0_27, %c0_28] : memref<64x64xbf16, #tpu.memory_space<vmem>>, vector<8x32xbf16>
    tpu.vector_store %arg7[%c0_27, %c0_28], %72 {strides = array<i32>} : memref<64x64xbf16, #tpu.memory_space<vmem>>, vector<8x32xbf16>,
    %74 = arith.truncf %71 : vector<8x32xf32> to vector<8x32xbf16>
    %c56_29 = arith.constant 56 : index
    %c32 = arith.constant 32 : index
    %75 = vector.load %arg7[%c56_29, %c32] : memref<64x64xbf16, #tpu.memory_space<vmem>>, vector<8x32xbf16>
    tpu.vector_store %arg7[%c56_29, %c32], %74 {strides = array<i32>} : memref<64x64xbf16, #tpu.memory_space<vmem>>, vector<8x32xbf16>,
    %c0_i32 = arith.constant 0 : i32
    %76 = vector.broadcast %c0_i32 : i32 to vector<8x1xi32>
    %77 = arith.cmpi sgt, %9, %76 : vector<8x1xi32>
    %c7_i32 = arith.constant 7 : i32
    %78 = vector.broadcast %c7_i32 : i32 to vector<8x1xi32>
    %79 = arith.cmpi sgt, %9, %78 : vector<8x1xi32>
    %80 = vector.shape_cast %77 : vector<8x1xi1> to vector<8x1xi1>
    %81 = vector.broadcast %80 : vector<8x1xi1> to vector<8x32xi1>
    %82 = arith.select %81, %46, %10 : vector<8x32xi1>, vector<8x32xf32>
    %83 = vector.shape_cast %77 : vector<8x1xi1> to vector<8x1xi1>
    %84 = vector.broadcast %83 : vector<8x1xi1> to vector<8x32xi1>
    %85 = arith.select %84, %44, %11 : vector<8x32xi1>, vector<8x32xf32>
    %86 = vector.shape_cast %79 : vector<8x1xi1> to vector<8x1xi1>
    %87 = vector.broadcast %86 : vector<8x1xi1> to vector<8x32xi1>
    %88 = arith.select %87, %71, %12 : vector<8x32xi1>, vector<8x32xf32>
    %89 = vector.shape_cast %79 : vector<8x1xi1> to vector<8x1xi1>
    %90 = vector.broadcast %89 : vector<8x1xi1> to vector<8x32xi1>
    %91 = arith.select %90, %69, %13 : vector<8x32xi1>, vector<8x32xf32>
    %c8 = arith.constant 8 : index
    %c0_30 = arith.constant 0 : index
    %92 = vector.load %arg9[%c8, %c0_30] : memref<64x256xf32, #tpu.memory_space<vmem>>, vector<8x128xf32>
    %93 = arith.truncf %82 : vector<8x32xf32> to vector<8x32xbf16>
    %cst_31 = arith.constant dense<0.000000e+00> : vector<8x128xf32>
    %94 = tpu.matmul %93, %7, %cst_31 {dimension_numbers = #tpu.dot_dimension_numbers<[1], [0], [0], [1], [0, 0, 1, 1], [], []>} : vector<8x32xbf16>, vector<32x128xbf16>, vector<8x128xf32> -> vector<8x128xf32>
    %95 = arith.addf %92, %94 : vector<8x128xf32>
    %c48 = arith.constant 48 : index
    %c128_32 = arith.constant 128 : index
    %96 = vector.load %arg9[%c48, %c128_32] : memref<64x256xf32, #tpu.memory_space<vmem>>, vector<8x128xf32>
    %97 = arith.truncf %88 : vector<8x32xf32> to vector<8x32xbf16>
    %cst_33 = arith.constant dense<0.000000e+00> : vector<8x128xf32>
    %98 = tpu.matmul %97, %8, %cst_33 {dimension_numbers = #tpu.dot_dimension_numbers<[1], [0], [0], [1], [0, 0, 1, 1], [], []>} : vector<8x32xbf16>, vector<32x128xbf16>, vector<8x128xf32> -> vector<8x128xf32>
    %99 = arith.addf %96, %98 : vector<8x128xf32>
    %100 = vector.extract_strided_slice %95 {offsets = [0, 0], sizes = [8, 32], strides = [1, 1]} : vector<8x128xf32> to vector<8x32xf32>
    %101 = arith.negf %100 : vector<8x32xf32>
    %102 = math.exp %101 : vector<8x32xf32>
    %cst_34 = arith.constant 1.000000e+00 : f32
    %103 = vector.broadcast %cst_34 : f32 to vector<8x32xf32>
    %104 = arith.addf %103, %102 : vector<8x32xf32>
    %105 = arith.divf %103, %104 : vector<8x32xf32>
    %106 = vector.extract_strided_slice %95 {offsets = [0, 32], sizes = [8, 32], strides = [1, 1]} : vector<8x128xf32> to vector<8x32xf32>
    %107 = arith.negf %106 : vector<8x32xf32>
    %108 = math.exp %107 : vector<8x32xf32>
    %cst_35 = arith.constant 1.000000e+00 : f32
    %109 = vector.broadcast %cst_35 : f32 to vector<8x32xf32>
    %110 = arith.addf %109, %108 : vector<8x32xf32>
    %111 = arith.divf %109, %110 : vector<8x32xf32>
    %112 = vector.extract_strided_slice %95 {offsets = [0, 64], sizes = [8, 32], strides = [1, 1]} : vector<8x128xf32> to vector<8x32xf32>
    %113 = math.tanh %112 : vector<8x32xf32>
    %114 = vector.extract_strided_slice %95 {offsets = [0, 96], sizes = [8, 32], strides = [1, 1]} : vector<8x128xf32> to vector<8x32xf32>
    %115 = arith.negf %114 : vector<8x32xf32>
    %116 = math.exp %115 : vector<8x32xf32>
    %cst_36 = arith.constant 1.000000e+00 : f32
    %117 = vector.broadcast %cst_36 : f32 to vector<8x32xf32>
    %118 = arith.addf %117, %116 : vector<8x32xf32>
    %119 = arith.divf %117, %118 : vector<8x32xf32>
    %120 = arith.mulf %111, %85 : vector<8x32xf32>
    %121 = arith.mulf %105, %113 : vector<8x32xf32>
    %122 = arith.addf %120, %121 : vector<8x32xf32>
    %123 = math.tanh %122 : vector<8x32xf32>
    %124 = arith.mulf %119, %123 : vector<8x32xf32>
    %125 = vector.extract_strided_slice %99 {offsets = [0, 0], sizes = [8, 32], strides = [1, 1]} : vector<8x128xf32> to vector<8x32xf32>
    %126 = arith.negf %125 : vector<8x32xf32>
    %127 = math.exp %126 : vector<8x32xf32>
    %cst_37 = arith.constant 1.000000e+00 : f32
    %128 = vector.broadcast %cst_37 : f32 to vector<8x32xf32>
    %129 = arith.addf %128, %127 : vector<8x32xf32>
    %130 = arith.divf %128, %129 : vector<8x32xf32>
    %131 = vector.extract_strided_slice %99 {offsets = [0, 32], sizes = [8, 32], strides = [1, 1]} : vector<8x128xf32> to vector<8x32xf32>
    %132 = arith.negf %131 : vector<8x32xf32>
    %133 = math.exp %132 : vector<8x32xf32>
    %cst_38 = arith.constant 1.000000e+00 : f32
    %134 = vector.broadcast %cst_38 : f32 to vector<8x32xf32>
    %135 = arith.addf %134, %133 : vector<8x32xf32>
    %136 = arith.divf %134, %135 : vector<8x32xf32>
    %137 = vector.extract_strided_slice %99 {offsets = [0, 64], sizes = [8, 32], strides = [1, 1]} : vector<8x128xf32> to vector<8x32xf32>
    %138 = math.tanh %137 : vector<8x32xf32>
    %139 = vector.extract_strided_slice %99 {offsets = [0, 96], sizes = [8, 32], strides = [1, 1]} : vector<8x128xf32> to vector<8x32xf32>
    %140 = arith.negf %139 : vector<8x32xf32>
    %141 = math.exp %140 : vector<8x32xf32>
    %cst_39 = arith.constant 1.000000e+00 : f32
    %142 = vector.broadcast %cst_39 : f32 to vector<8x32xf32>
    %143 = arith.addf %142, %141 : vector<8x32xf32>
    %144 = arith.divf %142, %143 : vector<8x32xf32>
    %145 = arith.mulf %136, %91 : vector<8x32xf32>
    %146 = arith.mulf %130, %138 : vector<8x32xf32>
    %147 = arith.addf %145, %146 : vector<8x32xf32>
    %148 = math.tanh %147 : vector<8x32xf32>
    %149 = arith.mulf %144, %148 : vector<8x32xf32>
    %150 = arith.truncf %124 : vector<8x32xf32> to vector<8x32xbf16>
    %c8_40 = arith.constant 8 : index
    %c0_41 = arith.constant 0 : index
    %151 = vector.load %arg7[%c8_40, %c0_41] : memref<64x64xbf16, #tpu.memory_space<vmem>>, vector<8x32xbf16>
    tpu.vector_store %arg7[%c8_40, %c0_41], %150 {strides = array<i32>} : memref<64x64xbf16, #tpu.memory_space<vmem>>, vector<8x32xbf16>,
    %152 = arith.truncf %149 : vector<8x32xf32> to vector<8x32xbf16>
    %c48_42 = arith.constant 48 : index
    %c32_43 = arith.constant 32 : index
    %153 = vector.load %arg7[%c48_42, %c32_43] : memref<64x64xbf16, #tpu.memory_space<vmem>>, vector<8x32xbf16>
    tpu.vector_store %arg7[%c48_42, %c32_43], %152 {strides = array<i32>} : memref<64x64xbf16, #tpu.memory_space<vmem>>, vector<8x32xbf16>,
    %c1_i32 = arith.constant 1 : i32
    %154 = vector.broadcast %c1_i32 : i32 to vector<8x1xi32>
    %155 = arith.cmpi sgt, %9, %154 : vector<8x1xi32>
    %c6_i32 = arith.constant 6 : i32
    %156 = vector.broadcast %c6_i32 : i32 to vector<8x1xi32>
    %157 = arith.cmpi sgt, %9, %156 : vector<8x1xi32>
    %158 = vector.shape_cast %155 : vector<8x1xi1> to vector<8x1xi1>
    %159 = vector.broadcast %158 : vector<8x1xi1> to vector<8x32xi1>
    %160 = arith.select %159, %124, %82 : vector<8x32xi1>, vector<8x32xf32>
    %161 = vector.shape_cast %155 : vector<8x1xi1> to vector<8x1xi1>
    %162 = vector.broadcast %161 : vector<8x1xi1> to vector<8x32xi1>
    %163 = arith.select %162, %122, %85 : vector<8x32xi1>, vector<8x32xf32>
    %164 = vector.shape_cast %157 : vector<8x1xi1> to vector<8x1xi1>
    %165 = vector.broadcast %164 : vector<8x1xi1> to vector<8x32xi1>
    %166 = arith.select %165, %149, %88 : vector<8x32xi1>, vector<8x32xf32>
    %167 = vector.shape_cast %157 : vector<8x1xi1> to vector<8x1xi1>
    %168 = vector.broadcast %167 : vector<8x1xi1> to vector<8x32xi1>
    %169 = arith.select %168, %147, %91 : vector<8x32xi1>, vector<8x32xf32>
    %c16 = arith.constant 16 : index
    %c0_44 = arith.constant 0 : index
    %170 = vector.load %arg9[%c16, %c0_44] : memref<64x256xf32, #tpu.memory_space<vmem>>, vector<8x128xf32>
    %171 = arith.truncf %160 : vector<8x32xf32> to vector<8x32xbf16>
    %cst_45 = arith.constant dense<0.000000e+00> : vector<8x128xf32>
    %172 = tpu.matmul %171, %7, %cst_45 {dimension_numbers = #tpu.dot_dimension_numbers<[1], [0], [0], [1], [0, 0, 1, 1], [], []>} : vector<8x32xbf16>, vector<32x128xbf16>, vector<8x128xf32> -> vector<8x128xf32>
    %173 = arith.addf %170, %172 : vector<8x128xf32>
    %c40 = arith.constant 40 : index
    %c128_46 = arith.constant 128 : index
    %174 = vector.load %arg9[%c40, %c128_46] : memref<64x256xf32, #tpu.memory_space<vmem>>, vector<8x128xf32>
    %175 = arith.truncf %166 : vector<8x32xf32> to vector<8x32xbf16>
    %cst_47 = arith.constant dense<0.000000e+00> : vector<8x128xf32>
    %176 = tpu.matmul %175, %8, %cst_47 {dimension_numbers = #tpu.dot_dimension_numbers<[1], [0], [0], [1], [0, 0, 1, 1], [], []>} : vector<8x32xbf16>, vector<32x128xbf16>, vector<8x128xf32> -> vector<8x128xf32>
    %177 = arith.addf %174, %176 : vector<8x128xf32>
    %178 = vector.extract_strided_slice %173 {offsets = [0, 0], sizes = [8, 32], strides = [1, 1]} : vector<8x128xf32> to vector<8x32xf32>
    %179 = arith.negf %178 : vector<8x32xf32>
    %180 = math.exp %179 : vector<8x32xf32>
    %cst_48 = arith.constant 1.000000e+00 : f32
    %181 = vector.broadcast %cst_48 : f32 to vector<8x32xf32>
    %182 = arith.addf %181, %180 : vector<8x32xf32>
    %183 = arith.divf %181, %182 : vector<8x32xf32>
    %184 = vector.extract_strided_slice %173 {offsets = [0, 32], sizes = [8, 32], strides = [1, 1]} : vector<8x128xf32> to vector<8x32xf32>
    %185 = arith.negf %184 : vector<8x32xf32>
    %186 = math.exp %185 : vector<8x32xf32>
    %cst_49 = arith.constant 1.000000e+00 : f32
    %187 = vector.broadcast %cst_49 : f32 to vector<8x32xf32>
    %188 = arith.addf %187, %186 : vector<8x32xf32>
    %189 = arith.divf %187, %188 : vector<8x32xf32>
    %190 = vector.extract_strided_slice %173 {offsets = [0, 64], sizes = [8, 32], strides = [1, 1]} : vector<8x128xf32> to vector<8x32xf32>
    %191 = math.tanh %190 : vector<8x32xf32>
    %192 = vector.extract_strided_slice %173 {offsets = [0, 96], sizes = [8, 32], strides = [1, 1]} : vector<8x128xf32> to vector<8x32xf32>
    %193 = arith.negf %192 : vector<8x32xf32>
    %194 = math.exp %193 : vector<8x32xf32>
    %cst_50 = arith.constant 1.000000e+00 : f32
    %195 = vector.broadcast %cst_50 : f32 to vector<8x32xf32>
    %196 = arith.addf %195, %194 : vector<8x32xf32>
    %197 = arith.divf %195, %196 : vector<8x32xf32>
    %198 = arith.mulf %189, %163 : vector<8x32xf32>
    %199 = arith.mulf %183, %191 : vector<8x32xf32>
    %200 = arith.addf %198, %199 : vector<8x32xf32>
    %201 = math.tanh %200 : vector<8x32xf32>
    %202 = arith.mulf %197, %201 : vector<8x32xf32>
    %203 = vector.extract_strided_slice %177 {offsets = [0, 0], sizes = [8, 32], strides = [1, 1]} : vector<8x128xf32> to vector<8x32xf32>
    %204 = arith.negf %203 : vector<8x32xf32>
    %205 = math.exp %204 : vector<8x32xf32>
    %cst_51 = arith.constant 1.000000e+00 : f32
    %206 = vector.broadcast %cst_51 : f32 to vector<8x32xf32>
    %207 = arith.addf %206, %205 : vector<8x32xf32>
    %208 = arith.divf %206, %207 : vector<8x32xf32>
    %209 = vector.extract_strided_slice %177 {offsets = [0, 32], sizes = [8, 32], strides = [1, 1]} : vector<8x128xf32> to vector<8x32xf32>
    %210 = arith.negf %209 : vector<8x32xf32>
    %211 = math.exp %210 : vector<8x32xf32>
    %cst_52 = arith.constant 1.000000e+00 : f32
    %212 = vector.broadcast %cst_52 : f32 to vector<8x32xf32>
    %213 = arith.addf %212, %211 : vector<8x32xf32>
    %214 = arith.divf %212, %213 : vector<8x32xf32>
    %215 = vector.extract_strided_slice %177 {offsets = [0, 64], sizes = [8, 32], strides = [1, 1]} : vector<8x128xf32> to vector<8x32xf32>
    %216 = math.tanh %215 : vector<8x32xf32>
    %217 = vector.extract_strided_slice %177 {offsets = [0, 96], sizes = [8, 32], strides = [1, 1]} : vector<8x128xf32> to vector<8x32xf32>
    %218 = arith.negf %217 : vector<8x32xf32>
    %219 = math.exp %218 : vector<8x32xf32>
    %cst_53 = arith.constant 1.000000e+00 : f32
    %220 = vector.broadcast %cst_53 : f32 to vector<8x32xf32>
    %221 = arith.addf %220, %219 : vector<8x32xf32>
    %222 = arith.divf %220, %221 : vector<8x32xf32>
    %223 = arith.mulf %214, %169 : vector<8x32xf32>
    %224 = arith.mulf %208, %216 : vector<8x32xf32>
    %225 = arith.addf %223, %224 : vector<8x32xf32>
    %226 = math.tanh %225 : vector<8x32xf32>
    %227 = arith.mulf %222, %226 : vector<8x32xf32>
    %228 = arith.truncf %202 : vector<8x32xf32> to vector<8x32xbf16>
    %c16_54 = arith.constant 16 : index
    %c0_55 = arith.constant 0 : index
    %229 = vector.load %arg7[%c16_54, %c0_55] : memref<64x64xbf16, #tpu.memory_space<vmem>>, vector<8x32xbf16>
    tpu.vector_store %arg7[%c16_54, %c0_55], %228 {strides = array<i32>} : memref<64x64xbf16, #tpu.memory_space<vmem>>, vector<8x32xbf16>,
    %230 = arith.truncf %227 : vector<8x32xf32> to vector<8x32xbf16>
    %c40_56 = arith.constant 40 : index
    %c32_57 = arith.constant 32 : index
    %231 = vector.load %arg7[%c40_56, %c32_57] : memref<64x64xbf16, #tpu.memory_space<vmem>>, vector<8x32xbf16>
    tpu.vector_store %arg7[%c40_56, %c32_57], %230 {strides = array<i32>} : memref<64x64xbf16, #tpu.memory_space<vmem>>, vector<8x32xbf16>,
    %c2_i32 = arith.constant 2 : i32
    %232 = vector.broadcast %c2_i32 : i32 to vector<8x1xi32>
    %233 = arith.cmpi sgt, %9, %232 : vector<8x1xi32>
    %c5_i32 = arith.constant 5 : i32
    %234 = vector.broadcast %c5_i32 : i32 to vector<8x1xi32>
    %235 = arith.cmpi sgt, %9, %234 : vector<8x1xi32>
    %236 = vector.shape_cast %233 : vector<8x1xi1> to vector<8x1xi1>
    %237 = vector.broadcast %236 : vector<8x1xi1> to vector<8x32xi1>
    %238 = arith.select %237, %202, %160 : vector<8x32xi1>, vector<8x32xf32>
    %239 = vector.shape_cast %233 : vector<8x1xi1> to vector<8x1xi1>
    %240 = vector.broadcast %239 : vector<8x1xi1> to vector<8x32xi1>
    %241 = arith.select %240, %200, %163 : vector<8x32xi1>, vector<8x32xf32>
    %242 = vector.shape_cast %235 : vector<8x1xi1> to vector<8x1xi1>
    %243 = vector.broadcast %242 : vector<8x1xi1> to vector<8x32xi1>
    %244 = arith.select %243, %227, %166 : vector<8x32xi1>, vector<8x32xf32>
    %245 = vector.shape_cast %235 : vector<8x1xi1> to vector<8x1xi1>
    %246 = vector.broadcast %245 : vector<8x1xi1> to vector<8x32xi1>
    %247 = arith.select %246, %225, %169 : vector<8x32xi1>, vector<8x32xf32>
    %c24 = arith.constant 24 : index
    %c0_58 = arith.constant 0 : index
    %248 = vector.load %arg9[%c24, %c0_58] : memref<64x256xf32, #tpu.memory_space<vmem>>, vector<8x128xf32>
    %249 = arith.truncf %238 : vector<8x32xf32> to vector<8x32xbf16>
    %cst_59 = arith.constant dense<0.000000e+00> : vector<8x128xf32>
    %250 = tpu.matmul %249, %7, %cst_59 {dimension_numbers = #tpu.dot_dimension_numbers<[1], [0], [0], [1], [0, 0, 1, 1], [], []>} : vector<8x32xbf16>, vector<32x128xbf16>, vector<8x128xf32> -> vector<8x128xf32>
    %251 = arith.addf %248, %250 : vector<8x128xf32>
    %c32_60 = arith.constant 32 : index
    %c128_61 = arith.constant 128 : index
    %252 = vector.load %arg9[%c32_60, %c128_61] : memref<64x256xf32, #tpu.memory_space<vmem>>, vector<8x128xf32>
    %253 = arith.truncf %244 : vector<8x32xf32> to vector<8x32xbf16>
    %cst_62 = arith.constant dense<0.000000e+00> : vector<8x128xf32>
    %254 = tpu.matmul %253, %8, %cst_62 {dimension_numbers = #tpu.dot_dimension_numbers<[1], [0], [0], [1], [0, 0, 1, 1], [], []>} : vector<8x32xbf16>, vector<32x128xbf16>, vector<8x128xf32> -> vector<8x128xf32>
    %255 = arith.addf %252, %254 : vector<8x128xf32>
    %256 = vector.extract_strided_slice %251 {offsets = [0, 0], sizes = [8, 32], strides = [1, 1]} : vector<8x128xf32> to vector<8x32xf32>
    %257 = arith.negf %256 : vector<8x32xf32>
    %258 = math.exp %257 : vector<8x32xf32>
    %cst_63 = arith.constant 1.000000e+00 : f32
    %259 = vector.broadcast %cst_63 : f32 to vector<8x32xf32>
    %260 = arith.addf %259, %258 : vector<8x32xf32>
    %261 = arith.divf %259, %260 : vector<8x32xf32>
    %262 = vector.extract_strided_slice %251 {offsets = [0, 32], sizes = [8, 32], strides = [1, 1]} : vector<8x128xf32> to vector<8x32xf32>
    %263 = arith.negf %262 : vector<8x32xf32>
    %264 = math.exp %263 : vector<8x32xf32>
    %cst_64 = arith.constant 1.000000e+00 : f32
    %265 = vector.broadcast %cst_64 : f32 to vector<8x32xf32>
    %266 = arith.addf %265, %264 : vector<8x32xf32>
    %267 = arith.divf %265, %266 : vector<8x32xf32>
    %268 = vector.extract_strided_slice %251 {offsets = [0, 64], sizes = [8, 32], strides = [1, 1]} : vector<8x128xf32> to vector<8x32xf32>
    %269 = math.tanh %268 : vector<8x32xf32>
    %270 = vector.extract_strided_slice %251 {offsets = [0, 96], sizes = [8, 32], strides = [1, 1]} : vector<8x128xf32> to vector<8x32xf32>
    %271 = arith.negf %270 : vector<8x32xf32>
    %272 = math.exp %271 : vector<8x32xf32>
    %cst_65 = arith.constant 1.000000e+00 : f32
    %273 = vector.broadcast %cst_65 : f32 to vector<8x32xf32>
    %274 = arith.addf %273, %272 : vector<8x32xf32>
    %275 = arith.divf %273, %274 : vector<8x32xf32>
    %276 = arith.mulf %267, %241 : vector<8x32xf32>
    %277 = arith.mulf %261, %269 : vector<8x32xf32>
    %278 = arith.addf %276, %277 : vector<8x32xf32>
    %279 = math.tanh %278 : vector<8x32xf32>
    %280 = arith.mulf %275, %279 : vector<8x32xf32>
    %281 = vector.extract_strided_slice %255 {offsets = [0, 0], sizes = [8, 32], strides = [1, 1]} : vector<8x128xf32> to vector<8x32xf32>
    %282 = arith.negf %281 : vector<8x32xf32>
    %283 = math.exp %282 : vector<8x32xf32>
    %cst_66 = arith.constant 1.000000e+00 : f32
    %284 = vector.broadcast %cst_66 : f32 to vector<8x32xf32>
    %285 = arith.addf %284, %283 : vector<8x32xf32>
    %286 = arith.divf %284, %285 : vector<8x32xf32>
    %287 = vector.extract_strided_slice %255 {offsets = [0, 32], sizes = [8, 32], strides = [1, 1]} : vector<8x128xf32> to vector<8x32xf32>
    %288 = arith.negf %287 : vector<8x32xf32>
    %289 = math.exp %288 : vector<8x32xf32>
    %cst_67 = arith.constant 1.000000e+00 : f32
    %290 = vector.broadcast %cst_67 : f32 to vector<8x32xf32>
    %291 = arith.addf %290, %289 : vector<8x32xf32>
    %292 = arith.divf %290, %291 : vector<8x32xf32>
    %293 = vector.extract_strided_slice %255 {offsets = [0, 64], sizes = [8, 32], strides = [1, 1]} : vector<8x128xf32> to vector<8x32xf32>
    %294 = math.tanh %293 : vector<8x32xf32>
    %295 = vector.extract_strided_slice %255 {offsets = [0, 96], sizes = [8, 32], strides = [1, 1]} : vector<8x128xf32> to vector<8x32xf32>
    %296 = arith.negf %295 : vector<8x32xf32>
    %297 = math.exp %296 : vector<8x32xf32>
    %cst_68 = arith.constant 1.000000e+00 : f32
    %298 = vector.broadcast %cst_68 : f32 to vector<8x32xf32>
    %299 = arith.addf %298, %297 : vector<8x32xf32>
    %300 = arith.divf %298, %299 : vector<8x32xf32>
    %301 = arith.mulf %292, %247 : vector<8x32xf32>
    %302 = arith.mulf %286, %294 : vector<8x32xf32>
    %303 = arith.addf %301, %302 : vector<8x32xf32>
    %304 = math.tanh %303 : vector<8x32xf32>
    %305 = arith.mulf %300, %304 : vector<8x32xf32>
    %306 = arith.truncf %280 : vector<8x32xf32> to vector<8x32xbf16>
    %c24_69 = arith.constant 24 : index
    %c0_70 = arith.constant 0 : index
    %307 = vector.load %arg7[%c24_69, %c0_70] : memref<64x64xbf16, #tpu.memory_space<vmem>>, vector<8x32xbf16>
    tpu.vector_store %arg7[%c24_69, %c0_70], %306 {strides = array<i32>} : memref<64x64xbf16, #tpu.memory_space<vmem>>, vector<8x32xbf16>,
    %308 = arith.truncf %305 : vector<8x32xf32> to vector<8x32xbf16>
    %c32_71 = arith.constant 32 : index
    %c32_72 = arith.constant 32 : index
    %309 = vector.load %arg7[%c32_71, %c32_72] : memref<64x64xbf16, #tpu.memory_space<vmem>>, vector<8x32xbf16>
    tpu.vector_store %arg7[%c32_71, %c32_72], %308 {strides = array<i32>} : memref<64x64xbf16, #tpu.memory_space<vmem>>, vector<8x32xbf16>,
    %c3_i32 = arith.constant 3 : i32
    %310 = vector.broadcast %c3_i32 : i32 to vector<8x1xi32>
    %311 = arith.cmpi sgt, %9, %310 : vector<8x1xi32>
    %c4_i32 = arith.constant 4 : i32
    %312 = vector.broadcast %c4_i32 : i32 to vector<8x1xi32>
    %313 = arith.cmpi sgt, %9, %312 : vector<8x1xi32>
    %314 = vector.shape_cast %311 : vector<8x1xi1> to vector<8x1xi1>
    %315 = vector.broadcast %314 : vector<8x1xi1> to vector<8x32xi1>
    %316 = arith.select %315, %280, %238 : vector<8x32xi1>, vector<8x32xf32>
    %317 = vector.shape_cast %311 : vector<8x1xi1> to vector<8x1xi1>
    %318 = vector.broadcast %317 : vector<8x1xi1> to vector<8x32xi1>
    %319 = arith.select %318, %278, %241 : vector<8x32xi1>, vector<8x32xf32>
    %320 = vector.shape_cast %313 : vector<8x1xi1> to vector<8x1xi1>
    %321 = vector.broadcast %320 : vector<8x1xi1> to vector<8x32xi1>
    %322 = arith.select %321, %305, %244 : vector<8x32xi1>, vector<8x32xf32>
    %323 = vector.shape_cast %313 : vector<8x1xi1> to vector<8x1xi1>
    %324 = vector.broadcast %323 : vector<8x1xi1> to vector<8x32xi1>
    %325 = arith.select %324, %303, %247 : vector<8x32xi1>, vector<8x32xf32>
    %c32_73 = arith.constant 32 : index
    %c0_74 = arith.constant 0 : index
    %326 = vector.load %arg9[%c32_73, %c0_74] : memref<64x256xf32, #tpu.memory_space<vmem>>, vector<8x128xf32>
    %327 = arith.truncf %316 : vector<8x32xf32> to vector<8x32xbf16>
    %cst_75 = arith.constant dense<0.000000e+00> : vector<8x128xf32>
    %328 = tpu.matmul %327, %7, %cst_75 {dimension_numbers = #tpu.dot_dimension_numbers<[1], [0], [0], [1], [0, 0, 1, 1], [], []>} : vector<8x32xbf16>, vector<32x128xbf16>, vector<8x128xf32> -> vector<8x128xf32>
    %329 = arith.addf %326, %328 : vector<8x128xf32>
    %c24_76 = arith.constant 24 : index
    %c128_77 = arith.constant 128 : index
    %330 = vector.load %arg9[%c24_76, %c128_77] : memref<64x256xf32, #tpu.memory_space<vmem>>, vector<8x128xf32>
    %331 = arith.truncf %322 : vector<8x32xf32> to vector<8x32xbf16>
    %cst_78 = arith.constant dense<0.000000e+00> : vector<8x128xf32>
    %332 = tpu.matmul %331, %8, %cst_78 {dimension_numbers = #tpu.dot_dimension_numbers<[1], [0], [0], [1], [0, 0, 1, 1], [], []>} : vector<8x32xbf16>, vector<32x128xbf16>, vector<8x128xf32> -> vector<8x128xf32>
    %333 = arith.addf %330, %332 : vector<8x128xf32>
    %334 = vector.extract_strided_slice %329 {offsets = [0, 0], sizes = [8, 32], strides = [1, 1]} : vector<8x128xf32> to vector<8x32xf32>
    %335 = arith.negf %334 : vector<8x32xf32>
    %336 = math.exp %335 : vector<8x32xf32>
    %cst_79 = arith.constant 1.000000e+00 : f32
    %337 = vector.broadcast %cst_79 : f32 to vector<8x32xf32>
    %338 = arith.addf %337, %336 : vector<8x32xf32>
    %339 = arith.divf %337, %338 : vector<8x32xf32>
    %340 = vector.extract_strided_slice %329 {offsets = [0, 32], sizes = [8, 32], strides = [1, 1]} : vector<8x128xf32> to vector<8x32xf32>
    %341 = arith.negf %340 : vector<8x32xf32>
    %342 = math.exp %341 : vector<8x32xf32>
    %cst_80 = arith.constant 1.000000e+00 : f32
    %343 = vector.broadcast %cst_80 : f32 to vector<8x32xf32>
    %344 = arith.addf %343, %342 : vector<8x32xf32>
    %345 = arith.divf %343, %344 : vector<8x32xf32>
    %346 = vector.extract_strided_slice %329 {offsets = [0, 64], sizes = [8, 32], strides = [1, 1]} : vector<8x128xf32> to vector<8x32xf32>
    %347 = math.tanh %346 : vector<8x32xf32>
    %348 = vector.extract_strided_slice %329 {offsets = [0, 96], sizes = [8, 32], strides = [1, 1]} : vector<8x128xf32> to vector<8x32xf32>
    %349 = arith.negf %348 : vector<8x32xf32>
    %350 = math.exp %349 : vector<8x32xf32>
    %cst_81 = arith.constant 1.000000e+00 : f32
    %351 = vector.broadcast %cst_81 : f32 to vector<8x32xf32>
    %352 = arith.addf %351, %350 : vector<8x32xf32>
    %353 = arith.divf %351, %352 : vector<8x32xf32>
    %354 = arith.mulf %345, %319 : vector<8x32xf32>
    %355 = arith.mulf %339, %347 : vector<8x32xf32>
    %356 = arith.addf %354, %355 : vector<8x32xf32>
    %357 = math.tanh %356 : vector<8x32xf32>
    %358 = arith.mulf %353, %357 : vector<8x32xf32>
    %359 = vector.extract_strided_slice %333 {offsets = [0, 0], sizes = [8, 32], strides = [1, 1]} : vector<8x128xf32> to vector<8x32xf32>
    %360 = arith.negf %359 : vector<8x32xf32>
    %361 = math.exp %360 : vector<8x32xf32>
    %cst_82 = arith.constant 1.000000e+00 : f32
    %362 = vector.broadcast %cst_82 : f32 to vector<8x32xf32>
    %363 = arith.addf %362, %361 : vector<8x32xf32>
    %364 = arith.divf %362, %363 : vector<8x32xf32>
    %365 = vector.extract_strided_slice %333 {offsets = [0, 32], sizes = [8, 32], strides = [1, 1]} : vector<8x128xf32> to vector<8x32xf32>
    %366 = arith.negf %365 : vector<8x32xf32>
    %367 = math.exp %366 : vector<8x32xf32>
    %cst_83 = arith.constant 1.000000e+00 : f32
    %368 = vector.broadcast %cst_83 : f32 to vector<8x32xf32>
    %369 = arith.addf %368, %367 : vector<8x32xf32>
    %370 = arith.divf %368, %369 : vector<8x32xf32>
    %371 = vector.extract_strided_slice %333 {offsets = [0, 64], sizes = [8, 32], strides = [1, 1]} : vector<8x128xf32> to vector<8x32xf32>
    %372 = math.tanh %371 : vector<8x32xf32>
    %373 = vector.extract_strided_slice %333 {offsets = [0, 96], sizes = [8, 32], strides = [1, 1]} : vector<8x128xf32> to vector<8x32xf32>
    %374 = arith.negf %373 : vector<8x32xf32>
    %375 = math.exp %374 : vector<8x32xf32>
    %cst_84 = arith.constant 1.000000e+00 : f32
    %376 = vector.broadcast %cst_84 : f32 to vector<8x32xf32>
    %377 = arith.addf %376, %375 : vector<8x32xf32>
    %378 = arith.divf %376, %377 : vector<8x32xf32>
    %379 = arith.mulf %370, %325 : vector<8x32xf32>
    %380 = arith.mulf %364, %372 : vector<8x32xf32>
    %381 = arith.addf %379, %380 : vector<8x32xf32>
    %382 = math.tanh %381 : vector<8x32xf32>
    %383 = arith.mulf %378, %382 : vector<8x32xf32>
    %384 = arith.truncf %358 : vector<8x32xf32> to vector<8x32xbf16>
    %c32_85 = arith.constant 32 : index
    %c0_86 = arith.constant 0 : index
    %385 = vector.load %arg7[%c32_85, %c0_86] : memref<64x64xbf16, #tpu.memory_space<vmem>>, vector<8x32xbf16>
    tpu.vector_store %arg7[%c32_85, %c0_86], %384 {strides = array<i32>} : memref<64x64xbf16, #tpu.memory_space<vmem>>, vector<8x32xbf16>,
    %386 = arith.truncf %383 : vector<8x32xf32> to vector<8x32xbf16>
    %c24_87 = arith.constant 24 : index
    %c32_88 = arith.constant 32 : index
    %387 = vector.load %arg7[%c24_87, %c32_88] : memref<64x64xbf16, #tpu.memory_space<vmem>>, vector<8x32xbf16>
    tpu.vector_store %arg7[%c24_87, %c32_88], %386 {strides = array<i32>} : memref<64x64xbf16, #tpu.memory_space<vmem>>, vector<8x32xbf16>,
    %c4_i32_89 = arith.constant 4 : i32
    %388 = vector.broadcast %c4_i32_89 : i32 to vector<8x1xi32>
    %389 = arith.cmpi sgt, %9, %388 : vector<8x1xi32>
    %c3_i32_90 = arith.constant 3 : i32
    %390 = vector.broadcast %c3_i32_90 : i32 to vector<8x1xi32>
    %391 = arith.cmpi sgt, %9, %390 : vector<8x1xi32>
    %392 = vector.shape_cast %389 : vector<8x1xi1> to vector<8x1xi1>
    %393 = vector.broadcast %392 : vector<8x1xi1> to vector<8x32xi1>
    %394 = arith.select %393, %358, %316 : vector<8x32xi1>, vector<8x32xf32>
    %395 = vector.shape_cast %389 : vector<8x1xi1> to vector<8x1xi1>
    %396 = vector.broadcast %395 : vector<8x1xi1> to vector<8x32xi1>
    %397 = arith.select %396, %356, %319 : vector<8x32xi1>, vector<8x32xf32>
    %398 = vector.shape_cast %391 : vector<8x1xi1> to vector<8x1xi1>
    %399 = vector.broadcast %398 : vector<8x1xi1> to vector<8x32xi1>
    %400 = arith.select %399, %383, %322 : vector<8x32xi1>, vector<8x32xf32>
    %401 = vector.shape_cast %391 : vector<8x1xi1> to vector<8x1xi1>
    %402 = vector.broadcast %401 : vector<8x1xi1> to vector<8x32xi1>
    %403 = arith.select %402, %381, %325 : vector<8x32xi1>, vector<8x32xf32>
    %c40_91 = arith.constant 40 : index
    %c0_92 = arith.constant 0 : index
    %404 = vector.load %arg9[%c40_91, %c0_92] : memref<64x256xf32, #tpu.memory_space<vmem>>, vector<8x128xf32>
    %405 = arith.truncf %394 : vector<8x32xf32> to vector<8x32xbf16>
    %cst_93 = arith.constant dense<0.000000e+00> : vector<8x128xf32>
    %406 = tpu.matmul %405, %7, %cst_93 {dimension_numbers = #tpu.dot_dimension_numbers<[1], [0], [0], [1], [0, 0, 1, 1], [], []>} : vector<8x32xbf16>, vector<32x128xbf16>, vector<8x128xf32> -> vector<8x128xf32>
    %407 = arith.addf %404, %406 : vector<8x128xf32>
    %c16_94 = arith.constant 16 : index
    %c128_95 = arith.constant 128 : index
    %408 = vector.load %arg9[%c16_94, %c128_95] : memref<64x256xf32, #tpu.memory_space<vmem>>, vector<8x128xf32>
    %409 = arith.truncf %400 : vector<8x32xf32> to vector<8x32xbf16>
    %cst_96 = arith.constant dense<0.000000e+00> : vector<8x128xf32>
    %410 = tpu.matmul %409, %8, %cst_96 {dimension_numbers = #tpu.dot_dimension_numbers<[1], [0], [0], [1], [0, 0, 1, 1], [], []>} : vector<8x32xbf16>, vector<32x128xbf16>, vector<8x128xf32> -> vector<8x128xf32>
    %411 = arith.addf %408, %410 : vector<8x128xf32>
    %412 = vector.extract_strided_slice %407 {offsets = [0, 0], sizes = [8, 32], strides = [1, 1]} : vector<8x128xf32> to vector<8x32xf32>
    %413 = arith.negf %412 : vector<8x32xf32>
    %414 = math.exp %413 : vector<8x32xf32>
    %cst_97 = arith.constant 1.000000e+00 : f32
    %415 = vector.broadcast %cst_97 : f32 to vector<8x32xf32>
    %416 = arith.addf %415, %414 : vector<8x32xf32>
    %417 = arith.divf %415, %416 : vector<8x32xf32>
    %418 = vector.extract_strided_slice %407 {offsets = [0, 32], sizes = [8, 32], strides = [1, 1]} : vector<8x128xf32> to vector<8x32xf32>
    %419 = arith.negf %418 : vector<8x32xf32>
    %420 = math.exp %419 : vector<8x32xf32>
    %cst_98 = arith.constant 1.000000e+00 : f32
    %421 = vector.broadcast %cst_98 : f32 to vector<8x32xf32>
    %422 = arith.addf %421, %420 : vector<8x32xf32>
    %423 = arith.divf %421, %422 : vector<8x32xf32>
    %424 = vector.extract_strided_slice %407 {offsets = [0, 64], sizes = [8, 32], strides = [1, 1]} : vector<8x128xf32> to vector<8x32xf32>
    %425 = math.tanh %424 : vector<8x32xf32>
    %426 = vector.extract_strided_slice %407 {offsets = [0, 96], sizes = [8, 32], strides = [1, 1]} : vector<8x128xf32> to vector<8x32xf32>
    %427 = arith.negf %426 : vector<8x32xf32>
    %428 = math.exp %427 : vector<8x32xf32>
    %cst_99 = arith.constant 1.000000e+00 : f32
    %429 = vector.broadcast %cst_99 : f32 to vector<8x32xf32>
    %430 = arith.addf %429, %428 : vector<8x32xf32>
    %431 = arith.divf %429, %430 : vector<8x32xf32>
    %432 = arith.mulf %423, %397 : vector<8x32xf32>
    %433 = arith.mulf %417, %425 : vector<8x32xf32>
    %434 = arith.addf %432, %433 : vector<8x32xf32>
    %435 = math.tanh %434 : vector<8x32xf32>
    %436 = arith.mulf %431, %435 : vector<8x32xf32>
    %437 = vector.extract_strided_slice %411 {offsets = [0, 0], sizes = [8, 32], strides = [1, 1]} : vector<8x128xf32> to vector<8x32xf32>
    %438 = arith.negf %437 : vector<8x32xf32>
    %439 = math.exp %438 : vector<8x32xf32>
    %cst_100 = arith.constant 1.000000e+00 : f32
    %440 = vector.broadcast %cst_100 : f32 to vector<8x32xf32>
    %441 = arith.addf %440, %439 : vector<8x32xf32>
    %442 = arith.divf %440, %441 : vector<8x32xf32>
    %443 = vector.extract_strided_slice %411 {offsets = [0, 32], sizes = [8, 32], strides = [1, 1]} : vector<8x128xf32> to vector<8x32xf32>
    %444 = arith.negf %443 : vector<8x32xf32>
    %445 = math.exp %444 : vector<8x32xf32>
    %cst_101 = arith.constant 1.000000e+00 : f32
    %446 = vector.broadcast %cst_101 : f32 to vector<8x32xf32>
    %447 = arith.addf %446, %445 : vector<8x32xf32>
    %448 = arith.divf %446, %447 : vector<8x32xf32>
    %449 = vector.extract_strided_slice %411 {offsets = [0, 64], sizes = [8, 32], strides = [1, 1]} : vector<8x128xf32> to vector<8x32xf32>
    %450 = math.tanh %449 : vector<8x32xf32>
    %451 = vector.extract_strided_slice %411 {offsets = [0, 96], sizes = [8, 32], strides = [1, 1]} : vector<8x128xf32> to vector<8x32xf32>
    %452 = arith.negf %451 : vector<8x32xf32>
    %453 = math.exp %452 : vector<8x32xf32>
    %cst_102 = arith.constant 1.000000e+00 : f32
    %454 = vector.broadcast %cst_102 : f32 to vector<8x32xf32>
    %455 = arith.addf %454, %453 : vector<8x32xf32>
    %456 = arith.divf %454, %455 : vector<8x32xf32>
    %457 = arith.mulf %448, %403 : vector<8x32xf32>
    %458 = arith.mulf %442, %450 : vector<8x32xf32>
    %459 = arith.addf %457, %458 : vector<8x32xf32>
    %460 = math.tanh %459 : vector<8x32xf32>
    %461 = arith.mulf %456, %460 : vector<8x32xf32>
    %462 = arith.truncf %436 : vector<8x32xf32> to vector<8x32xbf16>
    %c40_103 = arith.constant 40 : index
    %c0_104 = arith.constant 0 : index
    %463 = vector.load %arg7[%c40_103, %c0_104] : memref<64x64xbf16, #tpu.memory_space<vmem>>, vector<8x32xbf16>
    tpu.vector_store %arg7[%c40_103, %c0_104], %462 {strides = array<i32>} : memref<64x64xbf16, #tpu.memory_space<vmem>>, vector<8x32xbf16>,
    %464 = arith.truncf %461 : vector<8x32xf32> to vector<8x32xbf16>
    %c16_105 = arith.constant 16 : index
    %c32_106 = arith.constant 32 : index
    %465 = vector.load %arg7[%c16_105, %c32_106] : memref<64x64xbf16, #tpu.memory_space<vmem>>, vector<8x32xbf16>
    tpu.vector_store %arg7[%c16_105, %c32_106], %464 {strides = array<i32>} : memref<64x64xbf16, #tpu.memory_space<vmem>>, vector<8x32xbf16>,
    %c5_i32_107 = arith.constant 5 : i32
    %466 = vector.broadcast %c5_i32_107 : i32 to vector<8x1xi32>
    %467 = arith.cmpi sgt, %9, %466 : vector<8x1xi32>
    %c2_i32_108 = arith.constant 2 : i32
    %468 = vector.broadcast %c2_i32_108 : i32 to vector<8x1xi32>
    %469 = arith.cmpi sgt, %9, %468 : vector<8x1xi32>
    %470 = vector.shape_cast %467 : vector<8x1xi1> to vector<8x1xi1>
    %471 = vector.broadcast %470 : vector<8x1xi1> to vector<8x32xi1>
    %472 = arith.select %471, %436, %394 : vector<8x32xi1>, vector<8x32xf32>
    %473 = vector.shape_cast %467 : vector<8x1xi1> to vector<8x1xi1>
    %474 = vector.broadcast %473 : vector<8x1xi1> to vector<8x32xi1>
    %475 = arith.select %474, %434, %397 : vector<8x32xi1>, vector<8x32xf32>
    %476 = vector.shape_cast %469 : vector<8x1xi1> to vector<8x1xi1>
    %477 = vector.broadcast %476 : vector<8x1xi1> to vector<8x32xi1>
    %478 = arith.select %477, %461, %400 : vector<8x32xi1>, vector<8x32xf32>
    %479 = vector.shape_cast %469 : vector<8x1xi1> to vector<8x1xi1>
    %480 = vector.broadcast %479 : vector<8x1xi1> to vector<8x32xi1>
    %481 = arith.select %480, %459, %403 : vector<8x32xi1>, vector<8x32xf32>
    %c48_109 = arith.constant 48 : index
    %c0_110 = arith.constant 0 : index
    %482 = vector.load %arg9[%c48_109, %c0_110] : memref<64x256xf32, #tpu.memory_space<vmem>>, vector<8x128xf32>
    %483 = arith.truncf %472 : vector<8x32xf32> to vector<8x32xbf16>
    %cst_111 = arith.constant dense<0.000000e+00> : vector<8x128xf32>
    %484 = tpu.matmul %483, %7, %cst_111 {dimension_numbers = #tpu.dot_dimension_numbers<[1], [0], [0], [1], [0, 0, 1, 1], [], []>} : vector<8x32xbf16>, vector<32x128xbf16>, vector<8x128xf32> -> vector<8x128xf32>
    %485 = arith.addf %482, %484 : vector<8x128xf32>
    %c8_112 = arith.constant 8 : index
    %c128_113 = arith.constant 128 : index
    %486 = vector.load %arg9[%c8_112, %c128_113] : memref<64x256xf32, #tpu.memory_space<vmem>>, vector<8x128xf32>
    %487 = arith.truncf %478 : vector<8x32xf32> to vector<8x32xbf16>
    %cst_114 = arith.constant dense<0.000000e+00> : vector<8x128xf32>
    %488 = tpu.matmul %487, %8, %cst_114 {dimension_numbers = #tpu.dot_dimension_numbers<[1], [0], [0], [1], [0, 0, 1, 1], [], []>} : vector<8x32xbf16>, vector<32x128xbf16>, vector<8x128xf32> -> vector<8x128xf32>
    %489 = arith.addf %486, %488 : vector<8x128xf32>
    %490 = vector.extract_strided_slice %485 {offsets = [0, 0], sizes = [8, 32], strides = [1, 1]} : vector<8x128xf32> to vector<8x32xf32>
    %491 = arith.negf %490 : vector<8x32xf32>
    %492 = math.exp %491 : vector<8x32xf32>
    %cst_115 = arith.constant 1.000000e+00 : f32
    %493 = vector.broadcast %cst_115 : f32 to vector<8x32xf32>
    %494 = arith.addf %493, %492 : vector<8x32xf32>
    %495 = arith.divf %493, %494 : vector<8x32xf32>
    %496 = vector.extract_strided_slice %485 {offsets = [0, 32], sizes = [8, 32], strides = [1, 1]} : vector<8x128xf32> to vector<8x32xf32>
    %497 = arith.negf %496 : vector<8x32xf32>
    %498 = math.exp %497 : vector<8x32xf32>
    %cst_116 = arith.constant 1.000000e+00 : f32
    %499 = vector.broadcast %cst_116 : f32 to vector<8x32xf32>
    %500 = arith.addf %499, %498 : vector<8x32xf32>
    %501 = arith.divf %499, %500 : vector<8x32xf32>
    %502 = vector.extract_strided_slice %485 {offsets = [0, 64], sizes = [8, 32], strides = [1, 1]} : vector<8x128xf32> to vector<8x32xf32>
    %503 = math.tanh %502 : vector<8x32xf32>
    %504 = vector.extract_strided_slice %485 {offsets = [0, 96], sizes = [8, 32], strides = [1, 1]} : vector<8x128xf32> to vector<8x32xf32>
    %505 = arith.negf %504 : vector<8x32xf32>
    %506 = math.exp %505 : vector<8x32xf32>
    %cst_117 = arith.constant 1.000000e+00 : f32
    %507 = vector.broadcast %cst_117 : f32 to vector<8x32xf32>
    %508 = arith.addf %507, %506 : vector<8x32xf32>
    %509 = arith.divf %507, %508 : vector<8x32xf32>
    %510 = arith.mulf %501, %475 : vector<8x32xf32>
    %511 = arith.mulf %495, %503 : vector<8x32xf32>
    %512 = arith.addf %510, %511 : vector<8x32xf32>
    %513 = math.tanh %512 : vector<8x32xf32>
    %514 = arith.mulf %509, %513 : vector<8x32xf32>
    %515 = vector.extract_strided_slice %489 {offsets = [0, 0], sizes = [8, 32], strides = [1, 1]} : vector<8x128xf32> to vector<8x32xf32>
    %516 = arith.negf %515 : vector<8x32xf32>
    %517 = math.exp %516 : vector<8x32xf32>
    %cst_118 = arith.constant 1.000000e+00 : f32
    %518 = vector.broadcast %cst_118 : f32 to vector<8x32xf32>
    %519 = arith.addf %518, %517 : vector<8x32xf32>
    %520 = arith.divf %518, %519 : vector<8x32xf32>
    %521 = vector.extract_strided_slice %489 {offsets = [0, 32], sizes = [8, 32], strides = [1, 1]} : vector<8x128xf32> to vector<8x32xf32>
    %522 = arith.negf %521 : vector<8x32xf32>
    %523 = math.exp %522 : vector<8x32xf32>
    %cst_119 = arith.constant 1.000000e+00 : f32
    %524 = vector.broadcast %cst_119 : f32 to vector<8x32xf32>
    %525 = arith.addf %524, %523 : vector<8x32xf32>
    %526 = arith.divf %524, %525 : vector<8x32xf32>
    %527 = vector.extract_strided_slice %489 {offsets = [0, 64], sizes = [8, 32], strides = [1, 1]} : vector<8x128xf32> to vector<8x32xf32>
    %528 = math.tanh %527 : vector<8x32xf32>
    %529 = vector.extract_strided_slice %489 {offsets = [0, 96], sizes = [8, 32], strides = [1, 1]} : vector<8x128xf32> to vector<8x32xf32>
    %530 = arith.negf %529 : vector<8x32xf32>
    %531 = math.exp %530 : vector<8x32xf32>
    %cst_120 = arith.constant 1.000000e+00 : f32
    %532 = vector.broadcast %cst_120 : f32 to vector<8x32xf32>
    %533 = arith.addf %532, %531 : vector<8x32xf32>
    %534 = arith.divf %532, %533 : vector<8x32xf32>
    %535 = arith.mulf %526, %481 : vector<8x32xf32>
    %536 = arith.mulf %520, %528 : vector<8x32xf32>
    %537 = arith.addf %535, %536 : vector<8x32xf32>
    %538 = math.tanh %537 : vector<8x32xf32>
    %539 = arith.mulf %534, %538 : vector<8x32xf32>
    %540 = arith.truncf %514 : vector<8x32xf32> to vector<8x32xbf16>
    %c48_121 = arith.constant 48 : index
    %c0_122 = arith.constant 0 : index
    %541 = vector.load %arg7[%c48_121, %c0_122] : memref<64x64xbf16, #tpu.memory_space<vmem>>, vector<8x32xbf16>
    tpu.vector_store %arg7[%c48_121, %c0_122], %540 {strides = array<i32>} : memref<64x64xbf16, #tpu.memory_space<vmem>>, vector<8x32xbf16>,
    %542 = arith.truncf %539 : vector<8x32xf32> to vector<8x32xbf16>
    %c8_123 = arith.constant 8 : index
    %c32_124 = arith.constant 32 : index
    %543 = vector.load %arg7[%c8_123, %c32_124] : memref<64x64xbf16, #tpu.memory_space<vmem>>, vector<8x32xbf16>
    tpu.vector_store %arg7[%c8_123, %c32_124], %542 {strides = array<i32>} : memref<64x64xbf16, #tpu.memory_space<vmem>>, vector<8x32xbf16>,
    %c6_i32_125 = arith.constant 6 : i32
    %544 = vector.broadcast %c6_i32_125 : i32 to vector<8x1xi32>
    %545 = arith.cmpi sgt, %9, %544 : vector<8x1xi32>
    %c1_i32_126 = arith.constant 1 : i32
    %546 = vector.broadcast %c1_i32_126 : i32 to vector<8x1xi32>
    %547 = arith.cmpi sgt, %9, %546 : vector<8x1xi32>
    %548 = vector.shape_cast %545 : vector<8x1xi1> to vector<8x1xi1>
    %549 = vector.broadcast %548 : vector<8x1xi1> to vector<8x32xi1>
    %550 = arith.select %549, %514, %472 : vector<8x32xi1>, vector<8x32xf32>
    %551 = vector.shape_cast %545 : vector<8x1xi1> to vector<8x1xi1>
    %552 = vector.broadcast %551 : vector<8x1xi1> to vector<8x32xi1>
    %553 = arith.select %552, %512, %475 : vector<8x32xi1>, vector<8x32xf32>
    %554 = vector.shape_cast %547 : vector<8x1xi1> to vector<8x1xi1>
    %555 = vector.broadcast %554 : vector<8x1xi1> to vector<8x32xi1>
    %556 = arith.select %555, %539, %478 : vector<8x32xi1>, vector<8x32xf32>
    %557 = vector.shape_cast %547 : vector<8x1xi1> to vector<8x1xi1>
    %558 = vector.broadcast %557 : vector<8x1xi1> to vector<8x32xi1>
    %559 = arith.select %558, %537, %481 : vector<8x32xi1>, vector<8x32xf32>
    %c56_127 = arith.constant 56 : index
    %c0_128 = arith.constant 0 : index
    %560 = vector.load %arg9[%c56_127, %c0_128] : memref<64x256xf32, #tpu.memory_space<vmem>>, vector<8x128xf32>
    %561 = arith.truncf %550 : vector<8x32xf32> to vector<8x32xbf16>
    %cst_129 = arith.constant dense<0.000000e+00> : vector<8x128xf32>
    %562 = tpu.matmul %561, %7, %cst_129 {dimension_numbers = #tpu.dot_dimension_numbers<[1], [0], [0], [1], [0, 0, 1, 1], [], []>} : vector<8x32xbf16>, vector<32x128xbf16>, vector<8x128xf32> -> vector<8x128xf32>
    %563 = arith.addf %560, %562 : vector<8x128xf32>
    %c0_130 = arith.constant 0 : index
    %c128_131 = arith.constant 128 : index
    %564 = vector.load %arg9[%c0_130, %c128_131] : memref<64x256xf32, #tpu.memory_space<vmem>>, vector<8x128xf32>
    %565 = arith.truncf %556 : vector<8x32xf32> to vector<8x32xbf16>
    %cst_132 = arith.constant dense<0.000000e+00> : vector<8x128xf32>
    %566 = tpu.matmul %565, %8, %cst_132 {dimension_numbers = #tpu.dot_dimension_numbers<[1], [0], [0], [1], [0, 0, 1, 1], [], []>} : vector<8x32xbf16>, vector<32x128xbf16>, vector<8x128xf32> -> vector<8x128xf32>
    %567 = arith.addf %564, %566 : vector<8x128xf32>
    %568 = vector.extract_strided_slice %563 {offsets = [0, 0], sizes = [8, 32], strides = [1, 1]} : vector<8x128xf32> to vector<8x32xf32>
    %569 = arith.negf %568 : vector<8x32xf32>
    %570 = math.exp %569 : vector<8x32xf32>
    %cst_133 = arith.constant 1.000000e+00 : f32
    %571 = vector.broadcast %cst_133 : f32 to vector<8x32xf32>
    %572 = arith.addf %571, %570 : vector<8x32xf32>
    %573 = arith.divf %571, %572 : vector<8x32xf32>
    %574 = vector.extract_strided_slice %563 {offsets = [0, 32], sizes = [8, 32], strides = [1, 1]} : vector<8x128xf32> to vector<8x32xf32>
    %575 = arith.negf %574 : vector<8x32xf32>
    %576 = math.exp %575 : vector<8x32xf32>
    %cst_134 = arith.constant 1.000000e+00 : f32
    %577 = vector.broadcast %cst_134 : f32 to vector<8x32xf32>
    %578 = arith.addf %577, %576 : vector<8x32xf32>
    %579 = arith.divf %577, %578 : vector<8x32xf32>
    %580 = vector.extract_strided_slice %563 {offsets = [0, 64], sizes = [8, 32], strides = [1, 1]} : vector<8x128xf32> to vector<8x32xf32>
    %581 = math.tanh %580 : vector<8x32xf32>
    %582 = vector.extract_strided_slice %563 {offsets = [0, 96], sizes = [8, 32], strides = [1, 1]} : vector<8x128xf32> to vector<8x32xf32>
    %583 = arith.negf %582 : vector<8x32xf32>
    %584 = math.exp %583 : vector<8x32xf32>
    %cst_135 = arith.constant 1.000000e+00 : f32
    %585 = vector.broadcast %cst_135 : f32 to vector<8x32xf32>
    %586 = arith.addf %585, %584 : vector<8x32xf32>
    %587 = arith.divf %585, %586 : vector<8x32xf32>
    %588 = arith.mulf %579, %553 : vector<8x32xf32>
    %589 = arith.mulf %573, %581 : vector<8x32xf32>
    %590 = arith.addf %588, %589 : vector<8x32xf32>
    %591 = math.tanh %590 : vector<8x32xf32>
    %592 = arith.mulf %587, %591 : vector<8x32xf32>
    %593 = vector.extract_strided_slice %567 {offsets = [0, 0], sizes = [8, 32], strides = [1, 1]} : vector<8x128xf32> to vector<8x32xf32>
    %594 = arith.negf %593 : vector<8x32xf32>
    %595 = math.exp %594 : vector<8x32xf32>
    %cst_136 = arith.constant 1.000000e+00 : f32
    %596 = vector.broadcast %cst_136 : f32 to vector<8x32xf32>
    %597 = arith.addf %596, %595 : vector<8x32xf32>
    %598 = arith.divf %596, %597 : vector<8x32xf32>
    %599 = vector.extract_strided_slice %567 {offsets = [0, 32], sizes = [8, 32], strides = [1, 1]} : vector<8x128xf32> to vector<8x32xf32>
    %600 = arith.negf %599 : vector<8x32xf32>
    %601 = math.exp %600 : vector<8x32xf32>
    %cst_137 = arith.constant 1.000000e+00 : f32
    %602 = vector.broadcast %cst_137 : f32 to vector<8x32xf32>
    %603 = arith.addf %602, %601 : vector<8x32xf32>
    %604 = arith.divf %602, %603 : vector<8x32xf32>
    %605 = vector.extract_strided_slice %567 {offsets = [0, 64], sizes = [8, 32], strides = [1, 1]} : vector<8x128xf32> to vector<8x32xf32>
    %606 = math.tanh %605 : vector<8x32xf32>
    %607 = vector.extract_strided_slice %567 {offsets = [0, 96], sizes = [8, 32], strides = [1, 1]} : vector<8x128xf32> to vector<8x32xf32>
    %608 = arith.negf %607 : vector<8x32xf32>
    %609 = math.exp %608 : vector<8x32xf32>
    %cst_138 = arith.constant 1.000000e+00 : f32
    %610 = vector.broadcast %cst_138 : f32 to vector<8x32xf32>
    %611 = arith.addf %610, %609 : vector<8x32xf32>
    %612 = arith.divf %610, %611 : vector<8x32xf32>
    %613 = arith.mulf %604, %559 : vector<8x32xf32>
    %614 = arith.mulf %598, %606 : vector<8x32xf32>
    %615 = arith.addf %613, %614 : vector<8x32xf32>
    %616 = math.tanh %615 : vector<8x32xf32>
    %617 = arith.mulf %612, %616 : vector<8x32xf32>
    %618 = arith.truncf %592 : vector<8x32xf32> to vector<8x32xbf16>
    %c56_139 = arith.constant 56 : index
    %c0_140 = arith.constant 0 : index
    %619 = vector.load %arg7[%c56_139, %c0_140] : memref<64x64xbf16, #tpu.memory_space<vmem>>, vector<8x32xbf16>
    tpu.vector_store %arg7[%c56_139, %c0_140], %618 {strides = array<i32>} : memref<64x64xbf16, #tpu.memory_space<vmem>>, vector<8x32xbf16>,
    %620 = arith.truncf %617 : vector<8x32xf32> to vector<8x32xbf16>
    %c0_141 = arith.constant 0 : index
    %c32_142 = arith.constant 32 : index
    %621 = vector.load %arg7[%c0_141, %c32_142] : memref<64x64xbf16, #tpu.memory_space<vmem>>, vector<8x32xbf16>
    tpu.vector_store %arg7[%c0_141, %c32_142], %620 {strides = array<i32>} : memref<64x64xbf16, #tpu.memory_space<vmem>>, vector<8x32xbf16>,
    %c7_i32_143 = arith.constant 7 : i32
    %622 = vector.broadcast %c7_i32_143 : i32 to vector<8x1xi32>
    %623 = arith.cmpi sgt, %9, %622 : vector<8x1xi32>
    %c0_i32_144 = arith.constant 0 : i32
    %624 = vector.broadcast %c0_i32_144 : i32 to vector<8x1xi32>
    %625 = arith.cmpi sgt, %9, %624 : vector<8x1xi32>
    %626 = vector.shape_cast %623 : vector<8x1xi1> to vector<8x1xi1>
    %627 = vector.broadcast %626 : vector<8x1xi1> to vector<8x32xi1>
    %628 = arith.select %627, %592, %550 : vector<8x32xi1>, vector<8x32xf32>
    %629 = vector.shape_cast %625 : vector<8x1xi1> to vector<8x1xi1>
    %630 = vector.broadcast %629 : vector<8x1xi1> to vector<8x32xi1>
    %631 = arith.select %630, %617, %556 : vector<8x32xi1>, vector<8x32xf32>
    %c0_145 = arith.constant 0 : index
    %c0_146 = arith.constant 0 : index
    %632 = vector.load %arg8[%c0_145, %c0_146] : memref<8x64xf32, #tpu.memory_space<vmem>>, vector<8x32xf32>
    tpu.vector_store %arg8[%c0_145, %c0_146], %628 {strides = array<i32>} : memref<8x64xf32, #tpu.memory_space<vmem>>, vector<8x32xf32>,
    %c0_147 = arith.constant 0 : index
    %c32_148 = arith.constant 32 : index
    %633 = vector.load %arg8[%c0_147, %c32_148] : memref<8x64xf32, #tpu.memory_space<vmem>>, vector<8x32xf32>
    tpu.vector_store %arg8[%c0_147, %c32_148], %631 {strides = array<i32>} : memref<8x64xf32, #tpu.memory_space<vmem>>, vector<8x32xf32>,
    return
  }
  func.func @transform_0(%arg0: i32) -> (i32, i32) {
    %c0_i32 = arith.constant 0 : i32
    %c0_i32_0 = arith.constant 0 : i32
    %c0_i32_1 = arith.constant 0 : i32
    return %c0_i32, %c0_i32_0 : i32, i32
  }
  func.func @transform_1(%arg0: i32) -> (i32, i32) {
    %c0_i32 = arith.constant 0 : i32
    %c0_i32_0 = arith.constant 0 : i32
    %c0_i32_1 = arith.constant 0 : i32
    return %c0_i32, %c0_i32_0 : i32, i32
  }
  func.func @transform_2(%arg0: i32) -> (i32, i32) {
    %c0_i32 = arith.constant 0 : i32
    %c0_i32_0 = arith.constant 0 : i32
    %c0_i32_1 = arith.constant 0 : i32
    return %c0_i32, %c0_i32_0 : i32, i32
  }
  func.func @transform_3(%arg0: i32) -> (i32, i32) {
    %c0_i32 = arith.constant 0 : i32
    %c0_i32_0 = arith.constant 0 : i32
    %c0_i32_1 = arith.constant 0 : i32
    return %c0_i32, %c0_i32_0 : i32, i32
  }
  func.func @transform_4(%arg0: i32) -> (i32, i32) {
    %c0_i32 = arith.constant 0 : i32
    %c0_i32_0 = arith.constant 0 : i32
    %c0_i32_1 = arith.constant 0 : i32
    return %c0_i32, %c0_i32_0 : i32, i32
  }
  func.func @transform_5(%arg0: i32) -> (i32, i32) {
    %c0_i32 = arith.constant 0 : i32
    %c0_i32_0 = arith.constant 0 : i32
    %c0_i32_1 = arith.constant 0 : i32
    return %c0_i32, %c0_i32_0 : i32, i32
  }
  func.func @transform_6(%arg0: i32) -> (i32, i32) {
    %c0_i32 = arith.constant 0 : i32
    %c0_i32_0 = arith.constant 0 : i32
    %c0_i32_1 = arith.constant 0 : i32
    return %c0_i32, %c0_i32_0 : i32, i32
  }
  func.func @transform_7(%arg0: i32) -> (i32, i32) {
    %c0_i32 = arith.constant 0 : i32
    %c0_i32_0 = arith.constant 0 : i32
    %c0_i32_1 = arith.constant 0 : i32
    return %c0_i32, %c0_i32_0 : i32, i32
  }
}

module attributes {stable_mosaic.version = 11 : i64} {
  func.func @_bilstm_layer_kernel(%arg0: i32, %arg1: memref<64x64xbf16, #tpu.memory_space<vmem>>, %arg2: memref<8x1xi32, #tpu.memory_space<vmem>>, %arg3: memref<64x256xbf16, #tpu.memory_space<vmem>>, %arg4: memref<32x128xbf16, #tpu.memory_space<vmem>>, %arg5: memref<32x128xbf16, #tpu.memory_space<vmem>>, %arg6: memref<1x256xf32, #tpu.memory_space<vmem>>, %arg7: memref<64x64xbf16, #tpu.memory_space<vmem>>, %arg8: memref<8x64xf32, #tpu.memory_space<vmem>>, %arg9: memref<64x256xf32, #tpu.memory_space<vmem>>) attributes {dimension_semantics = [#tpu.dimension_semantics<arbitrary>], iteration_bounds = array<i64: 1>, scalar_prefetch = 0 : i64, scratch_operands = 1 : i64, tpu.core_type = #tpu.core_type<tc>, window_params = [{pipeline_mode = #tpu.pipeline_mode<synchronous>, transform_indices = @transform_0, window_bounds = array<i64: 64, 64>}, {pipeline_mode = #tpu.pipeline_mode<synchronous>, transform_indices = @transform_1, window_bounds = array<i64: 8, 1>}, {pipeline_mode = #tpu.pipeline_mode<synchronous>, transform_indices = @transform_2, window_bounds = array<i64: 64, 256>}, {pipeline_mode = #tpu.pipeline_mode<synchronous>, transform_indices = @transform_3, window_bounds = array<i64: 32, 128>}, {pipeline_mode = #tpu.pipeline_mode<synchronous>, transform_indices = @transform_4, window_bounds = array<i64: 32, 128>}, {pipeline_mode = #tpu.pipeline_mode<synchronous>, transform_indices = @transform_5, window_bounds = array<i64: 1, 256>}, {pipeline_mode = #tpu.pipeline_mode<synchronous>, transform_indices = @transform_6, window_bounds = array<i64: 64, 64>}, {pipeline_mode = #tpu.pipeline_mode<synchronous>, transform_indices = @transform_7, window_bounds = array<i64: 8, 64>}]} {
    %c0 = arith.constant 0 : index
    %c0_0 = arith.constant 0 : index
    %0 = vector.load %arg1[%c0, %c0_0] : memref<64x64xbf16, #tpu.memory_space<vmem>>, vector<64x64xbf16>
    %c0_1 = arith.constant 0 : index
    %c0_2 = arith.constant 0 : index
    %1 = vector.load %arg3[%c0_1, %c0_2] : memref<64x256xbf16, #tpu.memory_space<vmem>>, vector<64x256xbf16>
    %cst = arith.constant dense<0.000000e+00> : vector<64x256xf32>
    %2 = tpu.matmul %0, %1, %cst {dimension_numbers = #tpu.dot_dimension_numbers<[1], [0], [0], [1], [0, 0, 1, 1], [], []>} : vector<64x64xbf16>, vector<64x256xbf16>, vector<64x256xf32> -> vector<64x256xf32>
    %c0_3 = arith.constant 0 : index
    %c0_4 = arith.constant 0 : index
    %3 = vector.load %arg6[%c0_3, %c0_4] : memref<1x256xf32, #tpu.memory_space<vmem>>, vector<1x256xf32>
    %4 = vector.broadcast %3 : vector<1x256xf32> to vector<64x256xf32>
    %5 = arith.addf %2, %4 : vector<64x256xf32>
    %c0_5 = arith.constant 0 : index
    %c0_6 = arith.constant 0 : index
    %6 = vector.load %arg9[%c0_5, %c0_6] : memref<64x256xf32, #tpu.memory_space<vmem>>, vector<64x256xf32>
    tpu.vector_store %arg9[%c0_5, %c0_6], %5 {strides = array<i32>} : memref<64x256xf32, #tpu.memory_space<vmem>>, vector<64x256xf32>,
    %c0_7 = arith.constant 0 : index
    %c0_8 = arith.constant 0 : index
    %7 = vector.load %arg4[%c0_7, %c0_8] : memref<32x128xbf16, #tpu.memory_space<vmem>>, vector<32x128xbf16>
    %c0_9 = arith.constant 0 : index
    %c0_10 = arith.constant 0 : index
    %8 = vector.load %arg5[%c0_9, %c0_10] : memref<32x128xbf16, #tpu.memory_space<vmem>>, vector<32x128xbf16>
    %c0_11 = arith.constant 0 : index
    %c0_12 = arith.constant 0 : index
    %9 = vector.load %arg2[%c0_11, %c0_12] : memref<8x1xi32, #tpu.memory_space<vmem>>, vector<8x1xi32>
    %cst_13 = arith.constant 0.000000e+00 : f32
    %10 = vector.broadcast %cst_13 : f32 to vector<8x32xf32>
    %cst_14 = arith.constant 0.000000e+00 : f32
    %11 = vector.broadcast %cst_14 : f32 to vector<8x32xf32>
    %cst_15 = arith.constant 0.000000e+00 : f32
    %12 = vector.broadcast %cst_15 : f32 to vector<8x32xf32>
    %cst_16 = arith.constant 0.000000e+00 : f32
    %13 = vector.broadcast %cst_16 : f32 to vector<8x32xf32>
    %c0_17 = arith.constant 0 : index
    %c0_18 = arith.constant 0 : index
    %14 = vector.load %arg9[%c0_17, %c0_18] : memref<64x256xf32, #tpu.memory_space<vmem>>, vector<8x128xf32>
    %15 = arith.truncf %10 : vector<8x32xf32> to vector<8x32xbf16>
    %cst_19 = arith.constant dense<0.000000e+00> : vector<8x128xf32>
    %16 = tpu.matmul %15, %7, %cst_19 {dimension_numbers = #tpu.dot_dimension_numbers<[1], [0], [0], [1], [0, 0, 1, 1], [], []>} : vector<8x32xbf16>, vector<32x128xbf16>, vector<8x128xf32> -> vector<8x128xf32>
    %17 = arith.addf %14, %16 : vector<8x128xf32>
    %c56 = arith.constant 56 : index
    %c128 = arith.constant 128 : index
    %18 = vector.load %arg9[%c56, %c128] : memref<64x256xf32, #tpu.memory_space<vmem>>, vector<8x128xf32>
    %19 = arith.truncf %12 : vector<8x32xf32> to vector<8x32xbf16>
    %cst_20 = arith.constant dense<0.000000e+00> : vector<8x128xf32>
    %20 = tpu.matmul %19, %8, %cst_20 {dimension_numbers = #tpu.dot_dimension_numbers<[1], [0], [0], [1], [0, 0, 1, 1], [], []>} : vector<8x32xbf16>, vector<32x128xbf16>, vector<8x128xf32> -> vector<8x128xf32>
    %21 = arith.addf %18, %20 : vector<8x128xf32>
    %22 = vector.extract_strided_slice %17 {offsets = [0, 0], sizes = [8, 32], strides = [1, 1]} : vector<8x128xf32> to vector<8x32xf32>
    %23 = arith.negf %22 : vector<8x32xf32>
    %24 = math.exp %23 : vector<8x32xf32>
    %cst_21 = arith.constant 1.000000e+00 : f32
    %25 = vector.broadcast %cst_21 : f32 to vector<8x32xf32>
    %26 = arith.addf %25, %24 : vector<8x32xf32>
    %27 = arith.divf %25, %26 : vector<8x32xf32>
    %28 = vector.extract_strided_slice %17 {offsets = [0, 32], sizes = [8, 32], strides = [1, 1]} : vector<8x128xf32> to vector<8x32xf32>
    %29 = arith.negf %28 : vector<8x32xf32>
    %30 = math.exp %29 : vector<8x32xf32>
    %cst_22 = arith.constant 1.000000e+00 : f32
    %31 = vector.broadcast %cst_22 : f32 to vector<8x32xf32>
    %32 = arith.addf %31, %30 : vector<8x32xf32>
    %33 = arith.divf %31, %32 : vector<8x32xf32>
    %34 = vector.extract_strided_slice %17 {offsets = [0, 64], sizes = [8, 32], strides = [1, 1]} : vector<8x128xf32> to vector<8x32xf32>
    %35 = math.tanh %34 : vector<8x32xf32>
    %36 = vector.extract_strided_slice %17 {offsets = [0, 96], sizes = [8, 32], strides = [1, 1]} : vector<8x128xf32> to vector<8x32xf32>
    %37 = arith.negf %36 : vector<8x32xf32>
    %38 = math.exp %37 : vector<8x32xf32>
    %cst_23 = arith.constant 1.000000e+00 : f32
    %39 = vector.broadcast %cst_23 : f32 to vector<8x32xf32>
    %40 = arith.addf %39, %38 : vector<8x32xf32>
    %41 = arith.divf %39, %40 : vector<8x32xf32>
    %42 = arith.mulf %33, %11 : vector<8x32xf32>
    %43 = arith.mulf %27, %35 : vector<8x32xf32>
    %44 = arith.addf %42, %43 : vector<8x32xf32>
    %45 = math.tanh %44 : vector<8x32xf32>
    %46 = arith.mulf %41, %45 : vector<8x32xf32>
    %47 = vector.extract_strided_slice %21 {offsets = [0, 0], sizes = [8, 32], strides = [1, 1]} : vector<8x128xf32> to vector<8x32xf32>
    %48 = arith.negf %47 : vector<8x32xf32>
    %49 = math.exp %48 : vector<8x32xf32>
    %cst_24 = arith.constant 1.000000e+00 : f32
    %50 = vector.broadcast %cst_24 : f32 to vector<8x32xf32>
    %51 = arith.addf %50, %49 : vector<8x32xf32>
    %52 = arith.divf %50, %51 : vector<8x32xf32>
    %53 = vector.extract_strided_slice %21 {offsets = [0, 32], sizes = [8, 32], strides = [1, 1]} : vector<8x128xf32> to vector<8x32xf32>
    %54 = arith.negf %53 : vector<8x32xf32>
    %55 = math.exp %54 : vector<8x32xf32>
    %cst_25 = arith.constant 1.000000e+00 : f32
    %56 = vector.broadcast %cst_25 : f32 to vector<8x32xf32>
    %57 = arith.addf %56, %55 : vector<8x32xf32>
    %58 = arith.divf %56, %57 : vector<8x32xf32>
    %59 = vector.extract_strided_slice %21 {offsets = [0, 64], sizes = [8, 32], strides = [1, 1]} : vector<8x128xf32> to vector<8x32xf32>
    %60 = math.tanh %59 : vector<8x32xf32>
    %61 = vector.extract_strided_slice %21 {offsets = [0, 96], sizes = [8, 32], strides = [1, 1]} : vector<8x128xf32> to vector<8x32xf32>
    %62 = arith.negf %61 : vector<8x32xf32>
    %63 = math.exp %62 : vector<8x32xf32>
    %cst_26 = arith.constant 1.000000e+00 : f32
    %64 = vector.broadcast %cst_26 : f32 to vector<8x32xf32>
    %65 = arith.addf %64, %63 : vector<8x32xf32>
    %66 = arith.divf %64, %65 : vector<8x32xf32>
    %67 = arith.mulf %58, %13 : vector<8x32xf32>
    %68 = arith.mulf %52, %60 : vector<8x32xf32>
    %69 = arith.addf %67, %68 : vector<8x32xf32>
    %70 = math.tanh %69 : vector<8x32xf32>
    %71 = arith.mulf %66, %70 : vector<8x32xf32>
    %72 = arith.truncf %46 : vector<8x32xf32> to vector<8x32xbf16>
    %c0_27 = arith.constant 0 : index
    %c0_28 = arith.constant 0 : index
    %73 = vector.load %arg7[%c0_27, %c0_28] : memref<64x64xbf16, #tpu.memory_space<vmem>>, vector<8x32xbf16>
    tpu.vector_store %arg7[%c0_27, %c0_28], %72 {strides = array<i32>} : memref<64x64xbf16, #tpu.memory_space<vmem>>, vector<8x32xbf16>,
    %74 = arith.truncf %71 : vector<8x32xf32> to vector<8x32xbf16>
    %c56_29 = arith.constant 56 : index
    %c32 = arith.constant 32 : index
    %75 = vector.load %arg7[%c56_29, %c32] : memref<64x64xbf16, #tpu.memory_space<vmem>>, vector<8x32xbf16>
    tpu.vector_store %arg7[%c56_29, %c32], %74 {strides = array<i32>} : memref<64x64xbf16, #tpu.memory_space<vmem>>, vector<8x32xbf16>,
    %c0_i32 = arith.constant 0 : i32
    %76 = vector.broadcast %c0_i32 : i32 to vector<8x1xi32>
    %77 = arith.cmpi sgt, %9, %76 : vector<8x1xi32>
    %c7_i32 = arith.constant 7 : i32
    %78 = vector.broadcast %c7_i32 : i32 to vector<8x1xi32>
    %79 = arith.cmpi sgt, %9, %78 : vector<8x1xi32>
    %80 = vector.shape_cast %77 : vector<8x1xi1> to vector<8x1xi1>
    %81 = vector.broadcast %80 : vector<8x1xi1> to vector<8x32xi1>
    %82 = arith.select %81, %46, %10 : vector<8x32xi1>, vector<8x32xf32>
    %83 = vector.shape_cast %77 : vector<8x1xi1> to vector<8x1xi1>
    %84 = vector.broadcast %83 : vector<8x1xi1> to vector<8x32xi1>
    %85 = arith.select %84, %44, %11 : vector<8x32xi1>, vector<8x32xf32>
    %86 = vector.shape_cast %79 : vector<8x1xi1> to vector<8x1xi1>
    %87 = vector.broadcast %86 : vector<8x1xi1> to vector<8x32xi1>
    %88 = arith.select %87, %71, %12 : vector<8x32xi1>, vector<8x32xf32>
    %89 = vector.shape_cast %79 : vector<8x1xi1> to vector<8x1xi1>
    %90 = vector.broadcast %89 : vector<8x1xi1> to vector<8x32xi1>
    %91 = arith.select %90, %69, %13 : vector<8x32xi1>, vector<8x32xf32>
    %c8 = arith.constant 8 : index
    %c0_30 = arith.constant 0 : index
    %92 = vector.load %arg9[%c8, %c0_30] : memref<64x256xf32, #tpu.memory_space<vmem>>, vector<8x128xf32>
    %93 = arith.truncf %82 : vector<8x32xf32> to vector<8x32xbf16>
    %cst_31 = arith.constant dense<0.000000e+00> : vector<8x128xf32>
    %94 = tpu.matmul %93, %7, %cst_31 {dimension_numbers = #tpu.dot_dimension_numbers<[1], [0], [0], [1], [0, 0, 1, 1], [], []>} : vector<8x32xbf16>, vector<32x128xbf16>, vector<8x128xf32> -> vector<8x128xf32>
    %95 = arith.addf %92, %94 : vector<8x128xf32>
    %c48 = arith.constant 48 : index
    %c128_32 = arith.constant 128 : index
    %96 = vector.load %arg9[%c48, %c128_32] : memref<64x256xf32, #tpu.memory_space<vmem>>, vector<8x128xf32>
    %97 = arith.truncf %88 : vector<8x32xf32> to vector<8x32xbf16>
    %cst_33 = arith.constant dense<0.000000e+00> : vector<8x128xf32>
    %98 = tpu.matmul %97, %8, %cst_33 {dimension_numbers = #tpu.dot_dimension_numbers<[1], [0], [0], [1], [0, 0, 1, 1], [], []>} : vector<8x32xbf16>, vector<32x128xbf16>, vector<8x128xf32> -> vector<8x128xf32>
    %99 = arith.addf %96, %98 : vector<8x128xf32>
    %100 = vector.extract_strided_slice %95 {offsets = [0, 0], sizes = [8, 32], strides = [1, 1]} : vector<8x128xf32> to vector<8x32xf32>
    %101 = arith.negf %100 : vector<8x32xf32>
    %102 = math.exp %101 : vector<8x32xf32>
    %cst_34 = arith.constant 1.000000e+00 : f32
    %103 = vector.broadcast %cst_34 : f32 to vector<8x32xf32>
    %104 = arith.addf %103, %102 : vector<8x32xf32>
    %105 = arith.divf %103, %104 : vector<8x32xf32>
    %106 = vector.extract_strided_slice %95 {offsets = [0, 32], sizes = [8, 32], strides = [1, 1]} : vector<8x128xf32> to vector<8x32xf32>
    %107 = arith.negf %106 : vector<8x32xf32>
    %108 = math.exp %107 : vector<8x32xf32>
    %cst_35 = arith.constant 1.000000e+00 : f32
    %109 = vector.broadcast %cst_35 : f32 to vector<8x32xf32>
    %110 = arith.addf %109, %108 : vector<8x32xf32>
    %111 = arith.divf %109, %110 : vector<8x32xf32>
    %112 = vector.extract_strided_slice %95 {offsets = [0, 64], sizes = [8, 32], strides = [1, 1]} : vector<8x128xf32> to vector<8x32xf32>
    %113 = math.tanh %112 : vector<8x32xf32>
    %114 = vector.extract_strided_slice %95 {offsets = [0, 96], sizes = [8, 32], strides = [1, 1]} : vector<8x128xf32> to vector<8x32xf32>
    %115 = arith.negf %114 : vector<8x32xf32>
    %116 = math.exp %115 : vector<8x32xf32>
    %cst_36 = arith.constant 1.000000e+00 : f32
    %117 = vector.broadcast %cst_36 : f32 to vector<8x32xf32>
    %118 = arith.addf %117, %116 : vector<8x32xf32>
    %119 = arith.divf %117, %118 : vector<8x32xf32>
    %120 = arith.mulf %111, %85 : vector<8x32xf32>
    %121 = arith.mulf %105, %113 : vector<8x32xf32>
    %122 = arith.addf %120, %121 : vector<8x32xf32>
    %123 = math.tanh %122 : vector<8x32xf32>
    %124 = arith.mulf %119, %123 : vector<8x32xf32>
    %125 = vector.extract_strided_slice %99 {offsets = [0, 0], sizes = [8, 32], strides = [1, 1]} : vector<8x128xf32> to vector<8x32xf32>
    %126 = arith.negf %125 : vector<8x32xf32>
    %127 = math.exp %126 : vector<8x32xf32>
    %cst_37 = arith.constant 1.000000e+00 : f32
    %128 = vector.broadcast %cst_37 : f32 to vector<8x32xf32>
    %129 = arith.addf %128, %127 : vector<8x32xf32>
    %130 = arith.divf %128, %129 : vector<8x32xf32>
    %131 = vector.extract_strided_slice %99 {offsets = [0, 32], sizes = [8, 32], strides = [1, 1]} : vector<8x128xf32> to vector<8x32xf32>
    %132 = arith.negf %131 : vector<8x32xf32>
    %133 = math.exp %132 : vector<8x32xf32>
    %cst_38 = arith.constant 1.000000e+00 : f32
    %134 = vector.broadcast %cst_38 : f32 to vector<8x32xf32>
    %135 = arith.addf %134, %133 : vector<8x32xf32>
    %136 = arith.divf %134, %135 : vector<8x32xf32>
    %137 = vector.extract_strided_slice %99 {offsets = [0, 64], sizes = [8, 32], strides = [1, 1]} : vector<8x128xf32> to vector<8x32xf32>
    %138 = math.tanh %137 : vector<8x32xf32>
    %139 = vector.extract_strided_slice %99 {offsets = [0, 96], sizes = [8, 32], strides = [1, 1]} : vector<8x128xf32> to vector<8x32xf32>
    %140 = arith.negf %139 : vector<8x32xf32>
    %141 = math.exp %140 : vector<8x32xf32>
    %cst_39 = arith.constant 1.000000e+00 : f32
    %142 = vector.broadcast %cst_39 : f32 to vector<8x32xf32>
    %143 = arith.addf %142, %141 : vector<8x32xf32>
    %144 = arith.divf %142, %143 : vector<8x32xf32>
    %145 = arith.mulf %136, %91 : vector<8x32xf32>
    %146 = arith.mulf %130, %138 : vector<8x32xf32>
    %147 = arith.addf %145, %146 : vector<8x32xf32>
    %148 = math.tanh %147 : vector<8x32xf32>
    %149 = arith.mulf %144, %148 : vector<8x32xf32>
    %150 = arith.truncf %124 : vector<8x32xf32> to vector<8x32xbf16>
    %c8_40 = arith.constant 8 : index
    %c0_41 = arith.constant 0 : index
    %151 = vector.load %arg7[%c8_40, %c0_41] : memref<64x64xbf16, #tpu.memory_space<vmem>>, vector<8x32xbf16>
    tpu.vector_store %arg7[%c8_40, %c0_41], %150 {strides = array<i32>} : memref<64x64xbf16, #tpu.memory_space<vmem>>, vector<8x32xbf16>,
    %152 = arith.truncf %149 : vector<8x32xf32> to vector<8x32xbf16>
    %c48_42 = arith.constant 48 : index
    %c32_43 = arith.constant 32 : index
    %153 = vector.load %arg7[%c48_42, %c32_43] : memref<64x64xbf16, #tpu.memory_space<vmem>>, vector<8x32xbf16>
    tpu.vector_store %arg7[%c48_42, %c32_43], %152 {strides = array<i32>} : memref<64x64xbf16, #tpu.memory_space<vmem>>, vector<8x32xbf16>,
    %c1_i32 = arith.constant 1 : i32
    %154 = vector.broadcast %c1_i32 : i32 to vector<8x1xi32>
    %155 = arith.cmpi sgt, %9, %154 : vector<8x1xi32>
    %c6_i32 = arith.constant 6 : i32
    %156 = vector.broadcast %c6_i32 : i32 to vector<8x1xi32>
    %157 = arith.cmpi sgt, %9, %156 : vector<8x1xi32>
    %158 = vector.shape_cast %155 : vector<8x1xi1> to vector<8x1xi1>
    %159 = vector.broadcast %158 : vector<8x1xi1> to vector<8x32xi1>
    %160 = arith.select %159, %124, %82 : vector<8x32xi1>, vector<8x32xf32>
    %161 = vector.shape_cast %155 : vector<8x1xi1> to vector<8x1xi1>
    %162 = vector.broadcast %161 : vector<8x1xi1> to vector<8x32xi1>
    %163 = arith.select %162, %122, %85 : vector<8x32xi1>, vector<8x32xf32>
    %164 = vector.shape_cast %157 : vector<8x1xi1> to vector<8x1xi1>
    %165 = vector.broadcast %164 : vector<8x1xi1> to vector<8x32xi1>
    %166 = arith.select %165, %149, %88 : vector<8x32xi1>, vector<8x32xf32>
    %167 = vector.shape_cast %157 : vector<8x1xi1> to vector<8x1xi1>
    %168 = vector.broadcast %167 : vector<8x1xi1> to vector<8x32xi1>
    %169 = arith.select %168, %147, %91 : vector<8x32xi1>, vector<8x32xf32>
    %c16 = arith.constant 16 : index
    %c0_44 = arith.constant 0 : index
    %170 = vector.load %arg9[%c16, %c0_44] : memref<64x256xf32, #tpu.memory_space<vmem>>, vector<8x128xf32>
    %171 = arith.truncf %160 : vector<8x32xf32> to vector<8x32xbf16>
    %cst_45 = arith.constant dense<0.000000e+00> : vector<8x128xf32>
    %172 = tpu.matmul %171, %7, %cst_45 {dimension_numbers = #tpu.dot_dimension_numbers<[1], [0], [0], [1], [0, 0, 1, 1], [], []>} : vector<8x32xbf16>, vector<32x128xbf16>, vector<8x128xf32> -> vector<8x128xf32>
    %173 = arith.addf %170, %172 : vector<8x128xf32>
    %c40 = arith.constant 40 : index
    %c128_46 = arith.constant 128 : index
    %174 = vector.load %arg9[%c40, %c128_46] : memref<64x256xf32, #tpu.memory_space<vmem>>, vector<8x128xf32>
    %175 = arith.truncf %166 : vector<8x32xf32> to vector<8x32xbf16>
    %cst_47 = arith.constant dense<0.000000e+00> : vector<8x128xf32>
    %176 = tpu.matmul %175, %8, %cst_47 {dimension_numbers = #tpu.dot_dimension_numbers<[1], [0], [0], [1], [0, 0, 1, 1], [], []>} : vector<8x32xbf16>, vector<32x128xbf16>, vector<8x128xf32> -> vector<8x128xf32>
    %177 = arith.addf %174, %176 : vector<8x128xf32>
    %178 = vector.extract_strided_slice %173 {offsets = [0, 0], sizes = [8, 32], strides = [1, 1]} : vector<8x128xf32> to vector<8x32xf32>
    %179 = arith.negf %178 : vector<8x32xf32>
    %180 = math.exp %179 : vector<8x32xf32>
    %cst_48 = arith.constant 1.000000e+00 : f32
    %181 = vector.broadcast %cst_48 : f32 to vector<8x32xf32>
    %182 = arith.addf %181, %180 : vector<8x32xf32>
    %183 = arith.divf %181, %182 : vector<8x32xf32>
    %184 = vector.extract_strided_slice %173 {offsets = [0, 32], sizes = [8, 32], strides = [1, 1]} : vector<8x128xf32> to vector<8x32xf32>
    %185 = arith.negf %184 : vector<8x32xf32>
    %186 = math.exp %185 : vector<8x32xf32>
    %cst_49 = arith.constant 1.000000e+00 : f32
    %187 = vector.broadcast %cst_49 : f32 to vector<8x32xf32>
    %188 = arith.addf %187, %186 : vector<8x32xf32>
    %189 = arith.divf %187, %188 : vector<8x32xf32>
    %190 = vector.extract_strided_slice %173 {offsets = [0, 64], sizes = [8, 32], strides = [1, 1]} : vector<8x128xf32> to vector<8x32xf32>
    %191 = math.tanh %190 : vector<8x32xf32>
    %192 = vector.extract_strided_slice %173 {offsets = [0, 96], sizes = [8, 32], strides = [1, 1]} : vector<8x128xf32> to vector<8x32xf32>
    %193 = arith.negf %192 : vector<8x32xf32>
    %194 = math.exp %193 : vector<8x32xf32>
    %cst_50 = arith.constant 1.000000e+00 : f32
    %195 = vector.broadcast %cst_50 : f32 to vector<8x32xf32>
    %196 = arith.addf %195, %194 : vector<8x32xf32>
    %197 = arith.divf %195, %196 : vector<8x32xf32>
    %198 = arith.mulf %189, %163 : vector<8x32xf32>
    %199 = arith.mulf %183, %191 : vector<8x32xf32>
    %200 = arith.addf %198, %199 : vector<8x32xf32>
    %201 = math.tanh %200 : vector<8x32xf32>
    %202 = arith.mulf %197, %201 : vector<8x32xf32>
    %203 = vector.extract_strided_slice %177 {offsets = [0, 0], sizes = [8, 32], strides = [1, 1]} : vector<8x128xf32> to vector<8x32xf32>
    %204 = arith.negf %203 : vector<8x32xf32>
    %205 = math.exp %204 : vector<8x32xf32>
    %cst_51 = arith.constant 1.000000e+00 : f32
    %206 = vector.broadcast %cst_51 : f32 to vector<8x32xf32>
    %207 = arith.addf %206, %205 : vector<8x32xf32>
    %208 = arith.divf %206, %207 : vector<8x32xf32>
    %209 = vector.extract_strided_slice %177 {offsets = [0, 32], sizes = [8, 32], strides = [1, 1]} : vector<8x128xf32> to vector<8x32xf32>
    %210 = arith.negf %209 : vector<8x32xf32>
    %211 = math.exp %210 : vector<8x32xf32>
    %cst_52 = arith.constant 1.000000e+00 : f32
    %212 = vector.broadcast %cst_52 : f32 to vector<8x32xf32>
    %213 = arith.addf %212, %211 : vector<8x32xf32>
    %214 = arith.divf %212, %213 : vector<8x32xf32>
    %215 = vector.extract_strided_slice %177 {offsets = [0, 64], sizes = [8, 32], strides = [1, 1]} : vector<8x128xf32> to vector<8x32xf32>
    %216 = math.tanh %215 : vector<8x32xf32>
    %217 = vector.extract_strided_slice %177 {offsets = [0, 96], sizes = [8, 32], strides = [1, 1]} : vector<8x128xf32> to vector<8x32xf32>
    %218 = arith.negf %217 : vector<8x32xf32>
    %219 = math.exp %218 : vector<8x32xf32>
    %cst_53 = arith.constant 1.000000e+00 : f32
    %220 = vector.broadcast %cst_53 : f32 to vector<8x32xf32>
    %221 = arith.addf %220, %219 : vector<8x32xf32>
    %222 = arith.divf %220, %221 : vector<8x32xf32>
    %223 = arith.mulf %214, %169 : vector<8x32xf32>
    %224 = arith.mulf %208, %216 : vector<8x32xf32>
    %225 = arith.addf %223, %224 : vector<8x32xf32>
    %226 = math.tanh %225 : vector<8x32xf32>
    %227 = arith.mulf %222, %226 : vector<8x32xf32>
    %228 = arith.truncf %202 : vector<8x32xf32> to vector<8x32xbf16>
    %c16_54 = arith.constant 16 : index
    %c0_55 = arith.constant 0 : index
    %229 = vector.load %arg7[%c16_54, %c0_55] : memref<64x64xbf16, #tpu.memory_space<vmem>>, vector<8x32xbf16>
    tpu.vector_store %arg7[%c16_54, %c0_55], %228 {strides = array<i32>} : memref<64x64xbf16, #tpu.memory_space<vmem>>, vector<8x32xbf16>,
    %230 = arith.truncf %227 : vector<8x32xf32> to vector<8x32xbf16>
    %c40_56 = arith.constant 40 : index
    %c32_57 = arith.constant 32 : index
    %231 = vector.load %arg7[%c40_56, %c32_57] : memref<64x64xbf16, #tpu.memory_space<vmem>>, vector<8x32xbf16>
    tpu.vector_store %arg7[%c40_56, %c32_57], %230 {strides = array<i32>} : memref<64x64xbf16, #tpu.memory_space<vmem>>, vector<8x32xbf16>,
    %c2_i32 = arith.constant 2 : i32
    %232 = vector.broadcast %c2_i32 : i32 to vector<8x1xi32>
    %233 = arith.cmpi sgt, %9, %232 : vector<8x1xi32>
    %c5_i32 = arith.constant 5 : i32
    %234 = vector.broadcast %c5_i32 : i32 to vector<8x1xi32>
    %235 = arith.cmpi sgt, %9, %234 : vector<8x1xi32>
    %236 = vector.shape_cast %233 : vector<8x1xi1> to vector<8x1xi1>
    %237 = vector.broadcast %236 : vector<8x1xi1> to vector<8x32xi1>
    %238 = arith.select %237, %202, %160 : vector<8x32xi1>, vector<8x32xf32>
    %239 = vector.shape_cast %233 : vector<8x1xi1> to vector<8x1xi1>
    %240 = vector.broadcast %239 : vector<8x1xi1> to vector<8x32xi1>
    %241 = arith.select %240, %200, %163 : vector<8x32xi1>, vector<8x32xf32>
    %242 = vector.shape_cast %235 : vector<8x1xi1> to vector<8x1xi1>
    %243 = vector.broadcast %242 : vector<8x1xi1> to vector<8x32xi1>
    %244 = arith.select %243, %227, %166 : vector<8x32xi1>, vector<8x32xf32>
    %245 = vector.shape_cast %235 : vector<8x1xi1> to vector<8x1xi1>
    %246 = vector.broadcast %245 : vector<8x1xi1> to vector<8x32xi1>
    %247 = arith.select %246, %225, %169 : vector<8x32xi1>, vector<8x32xf32>
    %c24 = arith.constant 24 : index
    %c0_58 = arith.constant 0 : index
    %248 = vector.load %arg9[%c24, %c0_58] : memref<64x256xf32, #tpu.memory_space<vmem>>, vector<8x128xf32>
    %249 = arith.truncf %238 : vector<8x32xf32> to vector<8x32xbf16>
    %cst_59 = arith.constant dense<0.000000e+00> : vector<8x128xf32>
    %250 = tpu.matmul %249, %7, %cst_59 {dimension_numbers = #tpu.dot_dimension_numbers<[1], [0], [0], [1], [0, 0, 1, 1], [], []>} : vector<8x32xbf16>, vector<32x128xbf16>, vector<8x128xf32> -> vector<8x128xf32>
    %251 = arith.addf %248, %250 : vector<8x128xf32>
    %c32_60 = arith.constant 32 : index
    %c128_61 = arith.constant 128 : index
    %252 = vector.load %arg9[%c32_60, %c128_61] : memref<64x256xf32, #tpu.memory_space<vmem>>, vector<8x128xf32>
    %253 = arith.truncf %244 : vector<8x32xf32> to vector<8x32xbf16>
    %cst_62 = arith.constant dense<0.000000e+00> : vector<8x128xf32>
    %254 = tpu.matmul %253, %8, %cst_62 {dimension_numbers = #tpu.dot_dimension_numbers<[1], [0], [0], [1], [0, 0, 1, 1], [], []>} : vector<8x32xbf16>, vector<32x128xbf16>, vector<8x128xf32> -> vector<8x128xf32>
    %255 = arith.addf %252, %254 : vector<8x128xf32>
    %256 = vector.extract_strided_slice %251 {offsets = [0, 0], sizes = [8, 32], strides = [1, 1]} : vector<8x128xf32> to vector<8x32xf32>
    %257 = arith.negf %256 : vector<8x32xf32>
    %258 = math.exp %257 : vector<8x32xf32>
    %cst_63 = arith.constant 1.000000e+00 : f32
    %259 = vector.broadcast %cst_63 : f32 to vector<8x32xf32>
    %260 = arith.addf %259, %258 : vector<8x32xf32>
    %261 = arith.divf %259, %260 : vector<8x32xf32>
    %262 = vector.extract_strided_slice %251 {offsets = [0, 32], sizes = [8, 32], strides = [1, 1]} : vector<8x128xf32> to vector<8x32xf32>
    %263 = arith.negf %262 : vector<8x32xf32>
    %264 = math.exp %263 : vector<8x32xf32>
    %cst_64 = arith.constant 1.000000e+00 : f32
    %265 = vector.broadcast %cst_64 : f32 to vector<8x32xf32>
    %266 = arith.addf %265, %264 : vector<8x32xf32>
    %267 = arith.divf %265, %266 : vector<8x32xf32>
    %268 = vector.extract_strided_slice %251 {offsets = [0, 64], sizes = [8, 32], strides = [1, 1]} : vector<8x128xf32> to vector<8x32xf32>
    %269 = math.tanh %268 : vector<8x32xf32>
    %270 = vector.extract_strided_slice %251 {offsets = [0, 96], sizes = [8, 32], strides = [1, 1]} : vector<8x128xf32> to vector<8x32xf32>
    %271 = arith.negf %270 : vector<8x32xf32>
    %272 = math.exp %271 : vector<8x32xf32>
    %cst_65 = arith.constant 1.000000e+00 : f32
    %273 = vector.broadcast %cst_65 : f32 to vector<8x32xf32>
    %274 = arith.addf %273, %272 : vector<8x32xf32>
    %275 = arith.divf %273, %274 : vector<8x32xf32>
    %276 = arith.mulf %267, %241 : vector<8x32xf32>
    %277 = arith.mulf %261, %269 : vector<8x32xf32>
    %278 = arith.addf %276, %277 : vector<8x32xf32>
    %279 = math.tanh %278 : vector<8x32xf32>
    %280 = arith.mulf %275, %279 : vector<8x32xf32>
    %281 = vector.extract_strided_slice %255 {offsets = [0, 0], sizes = [8, 32], strides = [1, 1]} : vector<8x128xf32> to vector<8x32xf32>
    %282 = arith.negf %281 : vector<8x32xf32>
    %283 = math.exp %282 : vector<8x32xf32>
    %cst_66 = arith.constant 1.000000e+00 : f32
    %284 = vector.broadcast %cst_66 : f32 to vector<8x32xf32>
    %285 = arith.addf %284, %283 : vector<8x32xf32>
    %286 = arith.divf %284, %285 : vector<8x32xf32>
    %287 = vector.extract_strided_slice %255 {offsets = [0, 32], sizes = [8, 32], strides = [1, 1]} : vector<8x128xf32> to vector<8x32xf32>
    %288 = arith.negf %287 : vector<8x32xf32>
    %289 = math.exp %288 : vector<8x32xf32>
    %cst_67 = arith.constant 1.000000e+00 : f32
    %290 = vector.broadcast %cst_67 : f32 to vector<8x32xf32>
    %291 = arith.addf %290, %289 : vector<8x32xf32>
    %292 = arith.divf %290, %291 : vector<8x32xf32>
    %293 = vector.extract_strided_slice %255 {offsets = [0, 64], sizes = [8, 32], strides = [1, 1]} : vector<8x128xf32> to vector<8x32xf32>
    %294 = math.tanh %293 : vector<8x32xf32>
    %295 = vector.extract_strided_slice %255 {offsets = [0, 96], sizes = [8, 32], strides = [1, 1]} : vector<8x128xf32> to vector<8x32xf32>
    %296 = arith.negf %295 : vector<8x32xf32>
    %297 = math.exp %296 : vector<8x32xf32>
    %cst_68 = arith.constant 1.000000e+00 : f32
    %298 = vector.broadcast %cst_68 : f32 to vector<8x32xf32>
    %299 = arith.addf %298, %297 : vector<8x32xf32>
    %300 = arith.divf %298, %299 : vector<8x32xf32>
    %301 = arith.mulf %292, %247 : vector<8x32xf32>
    %302 = arith.mulf %286, %294 : vector<8x32xf32>
    %303 = arith.addf %301, %302 : vector<8x32xf32>
    %304 = math.tanh %303 : vector<8x32xf32>
    %305 = arith.mulf %300, %304 : vector<8x32xf32>
    %306 = arith.truncf %280 : vector<8x32xf32> to vector<8x32xbf16>
    %c24_69 = arith.constant 24 : index
    %c0_70 = arith.constant 0 : index
    %307 = vector.load %arg7[%c24_69, %c0_70] : memref<64x64xbf16, #tpu.memory_space<vmem>>, vector<8x32xbf16>
    tpu.vector_store %arg7[%c24_69, %c0_70], %306 {strides = array<i32>} : memref<64x64xbf16, #tpu.memory_space<vmem>>, vector<8x32xbf16>,
    %308 = arith.truncf %305 : vector<8x32xf32> to vector<8x32xbf16>
    %c32_71 = arith.constant 32 : index
    %c32_72 = arith.constant 32 : index
    %309 = vector.load %arg7[%c32_71, %c32_72] : memref<64x64xbf16, #tpu.memory_space<vmem>>, vector<8x32xbf16>
    tpu.vector_store %arg7[%c32_71, %c32_72], %308 {strides = array<i32>} : memref<64x64xbf16, #tpu.memory_space<vmem>>, vector<8x32xbf16>,
    %c3_i32 = arith.constant 3 : i32
    %310 = vector.broadcast %c3_i32 : i32 to vector<8x1xi32>
    %311 = arith.cmpi sgt, %9, %310 : vector<8x1xi32>
    %c4_i32 = arith.constant 4 : i32
    %312 = vector.broadcast %c4_i32 : i32 to vector<8x1xi32>
    %313 = arith.cmpi sgt, %9, %312 : vector<8x1xi32>
    %314 = vector.shape_cast %311 : vector<8x1xi1> to vector<8x1xi1>
    %315 = vector.broadcast %314 : vector<8x1xi1> to vector<8x32xi1>
    %316 = arith.select %315, %280, %238 : vector<8x32xi1>, vector<8x32xf32>
    %317 = vector.shape_cast %311 : vector<8x1xi1> to vector<8x1xi1>
    %318 = vector.broadcast %317 : vector<8x1xi1> to vector<8x32xi1>
    %319 = arith.select %318, %278, %241 : vector<8x32xi1>, vector<8x32xf32>
    %320 = vector.shape_cast %313 : vector<8x1xi1> to vector<8x1xi1>
    %321 = vector.broadcast %320 : vector<8x1xi1> to vector<8x32xi1>
    %322 = arith.select %321, %305, %244 : vector<8x32xi1>, vector<8x32xf32>
    %323 = vector.shape_cast %313 : vector<8x1xi1> to vector<8x1xi1>
    %324 = vector.broadcast %323 : vector<8x1xi1> to vector<8x32xi1>
    %325 = arith.select %324, %303, %247 : vector<8x32xi1>, vector<8x32xf32>
    %c32_73 = arith.constant 32 : index
    %c0_74 = arith.constant 0 : index
    %326 = vector.load %arg9[%c32_73, %c0_74] : memref<64x256xf32, #tpu.memory_space<vmem>>, vector<8x128xf32>
    %327 = arith.truncf %316 : vector<8x32xf32> to vector<8x32xbf16>
    %cst_75 = arith.constant dense<0.000000e+00> : vector<8x128xf32>
    %328 = tpu.matmul %327, %7, %cst_75 {dimension_numbers = #tpu.dot_dimension_numbers<[1], [0], [0], [1], [0, 0, 1, 1], [], []>} : vector<8x32xbf16>, vector<32x128xbf16>, vector<8x128xf32> -> vector<8x128xf32>
    %329 = arith.addf %326, %328 : vector<8x128xf32>
    %c24_76 = arith.constant 24 : index
    %c128_77 = arith.constant 128 : index
    %330 = vector.load %arg9[%c24_76, %c128_77] : memref<64x256xf32, #tpu.memory_space<vmem>>, vector<8x128xf32>
    %331 = arith.truncf %322 : vector<8x32xf32> to vector<8x32xbf16>
    %cst_78 = arith.constant dense<0.000000e+00> : vector<8x128xf32>
    %332 = tpu.matmul %331, %8, %cst_78 {dimension_numbers = #tpu.dot_dimension_numbers<[1], [0], [0], [1], [0, 0, 1, 1], [], []>} : vector<8x32xbf16>, vector<32x128xbf16>, vector<8x128xf32> -> vector<8x128xf32>
    %333 = arith.addf %330, %332 : vector<8x128xf32>
    %334 = vector.extract_strided_slice %329 {offsets = [0, 0], sizes = [8, 32], strides = [1, 1]} : vector<8x128xf32> to vector<8x32xf32>
    %335 = arith.negf %334 : vector<8x32xf32>
    %336 = math.exp %335 : vector<8x32xf32>
    %cst_79 = arith.constant 1.000000e+00 : f32
    %337 = vector.broadcast %cst_79 : f32 to vector<8x32xf32>
    %338 = arith.addf %337, %336 : vector<8x32xf32>
    %339 = arith.divf %337, %338 : vector<8x32xf32>
    %340 = vector.extract_strided_slice %329 {offsets = [0, 32], sizes = [8, 32], strides = [1, 1]} : vector<8x128xf32> to vector<8x32xf32>
    %341 = arith.negf %340 : vector<8x32xf32>
    %342 = math.exp %341 : vector<8x32xf32>
    %cst_80 = arith.constant 1.000000e+00 : f32
    %343 = vector.broadcast %cst_80 : f32 to vector<8x32xf32>
    %344 = arith.addf %343, %342 : vector<8x32xf32>
    %345 = arith.divf %343, %344 : vector<8x32xf32>
    %346 = vector.extract_strided_slice %329 {offsets = [0, 64], sizes = [8, 32], strides = [1, 1]} : vector<8x128xf32> to vector<8x32xf32>
    %347 = math.tanh %346 : vector<8x32xf32>
    %348 = vector.extract_strided_slice %329 {offsets = [0, 96], sizes = [8, 32], strides = [1, 1]} : vector<8x128xf32> to vector<8x32xf32>
    %349 = arith.negf %348 : vector<8x32xf32>
    %350 = math.exp %349 : vector<8x32xf32>
    %cst_81 = arith.constant 1.000000e+00 : f32
    %351 = vector.broadcast %cst_81 : f32 to vector<8x32xf32>
    %352 = arith.addf %351, %350 : vector<8x32xf32>
    %353 = arith.divf %351, %352 : vector<8x32xf32>
    %354 = arith.mulf %345, %319 : vector<8x32xf32>
    %355 = arith.mulf %339, %347 : vector<8x32xf32>
    %356 = arith.addf %354, %355 : vector<8x32xf32>
    %357 = math.tanh %356 : vector<8x32xf32>
    %358 = arith.mulf %353, %357 : vector<8x32xf32>
    %359 = vector.extract_strided_slice %333 {offsets = [0, 0], sizes = [8, 32], strides = [1, 1]} : vector<8x128xf32> to vector<8x32xf32>
    %360 = arith.negf %359 : vector<8x32xf32>
    %361 = math.exp %360 : vector<8x32xf32>
    %cst_82 = arith.constant 1.000000e+00 : f32
    %362 = vector.broadcast %cst_82 : f32 to vector<8x32xf32>
    %363 = arith.addf %362, %361 : vector<8x32xf32>
    %364 = arith.divf %362, %363 : vector<8x32xf32>
    %365 = vector.extract_strided_slice %333 {offsets = [0, 32], sizes = [8, 32], strides = [1, 1]} : vector<8x128xf32> to vector<8x32xf32>
    %366 = arith.negf %365 : vector<8x32xf32>
    %367 = math.exp %366 : vector<8x32xf32>
    %cst_83 = arith.constant 1.000000e+00 : f32
    %368 = vector.broadcast %cst_83 : f32 to vector<8x32xf32>
    %369 = arith.addf %368, %367 : vector<8x32xf32>
    %370 = arith.divf %368, %369 : vector<8x32xf32>
    %371 = vector.extract_strided_slice %333 {offsets = [0, 64], sizes = [8, 32], strides = [1, 1]} : vector<8x128xf32> to vector<8x32xf32>
    %372 = math.tanh %371 : vector<8x32xf32>
    %373 = vector.extract_strided_slice %333 {offsets = [0, 96], sizes = [8, 32], strides = [1, 1]} : vector<8x128xf32> to vector<8x32xf32>
    %374 = arith.negf %373 : vector<8x32xf32>
    %375 = math.exp %374 : vector<8x32xf32>
    %cst_84 = arith.constant 1.000000e+00 : f32
    %376 = vector.broadcast %cst_84 : f32 to vector<8x32xf32>
    %377 = arith.addf %376, %375 : vector<8x32xf32>
    %378 = arith.divf %376, %377 : vector<8x32xf32>
    %379 = arith.mulf %370, %325 : vector<8x32xf32>
    %380 = arith.mulf %364, %372 : vector<8x32xf32>
    %381 = arith.addf %379, %380 : vector<8x32xf32>
    %382 = math.tanh %381 : vector<8x32xf32>
    %383 = arith.mulf %378, %382 : vector<8x32xf32>
    %384 = arith.truncf %358 : vector<8x32xf32> to vector<8x32xbf16>
    %c32_85 = arith.constant 32 : index
    %c0_86 = arith.constant 0 : index
    %385 = vector.load %arg7[%c32_85, %c0_86] : memref<64x64xbf16, #tpu.memory_space<vmem>>, vector<8x32xbf16>
    tpu.vector_store %arg7[%c32_85, %c0_86], %384 {strides = array<i32>} : memref<64x64xbf16, #tpu.memory_space<vmem>>, vector<8x32xbf16>,
    %386 = arith.truncf %383 : vector<8x32xf32> to vector<8x32xbf16>
    %c24_87 = arith.constant 24 : index
    %c32_88 = arith.constant 32 : index
    %387 = vector.load %arg7[%c24_87, %c32_88] : memref<64x64xbf16, #tpu.memory_space<vmem>>, vector<8x32xbf16>
    tpu.vector_store %arg7[%c24_87, %c32_88], %386 {strides = array<i32>} : memref<64x64xbf16, #tpu.memory_space<vmem>>, vector<8x32xbf16>,
    %c4_i32_89 = arith.constant 4 : i32
    %388 = vector.broadcast %c4_i32_89 : i32 to vector<8x1xi32>
    %389 = arith.cmpi sgt, %9, %388 : vector<8x1xi32>
    %c3_i32_90 = arith.constant 3 : i32
    %390 = vector.broadcast %c3_i32_90 : i32 to vector<8x1xi32>
    %391 = arith.cmpi sgt, %9, %390 : vector<8x1xi32>
    %392 = vector.shape_cast %389 : vector<8x1xi1> to vector<8x1xi1>
    %393 = vector.broadcast %392 : vector<8x1xi1> to vector<8x32xi1>
    %394 = arith.select %393, %358, %316 : vector<8x32xi1>, vector<8x32xf32>
    %395 = vector.shape_cast %389 : vector<8x1xi1> to vector<8x1xi1>
    %396 = vector.broadcast %395 : vector<8x1xi1> to vector<8x32xi1>
    %397 = arith.select %396, %356, %319 : vector<8x32xi1>, vector<8x32xf32>
    %398 = vector.shape_cast %391 : vector<8x1xi1> to vector<8x1xi1>
    %399 = vector.broadcast %398 : vector<8x1xi1> to vector<8x32xi1>
    %400 = arith.select %399, %383, %322 : vector<8x32xi1>, vector<8x32xf32>
    %401 = vector.shape_cast %391 : vector<8x1xi1> to vector<8x1xi1>
    %402 = vector.broadcast %401 : vector<8x1xi1> to vector<8x32xi1>
    %403 = arith.select %402, %381, %325 : vector<8x32xi1>, vector<8x32xf32>
    %c40_91 = arith.constant 40 : index
    %c0_92 = arith.constant 0 : index
    %404 = vector.load %arg9[%c40_91, %c0_92] : memref<64x256xf32, #tpu.memory_space<vmem>>, vector<8x128xf32>
    %405 = arith.truncf %394 : vector<8x32xf32> to vector<8x32xbf16>
    %cst_93 = arith.constant dense<0.000000e+00> : vector<8x128xf32>
    %406 = tpu.matmul %405, %7, %cst_93 {dimension_numbers = #tpu.dot_dimension_numbers<[1], [0], [0], [1], [0, 0, 1, 1], [], []>} : vector<8x32xbf16>, vector<32x128xbf16>, vector<8x128xf32> -> vector<8x128xf32>
    %407 = arith.addf %404, %406 : vector<8x128xf32>
    %c16_94 = arith.constant 16 : index
    %c128_95 = arith.constant 128 : index
    %408 = vector.load %arg9[%c16_94, %c128_95] : memref<64x256xf32, #tpu.memory_space<vmem>>, vector<8x128xf32>
    %409 = arith.truncf %400 : vector<8x32xf32> to vector<8x32xbf16>
    %cst_96 = arith.constant dense<0.000000e+00> : vector<8x128xf32>
    %410 = tpu.matmul %409, %8, %cst_96 {dimension_numbers = #tpu.dot_dimension_numbers<[1], [0], [0], [1], [0, 0, 1, 1], [], []>} : vector<8x32xbf16>, vector<32x128xbf16>, vector<8x128xf32> -> vector<8x128xf32>
    %411 = arith.addf %408, %410 : vector<8x128xf32>
    %412 = vector.extract_strided_slice %407 {offsets = [0, 0], sizes = [8, 32], strides = [1, 1]} : vector<8x128xf32> to vector<8x32xf32>
    %413 = arith.negf %412 : vector<8x32xf32>
    %414 = math.exp %413 : vector<8x32xf32>
    %cst_97 = arith.constant 1.000000e+00 : f32
    %415 = vector.broadcast %cst_97 : f32 to vector<8x32xf32>
    %416 = arith.addf %415, %414 : vector<8x32xf32>
    %417 = arith.divf %415, %416 : vector<8x32xf32>
    %418 = vector.extract_strided_slice %407 {offsets = [0, 32], sizes = [8, 32], strides = [1, 1]} : vector<8x128xf32> to vector<8x32xf32>
    %419 = arith.negf %418 : vector<8x32xf32>
    %420 = math.exp %419 : vector<8x32xf32>
    %cst_98 = arith.constant 1.000000e+00 : f32
    %421 = vector.broadcast %cst_98 : f32 to vector<8x32xf32>
    %422 = arith.addf %421, %420 : vector<8x32xf32>
    %423 = arith.divf %421, %422 : vector<8x32xf32>
    %424 = vector.extract_strided_slice %407 {offsets = [0, 64], sizes = [8, 32], strides = [1, 1]} : vector<8x128xf32> to vector<8x32xf32>
    %425 = math.tanh %424 : vector<8x32xf32>
    %426 = vector.extract_strided_slice %407 {offsets = [0, 96], sizes = [8, 32], strides = [1, 1]} : vector<8x128xf32> to vector<8x32xf32>
    %427 = arith.negf %426 : vector<8x32xf32>
    %428 = math.exp %427 : vector<8x32xf32>
    %cst_99 = arith.constant 1.000000e+00 : f32
    %429 = vector.broadcast %cst_99 : f32 to vector<8x32xf32>
    %430 = arith.addf %429, %428 : vector<8x32xf32>
    %431 = arith.divf %429, %430 : vector<8x32xf32>
    %432 = arith.mulf %423, %397 : vector<8x32xf32>
    %433 = arith.mulf %417, %425 : vector<8x32xf32>
    %434 = arith.addf %432, %433 : vector<8x32xf32>
    %435 = math.tanh %434 : vector<8x32xf32>
    %436 = arith.mulf %431, %435 : vector<8x32xf32>
    %437 = vector.extract_strided_slice %411 {offsets = [0, 0], sizes = [8, 32], strides = [1, 1]} : vector<8x128xf32> to vector<8x32xf32>
    %438 = arith.negf %437 : vector<8x32xf32>
    %439 = math.exp %438 : vector<8x32xf32>
    %cst_100 = arith.constant 1.000000e+00 : f32
    %440 = vector.broadcast %cst_100 : f32 to vector<8x32xf32>
    %441 = arith.addf %440, %439 : vector<8x32xf32>
    %442 = arith.divf %440, %441 : vector<8x32xf32>
    %443 = vector.extract_strided_slice %411 {offsets = [0, 32], sizes = [8, 32], strides = [1, 1]} : vector<8x128xf32> to vector<8x32xf32>
    %444 = arith.negf %443 : vector<8x32xf32>
    %445 = math.exp %444 : vector<8x32xf32>
    %cst_101 = arith.constant 1.000000e+00 : f32
    %446 = vector.broadcast %cst_101 : f32 to vector<8x32xf32>
    %447 = arith.addf %446, %445 : vector<8x32xf32>
    %448 = arith.divf %446, %447 : vector<8x32xf32>
    %449 = vector.extract_strided_slice %411 {offsets = [0, 64], sizes = [8, 32], strides = [1, 1]} : vector<8x128xf32> to vector<8x32xf32>
    %450 = math.tanh %449 : vector<8x32xf32>
    %451 = vector.extract_strided_slice %411 {offsets = [0, 96], sizes = [8, 32], strides = [1, 1]} : vector<8x128xf32> to vector<8x32xf32>
    %452 = arith.negf %451 : vector<8x32xf32>
    %453 = math.exp %452 : vector<8x32xf32>
    %cst_102 = arith.constant 1.000000e+00 : f32
    %454 = vector.broadcast %cst_102 : f32 to vector<8x32xf32>
    %455 = arith.addf %454, %453 : vector<8x32xf32>
    %456 = arith.divf %454, %455 : vector<8x32xf32>
    %457 = arith.mulf %448, %403 : vector<8x32xf32>
    %458 = arith.mulf %442, %450 : vector<8x32xf32>
    %459 = arith.addf %457, %458 : vector<8x32xf32>
    %460 = math.tanh %459 : vector<8x32xf32>
    %461 = arith.mulf %456, %460 : vector<8x32xf32>
    %462 = arith.truncf %436 : vector<8x32xf32> to vector<8x32xbf16>
    %c40_103 = arith.constant 40 : index
    %c0_104 = arith.constant 0 : index
    %463 = vector.load %arg7[%c40_103, %c0_104] : memref<64x64xbf16, #tpu.memory_space<vmem>>, vector<8x32xbf16>
    tpu.vector_store %arg7[%c40_103, %c0_104], %462 {strides = array<i32>} : memref<64x64xbf16, #tpu.memory_space<vmem>>, vector<8x32xbf16>,
    %464 = arith.truncf %461 : vector<8x32xf32> to vector<8x32xbf16>
    %c16_105 = arith.constant 16 : index
    %c32_106 = arith.constant 32 : index
    %465 = vector.load %arg7[%c16_105, %c32_106] : memref<64x64xbf16, #tpu.memory_space<vmem>>, vector<8x32xbf16>
    tpu.vector_store %arg7[%c16_105, %c32_106], %464 {strides = array<i32>} : memref<64x64xbf16, #tpu.memory_space<vmem>>, vector<8x32xbf16>,
    %c5_i32_107 = arith.constant 5 : i32
    %466 = vector.broadcast %c5_i32_107 : i32 to vector<8x1xi32>
    %467 = arith.cmpi sgt, %9, %466 : vector<8x1xi32>
    %c2_i32_108 = arith.constant 2 : i32
    %468 = vector.broadcast %c2_i32_108 : i32 to vector<8x1xi32>
    %469 = arith.cmpi sgt, %9, %468 : vector<8x1xi32>
    %470 = vector.shape_cast %467 : vector<8x1xi1> to vector<8x1xi1>
    %471 = vector.broadcast %470 : vector<8x1xi1> to vector<8x32xi1>
    %472 = arith.select %471, %436, %394 : vector<8x32xi1>, vector<8x32xf32>
    %473 = vector.shape_cast %467 : vector<8x1xi1> to vector<8x1xi1>
    %474 = vector.broadcast %473 : vector<8x1xi1> to vector<8x32xi1>
    %475 = arith.select %474, %434, %397 : vector<8x32xi1>, vector<8x32xf32>
    %476 = vector.shape_cast %469 : vector<8x1xi1> to vector<8x1xi1>
    %477 = vector.broadcast %476 : vector<8x1xi1> to vector<8x32xi1>
    %478 = arith.select %477, %461, %400 : vector<8x32xi1>, vector<8x32xf32>
    %479 = vector.shape_cast %469 : vector<8x1xi1> to vector<8x1xi1>
    %480 = vector.broadcast %479 : vector<8x1xi1> to vector<8x32xi1>
    %481 = arith.select %480, %459, %403 : vector<8x32xi1>, vector<8x32xf32>
    %c48_109 = arith.constant 48 : index
    %c0_110 = arith.constant 0 : index
    %482 = vector.load %arg9[%c48_109, %c0_110] : memref<64x256xf32, #tpu.memory_space<vmem>>, vector<8x128xf32>
    %483 = arith.truncf %472 : vector<8x32xf32> to vector<8x32xbf16>
    %cst_111 = arith.constant dense<0.000000e+00> : vector<8x128xf32>
    %484 = tpu.matmul %483, %7, %cst_111 {dimension_numbers = #tpu.dot_dimension_numbers<[1], [0], [0], [1], [0, 0, 1, 1], [], []>} : vector<8x32xbf16>, vector<32x128xbf16>, vector<8x128xf32> -> vector<8x128xf32>
    %485 = arith.addf %482, %484 : vector<8x128xf32>
    %c8_112 = arith.constant 8 : index
    %c128_113 = arith.constant 128 : index
    %486 = vector.load %arg9[%c8_112, %c128_113] : memref<64x256xf32, #tpu.memory_space<vmem>>, vector<8x128xf32>
    %487 = arith.truncf %478 : vector<8x32xf32> to vector<8x32xbf16>
    %cst_114 = arith.constant dense<0.000000e+00> : vector<8x128xf32>
    %488 = tpu.matmul %487, %8, %cst_114 {dimension_numbers = #tpu.dot_dimension_numbers<[1], [0], [0], [1], [0, 0, 1, 1], [], []>} : vector<8x32xbf16>, vector<32x128xbf16>, vector<8x128xf32> -> vector<8x128xf32>
    %489 = arith.addf %486, %488 : vector<8x128xf32>
    %490 = vector.extract_strided_slice %485 {offsets = [0, 0], sizes = [8, 32], strides = [1, 1]} : vector<8x128xf32> to vector<8x32xf32>
    %491 = arith.negf %490 : vector<8x32xf32>
    %492 = math.exp %491 : vector<8x32xf32>
    %cst_115 = arith.constant 1.000000e+00 : f32
    %493 = vector.broadcast %cst_115 : f32 to vector<8x32xf32>
    %494 = arith.addf %493, %492 : vector<8x32xf32>
    %495 = arith.divf %493, %494 : vector<8x32xf32>
    %496 = vector.extract_strided_slice %485 {offsets = [0, 32], sizes = [8, 32], strides = [1, 1]} : vector<8x128xf32> to vector<8x32xf32>
    %497 = arith.negf %496 : vector<8x32xf32>
    %498 = math.exp %497 : vector<8x32xf32>
    %cst_116 = arith.constant 1.000000e+00 : f32
    %499 = vector.broadcast %cst_116 : f32 to vector<8x32xf32>
    %500 = arith.addf %499, %498 : vector<8x32xf32>
    %501 = arith.divf %499, %500 : vector<8x32xf32>
    %502 = vector.extract_strided_slice %485 {offsets = [0, 64], sizes = [8, 32], strides = [1, 1]} : vector<8x128xf32> to vector<8x32xf32>
    %503 = math.tanh %502 : vector<8x32xf32>
    %504 = vector.extract_strided_slice %485 {offsets = [0, 96], sizes = [8, 32], strides = [1, 1]} : vector<8x128xf32> to vector<8x32xf32>
    %505 = arith.negf %504 : vector<8x32xf32>
    %506 = math.exp %505 : vector<8x32xf32>
    %cst_117 = arith.constant 1.000000e+00 : f32
    %507 = vector.broadcast %cst_117 : f32 to vector<8x32xf32>
    %508 = arith.addf %507, %506 : vector<8x32xf32>
    %509 = arith.divf %507, %508 : vector<8x32xf32>
    %510 = arith.mulf %501, %475 : vector<8x32xf32>
    %511 = arith.mulf %495, %503 : vector<8x32xf32>
    %512 = arith.addf %510, %511 : vector<8x32xf32>
    %513 = math.tanh %512 : vector<8x32xf32>
    %514 = arith.mulf %509, %513 : vector<8x32xf32>
    %515 = vector.extract_strided_slice %489 {offsets = [0, 0], sizes = [8, 32], strides = [1, 1]} : vector<8x128xf32> to vector<8x32xf32>
    %516 = arith.negf %515 : vector<8x32xf32>
    %517 = math.exp %516 : vector<8x32xf32>
    %cst_118 = arith.constant 1.000000e+00 : f32
    %518 = vector.broadcast %cst_118 : f32 to vector<8x32xf32>
    %519 = arith.addf %518, %517 : vector<8x32xf32>
    %520 = arith.divf %518, %519 : vector<8x32xf32>
    %521 = vector.extract_strided_slice %489 {offsets = [0, 32], sizes = [8, 32], strides = [1, 1]} : vector<8x128xf32> to vector<8x32xf32>
    %522 = arith.negf %521 : vector<8x32xf32>
    %523 = math.exp %522 : vector<8x32xf32>
    %cst_119 = arith.constant 1.000000e+00 : f32
    %524 = vector.broadcast %cst_119 : f32 to vector<8x32xf32>
    %525 = arith.addf %524, %523 : vector<8x32xf32>
    %526 = arith.divf %524, %525 : vector<8x32xf32>
    %527 = vector.extract_strided_slice %489 {offsets = [0, 64], sizes = [8, 32], strides = [1, 1]} : vector<8x128xf32> to vector<8x32xf32>
    %528 = math.tanh %527 : vector<8x32xf32>
    %529 = vector.extract_strided_slice %489 {offsets = [0, 96], sizes = [8, 32], strides = [1, 1]} : vector<8x128xf32> to vector<8x32xf32>
    %530 = arith.negf %529 : vector<8x32xf32>
    %531 = math.exp %530 : vector<8x32xf32>
    %cst_120 = arith.constant 1.000000e+00 : f32
    %532 = vector.broadcast %cst_120 : f32 to vector<8x32xf32>
    %533 = arith.addf %532, %531 : vector<8x32xf32>
    %534 = arith.divf %532, %533 : vector<8x32xf32>
    %535 = arith.mulf %526, %481 : vector<8x32xf32>
    %536 = arith.mulf %520, %528 : vector<8x32xf32>
    %537 = arith.addf %535, %536 : vector<8x32xf32>
    %538 = math.tanh %537 : vector<8x32xf32>
    %539 = arith.mulf %534, %538 : vector<8x32xf32>
    %540 = arith.truncf %514 : vector<8x32xf32> to vector<8x32xbf16>
    %c48_121 = arith.constant 48 : index
    %c0_122 = arith.constant 0 : index
    %541 = vector.load %arg7[%c48_121, %c0_122] : memref<64x64xbf16, #tpu.memory_space<vmem>>, vector<8x32xbf16>
    tpu.vector_store %arg7[%c48_121, %c0_122], %540 {strides = array<i32>} : memref<64x64xbf16, #tpu.memory_space<vmem>>, vector<8x32xbf16>,
    %542 = arith.truncf %539 : vector<8x32xf32> to vector<8x32xbf16>
    %c8_123 = arith.constant 8 : index
    %c32_124 = arith.constant 32 : index
    %543 = vector.load %arg7[%c8_123, %c32_124] : memref<64x64xbf16, #tpu.memory_space<vmem>>, vector<8x32xbf16>
    tpu.vector_store %arg7[%c8_123, %c32_124], %542 {strides = array<i32>} : memref<64x64xbf16, #tpu.memory_space<vmem>>, vector<8x32xbf16>,
    %c6_i32_125 = arith.constant 6 : i32
    %544 = vector.broadcast %c6_i32_125 : i32 to vector<8x1xi32>
    %545 = arith.cmpi sgt, %9, %544 : vector<8x1xi32>
    %c1_i32_126 = arith.constant 1 : i32
    %546 = vector.broadcast %c1_i32_126 : i32 to vector<8x1xi32>
    %547 = arith.cmpi sgt, %9, %546 : vector<8x1xi32>
    %548 = vector.shape_cast %545 : vector<8x1xi1> to vector<8x1xi1>
    %549 = vector.broadcast %548 : vector<8x1xi1> to vector<8x32xi1>
    %550 = arith.select %549, %514, %472 : vector<8x32xi1>, vector<8x32xf32>
    %551 = vector.shape_cast %545 : vector<8x1xi1> to vector<8x1xi1>
    %552 = vector.broadcast %551 : vector<8x1xi1> to vector<8x32xi1>
    %553 = arith.select %552, %512, %475 : vector<8x32xi1>, vector<8x32xf32>
    %554 = vector.shape_cast %547 : vector<8x1xi1> to vector<8x1xi1>
    %555 = vector.broadcast %554 : vector<8x1xi1> to vector<8x32xi1>
    %556 = arith.select %555, %539, %478 : vector<8x32xi1>, vector<8x32xf32>
    %557 = vector.shape_cast %547 : vector<8x1xi1> to vector<8x1xi1>
    %558 = vector.broadcast %557 : vector<8x1xi1> to vector<8x32xi1>
    %559 = arith.select %558, %537, %481 : vector<8x32xi1>, vector<8x32xf32>
    %c56_127 = arith.constant 56 : index
    %c0_128 = arith.constant 0 : index
    %560 = vector.load %arg9[%c56_127, %c0_128] : memref<64x256xf32, #tpu.memory_space<vmem>>, vector<8x128xf32>
    %561 = arith.truncf %550 : vector<8x32xf32> to vector<8x32xbf16>
    %cst_129 = arith.constant dense<0.000000e+00> : vector<8x128xf32>
    %562 = tpu.matmul %561, %7, %cst_129 {dimension_numbers = #tpu.dot_dimension_numbers<[1], [0], [0], [1], [0, 0, 1, 1], [], []>} : vector<8x32xbf16>, vector<32x128xbf16>, vector<8x128xf32> -> vector<8x128xf32>
    %563 = arith.addf %560, %562 : vector<8x128xf32>
    %c0_130 = arith.constant 0 : index
    %c128_131 = arith.constant 128 : index
    %564 = vector.load %arg9[%c0_130, %c128_131] : memref<64x256xf32, #tpu.memory_space<vmem>>, vector<8x128xf32>
    %565 = arith.truncf %556 : vector<8x32xf32> to vector<8x32xbf16>
    %cst_132 = arith.constant dense<0.000000e+00> : vector<8x128xf32>
    %566 = tpu.matmul %565, %8, %cst_132 {dimension_numbers = #tpu.dot_dimension_numbers<[1], [0], [0], [1], [0, 0, 1, 1], [], []>} : vector<8x32xbf16>, vector<32x128xbf16>, vector<8x128xf32> -> vector<8x128xf32>
    %567 = arith.addf %564, %566 : vector<8x128xf32>
    %568 = vector.extract_strided_slice %563 {offsets = [0, 0], sizes = [8, 32], strides = [1, 1]} : vector<8x128xf32> to vector<8x32xf32>
    %569 = arith.negf %568 : vector<8x32xf32>
    %570 = math.exp %569 : vector<8x32xf32>
    %cst_133 = arith.constant 1.000000e+00 : f32
    %571 = vector.broadcast %cst_133 : f32 to vector<8x32xf32>
    %572 = arith.addf %571, %570 : vector<8x32xf32>
    %573 = arith.divf %571, %572 : vector<8x32xf32>
    %574 = vector.extract_strided_slice %563 {offsets = [0, 32], sizes = [8, 32], strides = [1, 1]} : vector<8x128xf32> to vector<8x32xf32>
    %575 = arith.negf %574 : vector<8x32xf32>
    %576 = math.exp %575 : vector<8x32xf32>
    %cst_134 = arith.constant 1.000000e+00 : f32
    %577 = vector.broadcast %cst_134 : f32 to vector<8x32xf32>
    %578 = arith.addf %577, %576 : vector<8x32xf32>
    %579 = arith.divf %577, %578 : vector<8x32xf32>
    %580 = vector.extract_strided_slice %563 {offsets = [0, 64], sizes = [8, 32], strides = [1, 1]} : vector<8x128xf32> to vector<8x32xf32>
    %581 = math.tanh %580 : vector<8x32xf32>
    %582 = vector.extract_strided_slice %563 {offsets = [0, 96], sizes = [8, 32], strides = [1, 1]} : vector<8x128xf32> to vector<8x32xf32>
    %583 = arith.negf %582 : vector<8x32xf32>
    %584 = math.exp %583 : vector<8x32xf32>
    %cst_135 = arith.constant 1.000000e+00 : f32
    %585 = vector.broadcast %cst_135 : f32 to vector<8x32xf32>
    %586 = arith.addf %585, %584 : vector<8x32xf32>
    %587 = arith.divf %585, %586 : vector<8x32xf32>
    %588 = arith.mulf %579, %553 : vector<8x32xf32>
    %589 = arith.mulf %573, %581 : vector<8x32xf32>
    %590 = arith.addf %588, %589 : vector<8x32xf32>
    %591 = math.tanh %590 : vector<8x32xf32>
    %592 = arith.mulf %587, %591 : vector<8x32xf32>
    %593 = vector.extract_strided_slice %567 {offsets = [0, 0], sizes = [8, 32], strides = [1, 1]} : vector<8x128xf32> to vector<8x32xf32>
    %594 = arith.negf %593 : vector<8x32xf32>
    %595 = math.exp %594 : vector<8x32xf32>
    %cst_136 = arith.constant 1.000000e+00 : f32
    %596 = vector.broadcast %cst_136 : f32 to vector<8x32xf32>
    %597 = arith.addf %596, %595 : vector<8x32xf32>
    %598 = arith.divf %596, %597 : vector<8x32xf32>
    %599 = vector.extract_strided_slice %567 {offsets = [0, 32], sizes = [8, 32], strides = [1, 1]} : vector<8x128xf32> to vector<8x32xf32>
    %600 = arith.negf %599 : vector<8x32xf32>
    %601 = math.exp %600 : vector<8x32xf32>
    %cst_137 = arith.constant 1.000000e+00 : f32
    %602 = vector.broadcast %cst_137 : f32 to vector<8x32xf32>
    %603 = arith.addf %602, %601 : vector<8x32xf32>
    %604 = arith.divf %602, %603 : vector<8x32xf32>
    %605 = vector.extract_strided_slice %567 {offsets = [0, 64], sizes = [8, 32], strides = [1, 1]} : vector<8x128xf32> to vector<8x32xf32>
    %606 = math.tanh %605 : vector<8x32xf32>
    %607 = vector.extract_strided_slice %567 {offsets = [0, 96], sizes = [8, 32], strides = [1, 1]} : vector<8x128xf32> to vector<8x32xf32>
    %608 = arith.negf %607 : vector<8x32xf32>
    %609 = math.exp %608 : vector<8x32xf32>
    %cst_138 = arith.constant 1.000000e+00 : f32
    %610 = vector.broadcast %cst_138 : f32 to vector<8x32xf32>
    %611 = arith.addf %610, %609 : vector<8x32xf32>
    %612 = arith.divf %610, %611 : vector<8x32xf32>
    %613 = arith.mulf %604, %559 : vector<8x32xf32>
    %614 = arith.mulf %598, %606 : vector<8x32xf32>
    %615 = arith.addf %613, %614 : vector<8x32xf32>
    %616 = math.tanh %615 : vector<8x32xf32>
    %617 = arith.mulf %612, %616 : vector<8x32xf32>
    %618 = arith.truncf %592 : vector<8x32xf32> to vector<8x32xbf16>
    %c56_139 = arith.constant 56 : index
    %c0_140 = arith.constant 0 : index
    %619 = vector.load %arg7[%c56_139, %c0_140] : memref<64x64xbf16, #tpu.memory_space<vmem>>, vector<8x32xbf16>
    tpu.vector_store %arg7[%c56_139, %c0_140], %618 {strides = array<i32>} : memref<64x64xbf16, #tpu.memory_space<vmem>>, vector<8x32xbf16>,
    %620 = arith.truncf %617 : vector<8x32xf32> to vector<8x32xbf16>
    %c0_141 = arith.constant 0 : index
    %c32_142 = arith.constant 32 : index
    %621 = vector.load %arg7[%c0_141, %c32_142] : memref<64x64xbf16, #tpu.memory_space<vmem>>, vector<8x32xbf16>
    tpu.vector_store %arg7[%c0_141, %c32_142], %620 {strides = array<i32>} : memref<64x64xbf16, #tpu.memory_space<vmem>>, vector<8x32xbf16>,
    %c7_i32_143 = arith.constant 7 : i32
    %622 = vector.broadcast %c7_i32_143 : i32 to vector<8x1xi32>
    %623 = arith.cmpi sgt, %9, %622 : vector<8x1xi32>
    %c0_i32_144 = arith.constant 0 : i32
    %624 = vector.broadcast %c0_i32_144 : i32 to vector<8x1xi32>
    %625 = arith.cmpi sgt, %9, %624 : vector<8x1xi32>
    %626 = vector.shape_cast %623 : vector<8x1xi1> to vector<8x1xi1>
    %627 = vector.broadcast %626 : vector<8x1xi1> to vector<8x32xi1>
    %628 = arith.select %627, %592, %550 : vector<8x32xi1>, vector<8x32xf32>
    %629 = vector.shape_cast %625 : vector<8x1xi1> to vector<8x1xi1>
    %630 = vector.broadcast %629 : vector<8x1xi1> to vector<8x32xi1>
    %631 = arith.select %630, %617, %556 : vector<8x32xi1>, vector<8x32xf32>
    %c0_145 = arith.constant 0 : index
    %c0_146 = arith.constant 0 : index
    %632 = vector.load %arg8[%c0_145, %c0_146] : memref<8x64xf32, #tpu.memory_space<vmem>>, vector<8x32xf32>
    tpu.vector_store %arg8[%c0_145, %c0_146], %628 {strides = array<i32>} : memref<8x64xf32, #tpu.memory_space<vmem>>, vector<8x32xf32>,
    %c0_147 = arith.constant 0 : index
    %c32_148 = arith.constant 32 : index
    %633 = vector.load %arg8[%c0_147, %c32_148] : memref<8x64xf32, #tpu.memory_space<vmem>>, vector<8x32xf32>
    tpu.vector_store %arg8[%c0_147, %c32_148], %631 {strides = array<i32>} : memref<8x64xf32, #tpu.memory_space<vmem>>, vector<8x32xf32>,
    return
  }
  func.func @transform_0(%arg0: i32) -> (i32, i32) {
    %c0_i32 = arith.constant 0 : i32
    %c0_i32_0 = arith.constant 0 : i32
    %c0_i32_1 = arith.constant 0 : i32
    return %c0_i32, %c0_i32_0 : i32, i32
  }
  func.func @transform_1(%arg0: i32) -> (i32, i32) {
    %c0_i32 = arith.constant 0 : i32
    %c0_i32_0 = arith.constant 0 : i32
    %c0_i32_1 = arith.constant 0 : i32
    return %c0_i32, %c0_i32_0 : i32, i32
  }
  func.func @transform_2(%arg0: i32) -> (i32, i32) {
    %c0_i32 = arith.constant 0 : i32
    %c0_i32_0 = arith.constant 0 : i32
    %c0_i32_1 = arith.constant 0 : i32
    return %c0_i32, %c0_i32_0 : i32, i32
  }
  func.func @transform_3(%arg0: i32) -> (i32, i32) {
    %c0_i32 = arith.constant 0 : i32
    %c0_i32_0 = arith.constant 0 : i32
    %c0_i32_1 = arith.constant 0 : i32
    return %c0_i32, %c0_i32_0 : i32, i32
  }
  func.func @transform_4(%arg0: i32) -> (i32, i32) {
    %c0_i32 = arith.constant 0 : i32
    %c0_i32_0 = arith.constant 0 : i32
    %c0_i32_1 = arith.constant 0 : i32
    return %c0_i32, %c0_i32_0 : i32, i32
  }
  func.func @transform_5(%arg0: i32) -> (i32, i32) {
    %c0_i32 = arith.constant 0 : i32
    %c0_i32_0 = arith.constant 0 : i32
    %c0_i32_1 = arith.constant 0 : i32
    return %c0_i32, %c0_i32_0 : i32, i32
  }
  func.func @transform_6(%arg0: i32) -> (i32, i32) {
    %c0_i32 = arith.constant 0 : i32
    %c0_i32_0 = arith.constant 0 : i32
    %c0_i32_1 = arith.constant 0 : i32
    return %c0_i32, %c0_i32_0 : i32, i32
  }
  func.func @transform_7(%arg0: i32) -> (i32, i32) {
    %c0_i32 = arith.constant 0 : i32
    %c0_i32_0 = arith.constant 0 : i32
    %c0_i32_1 = arith.constant 0 : i32
    return %c0_i32, %c0_i32_0 : i32, i32
  }
}

</mosaic_0001>

<bundles_post_ra>
// kernel: bilstm_forward.3
= control target key start
LH: loop header
LB: loop body
LE: loop exit
PB: predicated region body
PF: predicated region fallthrough
CT: control target
= control target key end

     0   :  { %v1652_v12 = vmov 0   ;;  %s2343_s0 = inlined_call_operand.vmem [shape: bf16[64,64], index: 0, kind: input, shape index: {}]   ;;  %s2344_s1 = inlined_call_operand.vmem [shape: s32[8,1], index: 1, kind: input, shape index: {}]   ;;  %s2345_s2 = inlined_call_operand.vmem [shape: bf16[64,256], index: 2, kind: input, shape index: {}]   ;;  %s2346_s3 = inlined_call_operand.vmem [shape: bf16[32,128], index: 3, kind: input, shape index: {}]   ;;  %s2347_s4 = inlined_call_operand.vmem [shape: bf16[32,128], index: 4, kind: input, shape index: {}]   ;;  %s2348_s5 = inlined_call_operand.vmem [shape: f32[1,256], index: 5, kind: input, shape index: {}]   ;;  %s2349_s6 = inlined_call_operand.hbm [shape: bf16[64,64], index: 6, kind: output, shape index: {0}]   ;;  %s2350_s7 = inlined_call_operand.vmem [shape: f32[8,64], index: 7, kind: output, shape index: {1}]  }
   0x1   :  { %v1414_v0 = vld [vmem:[%s2345_s2 + $0x30] sm:$0xf]  ;;  %v1485_v1 = vld [vmem:[%s2345_s2 + $0x34] sm:$0xf0]  ;;  %v1484_v2 = vld [vmem:[%s2345_s2 + $0x34] sm:$0xf]  ;;  %1495 = vset.pattern.permute.xlu0 %v1652_v12  ;;  %1496 = vset.pattern.permute.xlu1 %v1652_v12 }
   0x2   :  { %v1415_v3 = vor.u32 %v1485_v1, %v1414_v0  ;;  %v1416_v4 = vld [vmem:[%s2345_s2 + $0x38] sm:$0xf0]  ;;  %v1406_v5 = vld [vmem:[%s2345_s2 + $0x20] sm:$0xf]  ;;  %v1483_v6 = vld [vmem:[%s2345_s2 + $0x24] sm:$0xf0]  ;;  %1497 = vset.pattern.permute.xlu2 %v1652_v12 }
   0x3   :  { %v1419_v7 = vor.u32 %v1484_v2, %v1416_v4  ;;  %v1482_v8 = vld [vmem:[%s2345_s2 + $0x24] sm:$0xf]  ;;  %v1408_v9 = vld [vmem:[%s2345_s2 + $0x28] sm:$0xf0]  ;;  %v1407_v11 = vor.u32 %v1483_v6, %v1406_v5  ;;  %v1398_v14 = vld [vmem:[%s2345_s2 + $0x10] sm:$0xf] }
   0x4   :  { %v1724_v10 = vld [vmem:[%s2346_s3 + $0x8] sm:$0xff]  ;;  %126 = vmatpush.bf16.msra.mxu0 %v1415_v3  ;;  %v1411_v13 = vor.u32 %v1482_v8, %v1408_v9  ;;  %v1481_v15 = vld [vmem:[%s2345_s2 + $0x14] sm:$0xf0]  ;;  %v1737_v16 = vld [vmem:[%s2346_s3] sm:$0xff] }
   0x5   :  { %155 = vmatpush.bf16.msra.mxu1 %v1419_v7  ;;  %228 = vmatpush.bf16.msra.mxu2 %v1724_v10  ;;  %v1480_v17 = vld [vmem:[%s2345_s2 + $0x14] sm:$0xf]  ;;  %v1400_v18 = vld [vmem:[%s2345_s2 + $0x18] sm:$0xf0]  ;;  %v1399_v19 = vor.u32 %v1481_v15, %v1398_v14 }
   0x8   :  { %127 = vmatpush.bf16.msra.mxu0 %v1407_v11 }
   0x9   :  { %13 = vsyncpa [#allocation4], 0  ;;  %156 = vmatpush.bf16.msra.mxu1 %v1411_v13  ;;  %v1403_v20 = vor.u32 %v1480_v17, %v1400_v18  ;;  %229 = vmatpush.bf16.msra.mxu2 %v1737_v16  ;;  %v1390_v21 = vld [vmem:[%s2345_s2] sm:$0xf]  ;;  %v1479_v22 = vld [vmem:[%s2345_s2 + $0x4] sm:$0xf0] }
   0xa   :  { %v1478_v23 = vld [vmem:[%s2345_s2 + $0x4] sm:$0xf]  ;;  %v1392_v24 = vld [vmem:[%s2345_s2 + $0x8] sm:$0xf0]  ;;  %v1391_v25 = vor.u32 %v1479_v22, %v1390_v21  ;;  %vm109_vm0 = vcmask 523264   ;;  %v1476_v31 = vld [vmem:[%s2343_s0 + $0x10] sm:$0xff] }
   0xb   :  { %v1395_v26 = vor.u32 %v1478_v23, %v1392_v24  ;;  %v1474_v27 = vld [vmem:[%s2343_s0] sm:$0xff]  ;;  %v1774_v28 = vld [vmem:[%s2347_s4 + $0x8] sm:$0xff]  ;;  %v1477_v32 = vld [vmem:[%s2343_s0 + $0x18] sm:$0xff]  ;;  %vm218_vm13 = vcmask 261120   ;;  %s1655_s28 = smov [#allocation3]   ;;  %s1356_s8 = sshll.u32 %s2349_s6, 4  ;;  %s1357_s8 = int_to_ptr.hbm [resolvable:$true] %s1356_s8 }
   0xc   :  { %128 = vmatpush.bf16.msra.mxu0 %v1399_v19  ;;  %230 = vmatmul.bf16.vlgmr.msra.gmra.mxu2 %v1652_v12  ;;  %v1781_v29 = vld [vmem:[%s2347_s4] sm:$0xff]  ;;  %v1475_v30 = vld [vmem:[%s2343_s0 + $0x8] sm:$0xff]  ;;  %s1653_s0 = smov 64   ;;  %s1354_s3 = sshll.u32 %s1655_s28, 4  ;;  %s1355_s3 = int_to_ptr.vmem [resolvable:$true] %s1354_s3 }
   0xd   :  { %381 = vmatpush.bf16.msrb.mxu2 %v1724_v10  ;;  %157 = vmatpush.bf16.msra.mxu1 %v1403_v20  ;;  %v43_v33 = vld [vmem:[%s2348_s5] sm:$0x3]  ;;  %s1656_s9 = smov 4  }
   0xe   :  { %255 = vmatpush.bf16.msra.mxu3 %v1774_v28  ;;  %v1813_v34 = vperm.slane %v43_v33, 0  ;;  %v46_v35 = vperm.slane %v43_v33, 1  ;;  %v1835_v1 = vld [vmem:[%s2344_s1] sm:$0xff]  ;;  %s1654_s1 = smov 32  }
   0xf   :  { %vm351_vm1 = vcmp.gt.s32.totalorder %v1835_v1, 0  ;;  %vm352_vm10 = vcmp.gt.s32.totalorder %v1835_v1, 7 }
  0x10   :  { %129 = vmatpush.bf16.msra.mxu0 %v1391_v25  ;;  %v353_v2 = vsel %vm351_vm1, 1, %v1652_v12 }
  0x11   :  { %382 = vmatpush.bf16.msrb.mxu2 %v1737_v16  ;;  %158 = vmatpush.bf16.msra.mxu1 %v1395_v26 }
  0x12   :  { %256 = vmatpush.bf16.msra.mxu3 %v1781_v29 }
  0x13   :  { %1420 = vmatmul.msk.bf16.vlgmr.msra.gmra.mxu0 %vm109_vm0, %v1474_v27 }
  0x14   :  { %953 = vmatpush.bf16.msrb.mxu0 %v1724_v10  ;;  %1424 = vmatmul.msk.bf16.vlgmr.msra.gmra.mxu1 %vm109_vm0, %v1474_v27 }
  0x15   :  { %527 = vmatpush.bf16.msra.mxu2 %v1724_v10  ;;  %975 = vmatpush.bf16.msrb.mxu1 %v1774_v28 }
  0x16   :  { %403 = vmatpush.bf16.msrb.mxu3 %v1774_v28 }
  0x17   :  { %257 = vmatmul.bf16.vlgmr.msra.gmra.mxu3 %v1652_v12 }
  0x18   :  { %954 = vmatpush.bf16.msrb.mxu0 %v1737_v16 }
  0x19   :  { %528 = vmatpush.bf16.msra.mxu2 %v1737_v16  ;;  %976 = vmatpush.bf16.msrb.mxu1 %v1781_v29 }
  0x1a   :  { %404 = vmatpush.bf16.msrb.mxu3 %v1781_v29 }
  0x1c   :  { %1221 = vmatpush.bf16.msra.mxu0 %v1724_v10 }
  0x1d   :  { %1243 = vmatpush.bf16.msra.mxu1 %v1774_v28 }
  0x1e   :  { %549 = vmatpush.bf16.msra.mxu3 %v1774_v28 }
  0x20   :  { %1222 = vmatpush.bf16.msra.mxu0 %v1737_v16 }
  0x21   :  { %1244 = vmatpush.bf16.msra.mxu1 %v1781_v29 }
  0x22   :  { %550 = vmatpush.bf16.msra.mxu3 %v1781_v29 }
  0x23   :  { %1421 = vmatmul.msk.bf16.gmra.mxu0 %vm109_vm0, %v1475_v30 }
  0x24   :  { %1425 = vmatmul.msk.bf16.gmra.mxu1 %vm109_vm0, %v1475_v30 }
  0x33   :  { %1422 = vmatmul.msk.bf16.gmra.mxu0 %vm109_vm0, %v1476_v31 }
  0x34   :  { %1426 = vmatmul.msk.bf16.gmra.mxu1 %vm109_vm0, %v1476_v31 }
  0x43   :  { %1423 = vmatmul.msk.bf16.gmra.mxu0 %vm109_vm0, %v1477_v32 }
  0x44   :  { %1427 = vmatmul.msk.bf16.gmra.mxu1 %vm109_vm0, %v1477_v32 }
  0x8f   :  { %v231_v36 = vpop.f32.mrf.mxu2 }
  0x90   :  { %v131_v37 = vpop.f32.mrf.mxu0 }
  0x91   :  { %v132_v38 = vadd.f32 %v131_v37, %v1813_v34  ;;  %v160_v39 = vpop.f32.mrf.mxu1 }
  0x92   :  { %v1816_v40 = vadd.f32 %v160_v39, %v46_v35 }
  0x93   :  { %v235_v41 = vadd.f32 %v231_v36, %v132_v38  ;;  %v360_v36 = vsel %vm352_vm10, 1, %v1652_v12 }
  0x95   :  { %1498 = vtanh.f32 %v235_v41  ;;  %v1444_v62 = vmul.f32 -1.442695, %v235_v41 }
  0x97   :  { %v233_v42 = vpop.f32.mrf.mxu2 }
  0x99   :  { %v162_v43 = vpop.f32.mrf.mxu1 }
  0x9a   :  { %v1818_v44 = vadd.f32 %v162_v43, %v46_v35  ;;  %v258_v48 = vpop.f32.mrf.mxu3 }
  0x9b   :  { %v1499_v45 = vpop.eup %1498 }
  0x9c   :  { %285 = vrot.lane.b32.xlu0 %v1499_v45, %s1653_s0 }
  0xa1   :  { %v165_v46 = vpop.f32.mrf.mxu1 }
  0xa2   :  { %v1821_v47 = vadd.f32 %v165_v46, %v46_v35  ;;  %v260_v51 = vpop.f32.mrf.mxu3 }
  0xa9   :  { %v167_v49 = vpop.f32.mrf.mxu1 }
  0xaa   :  { %v1823_v50 = vadd.f32 %v167_v49, %v46_v35 }
  0xb1   :  { %v170_v52 = vpop.f32.mrf.mxu1 }
  0xb2   :  { %v1825_v53 = vadd.f32 %v170_v52, %v46_v35 }
  0xb9   :  { %v172_v54 = vpop.f32.mrf.mxu1 }
  0xba   :  { %v1827_v55 = vadd.f32 %v172_v54, %v46_v35 }
  0xc1   :  { %v175_v56 = vpop.f32.mrf.mxu1 }
  0xc2   :  { %v1829_v57 = vadd.f32 %v175_v56, %v46_v35 }
  0xc9   :  { %v177_v58 = vpop.f32.mrf.mxu1 }
  0xca   :  { %v178_v59 = vadd.f32 %v177_v58, %v46_v35 }
  0xcc   :  { %v262_v60 = vadd.f32 %v258_v48, %v178_v59 }
  0xce   :  { %1500 = vtanh.f32 %v262_v60  ;;  %v1445_v18 = vmul.f32 -1.442695, %v262_v60 }
  0xcf   :  { %1502 = vpow2.f32 %v1444_v62 }
  0xd4   :  { %v1501_v61 = vpop.eup %1500 }
  0xd5   :  { %322 = vrot.lane.b32.xlu0 %v1501_v61, %s1653_s0  ;;  %v1503_v63 = vpop.eup %1502 }
  0xd6   :  { %v266_v0 = vadd.f32 1.0, %v1503_v63 }
  0xd8   :  { %1504 = vrcp.f32 %v266_v0  ;;  %vm272_vm2 = vweird.f32 %v266_v0  ;;  %v278_v7 = vand.u32 2147483648, %v266_v0  ;;  %v276_v9 = vand.u32 2147483647, %v266_v0 }
  0xd9   :  { %1506 = vpow2.f32 %v1445_v18 }
  0xda   :  { %v279_v11 = vor.u32 1.1754944e-38, %v278_v7  ;;  %vm277_vm5 = vcmp.eq.f32.partialorder %v276_v9, 8.507059e+37 }
  0xdd   :  { %355 = vperm.xlu0 %1495, %v353_v2  }
  0xde   :  { %v1505_v3 = vpop.eup %1504 }
  0xdf   :  { %v268_v4 = vmul.f32 %v1505_v3, %v266_v0  ;;  %vm273_vm3 = vweird.f32 %v1505_v3  ;;  %v1507_v19 = vpop.eup %1506  ;;  %v133_v0 = vpop.f32.mrf.mxu0 }
  0xe0   :  { %vm274_vm4 = vmor %vm272_vm2, %vm273_vm3  ;;  %v303_v20 = vadd.f32 1.0, %v1507_v19  ;;  %v134_v2 = vadd.f32 %v133_v0, %v1813_v34 }
  0xe1   :  { %v269_v5 = vsub.f32 1.0, %v268_v4 }
  0xe2   :  { %1508 = vrcp.f32 %v303_v20  ;;  %v315_v26 = vand.u32 2147483648, %v303_v20  ;;  %vm309_vm7 = vweird.f32 %v303_v20  ;;  %v313_v27 = vand.u32 2147483647, %v303_v20 }
  0xe3   :  { %v270_v6 = vmul.f32 %v1505_v3, %v269_v5 }
  0xe4   :  { %v316_v31 = vor.u32 1.1754944e-38, %v315_v26  ;;  %vm314_vm9 = vcmp.eq.f32.partialorder %v313_v27, 8.507059e+37 }
  0xe5   :  { %v271_v8 = vadd.f32 %v1505_v3, %v270_v6 }
  0xe7   :  { %v275_v13 = vsel %vm274_vm4, %v1505_v3, %v271_v8 }
  0xe8   :  { %v280_v15 = vsel %vm277_vm5, %v279_v11, %v275_v13  ;;  %v1509_v21 = vpop.eup %1508 }
  0xe9   :  { %v305_v22 = vmul.f32 %v1509_v21, %v303_v20  ;;  %vm310_vm6 = vweird.f32 %v1509_v21  ;;  %v283_v37 = vmul.f32 0.0, %v280_v15 }
  0xea   :  { %vm311_vm8 = vmor %vm309_vm7, %vm310_vm6  ;;  %vm497_vm6 = vcmp.gt.s32.totalorder %v1835_v1, 1  ;;  %vm498_vm7 = vcmp.gt.s32.totalorder %v1835_v1, 6 }
  0xeb   :  { %v306_v23 = vsub.f32 1.0, %v305_v22 }
  0xed   :  { %v307_v24 = vmul.f32 %v1509_v21, %v306_v23 }
  0xef   :  { %v308_v25 = vadd.f32 %v1509_v21, %v307_v24 }
  0xf1   :  { %v312_v30 = vsel %vm311_vm8, %v1509_v21, %v308_v25 }
  0xf2   :  { %v317_v32 = vsel %vm314_vm9, %v316_v31, %v312_v30 }
  0xf3   :  { %v320_v42 = vmul.f32 0.0, %v317_v32 }
 0x10e   :  { %v286_v14 = vpop.permute.xlu0 %285 }
 0x10f   :  { %v288_v17 = vmul.f32 %v286_v14, %v280_v15 }
 0x111   :  { %290 = vrot.lane.b32.xlu1 %v288_v17, %s1654_s1 }
 0x147   :  { %v323_v33 = vpop.permute.xlu0 %322 }
 0x148   :  { %v325_v35 = vmul.f32 %v323_v33, %v317_v32 }
 0x14a   :  { %327 = vrot.lane.b32.xlu1 %v325_v35, %s1654_s1 }
 0x14f   :  { %v1851_v48 = vpop.permute.xlu0 %355 }
 0x150   :  { %vm357_vm11 = vcmp.eq.s32.totalorder %v1851_v48, 1 }
 0x152   :  { %362 = vperm.xlu1 %1496, %v360_v36  }
 0x183   :  { %v291_v38 = vpop.permute.xlu1 %290 }
 0x184   :  { %v1843_v39 = vadd.f32 %v291_v38, %v283_v37 }
 0x186   :  { %1510 = vtanh.f32 %v1843_v39 }
 0x18c   :  { %v1511_v41 = vpop.eup %1510 }
 0x18d   :  { %296 = vrot.lane.b32.xlu2 %v1511_v41, %s1653_s0 }
 0x1bc   :  { %v328_v43 = vpop.permute.xlu1 %327 }
 0x1bd   :  { %v1847_v45 = vadd.f32 %v328_v43, %v320_v42 }
 0x1bf   :  { %1512 = vtanh.f32 %v1847_v45 }
 0x1c4   :  { %v1864_v56 = vpop.permute.xlu1 %362 }
 0x1c5   :  { %v1513_v46 = vpop.eup %1512  ;;  %vm364_vm12 = vcmp.eq.s32.totalorder %v1864_v56, 1 }
 0x1c6   :  { %333 = vrot.lane.b32.xlu2 %v1513_v46, %s1653_s0 }
 0x1e7   :  { %v297_v49 = vpop.permute.xlu2 %296 }
 0x1e8   :  { %v1853_v51 = vmul.f32 %v297_v49, %v280_v15 }
 0x1ea   :  { %v1859_v52 = vsel %vm357_vm11, %v1853_v51, 0.0 }
 0x1eb   :  { %v368_v54 = vpack.c.bf16 %v1859_v52, %v1859_v52 }
 0x1ed   :  { %370 = vrot.lane.b32.xlu2 %v368_v54, %s1654_s1 }
 0x220   :  { %v334_v58 = vpop.permute.xlu2 %333 }
 0x221   :  { %v1866_v59 = vmul.f32 %v334_v58, %v317_v32 }
 0x223   :  { %v1872_v60 = vsel %vm364_vm12, %v1866_v59, 0.0 }
 0x224   :  { %v390_v61 = vpack.c.bf16 %v1872_v60, %v1872_v60 }
 0x226   :  { %392 = vrot.lane.b32.xlu1 %v390_v61, %s1654_s1  ;;  %v499_v61 = vsel %vm497_vm6, 1, %v1652_v12  ;;  %vm644_vm6 = vcmp.gt.s32.totalorder %v1835_v1, 5 }
 0x247   :  { %v371_v62 = vpop.permute.xlu2 %370 }
 0x248   :  { %1446 = vmatmul.msk.bf16.vlgmr.msrb.gmra.mxu2 %vm218_vm13, %v371_v62  ;;  %v1894_v62 = vsel %vm357_vm11, %v1843_v39, 0.0  ;;  %v1906_v39 = vsel %vm364_vm12, %v1847_v45, 0.0 }
 0x249   :  { %673 = vmatpush.bf16.msrb.mxu2 %v1724_v10 }
 0x24d   :  { %674 = vmatpush.bf16.msrb.mxu2 %v1737_v16 }
 0x298   :  { %v393_v63 = vpop.permute.xlu1 %392 }
 0x299   :  { %1447 = vmatmul.msk.bf16.vlgmr.msrb.gmra.mxu3 %vm218_vm13, %v393_v63 }
 0x29a   :  { %695 = vmatpush.bf16.msrb.mxu3 %v1774_v28 }
 0x29e   :  { %696 = vmatpush.bf16.msrb.mxu3 %v1781_v29 }
 0x2cb   :  { %v384_v3 = vpop.f32.mrf.mxu2 }
 0x2cc   :  { %v388_v4 = vadd.f32 %v384_v3, %v134_v2 }
 0x2ce   :  { %1514 = vtanh.f32 %v388_v4  ;;  %v1448_v7 = vmul.f32 -1.442695, %v388_v4  ;;  %v506_v4 = vsel %vm498_vm7, 1, %v1652_v12 }
 0x2d0   :  { %1516 = vpow2.f32 %v1448_v7 }
 0x2d3   :  { %v386_v5 = vpop.f32.mrf.mxu2 }
 0x2d4   :  { %v1515_v6 = vpop.eup %1514 }
 0x2d5   :  { %433 = vrot.lane.b32.xlu2 %v1515_v6, %s1653_s0 }
 0x2d6   :  { %v1517_v8 = vpop.eup %1516 }
 0x2d7   :  { %v414_v9 = vadd.f32 1.0, %v1517_v8 }
 0x2d9   :  { %1518 = vrcp.f32 %v414_v9  ;;  %v426_v22 = vand.u32 2147483648, %v414_v9  ;;  %vm420_vm15 = vweird.f32 %v414_v9  ;;  %v424_v23 = vand.u32 2147483647, %v414_v9 }
 0x2db   :  { %v427_v25 = vor.u32 1.1754944e-38, %v426_v22  ;;  %vm425_vm1 = vcmp.eq.f32.partialorder %v424_v23, 8.507059e+37 }
 0x2df   :  { %v1519_v11 = vpop.eup %1518 }
 0x2e0   :  { %v416_v14 = vmul.f32 %v1519_v11, %v414_v9  ;;  %vm421_vm14 = vweird.f32 %v1519_v11 }
 0x2e1   :  { %vm422_vm0 = vmor %vm420_vm15, %vm421_vm14 }
 0x2e2   :  { %v417_v17 = vsub.f32 1.0, %v416_v14 }
 0x2e4   :  { %v418_v19 = vmul.f32 %v1519_v11, %v417_v17 }
 0x2e6   :  { %v419_v21 = vadd.f32 %v1519_v11, %v418_v19 }
 0x2e8   :  { %v423_v24 = vsel %vm422_vm0, %v1519_v11, %v419_v21 }
 0x2e9   :  { %v428_v27 = vsel %vm425_vm1, %v427_v25, %v423_v24 }
 0x2ea   :  { %v431_v63 = vmul.f32 %v428_v27, %v1894_v62 }
 0x31c   :  { %v406_v13 = vpop.f32.mrf.mxu3 }
 0x31d   :  { %v410_v15 = vadd.f32 %v406_v13, %v1829_v57 }
 0x31f   :  { %1520 = vtanh.f32 %v410_v15  ;;  %v1449_v57 = vmul.f32 -1.442695, %v410_v15 }
 0x321   :  { %1522 = vpow2.f32 %v1449_v57 }
 0x324   :  { %v408_v18 = vpop.f32.mrf.mxu3 }
 0x325   :  { %v1521_v20 = vpop.eup %1520 }
 0x326   :  { %470 = vrot.lane.b32.xlu0 %v1521_v20, %s1653_s0 }
 0x327   :  { %v1523_v31 = vpop.eup %1522 }
 0x328   :  { %v451_v32 = vadd.f32 1.0, %v1523_v31 }
 0x32a   :  { %1524 = vrcp.f32 %v451_v32  ;;  %v463_v41 = vand.u32 2147483648, %v451_v32  ;;  %vm457_vm3 = vweird.f32 %v451_v32  ;;  %v461_v42 = vand.u32 2147483647, %v451_v32 }
 0x32c   :  { %v464_v46 = vor.u32 1.1754944e-38, %v463_v41  ;;  %vm462_vm5 = vcmp.eq.f32.partialorder %v461_v42, 8.507059e+37 }
 0x32f   :  { %v434_v26 = vpop.permute.xlu2 %433 }
 0x330   :  { %v436_v30 = vmul.f32 %v434_v26, %v428_v27  ;;  %v1525_v33 = vpop.eup %1524 }
 0x331   :  { %v453_v35 = vmul.f32 %v1525_v33, %v451_v32  ;;  %vm458_vm2 = vweird.f32 %v1525_v33 }
 0x332   :  { %438 = vrot.lane.b32.xlu1 %v436_v30, %s1654_s1  ;;  %vm459_vm4 = vmor %vm457_vm3, %vm458_vm2 }
 0x333   :  { %v454_v36 = vsub.f32 1.0, %v453_v35 }
 0x335   :  { %v455_v37 = vmul.f32 %v1525_v33, %v454_v36 }
 0x337   :  { %v456_v38 = vadd.f32 %v1525_v33, %v455_v37 }
 0x339   :  { %v460_v43 = vsel %vm459_vm4, %v1525_v33, %v456_v38 }
 0x33a   :  { %v465_v54 = vsel %vm462_vm5, %v464_v46, %v460_v43  ;;  %vm643_vm5 = vcmp.gt.s32.totalorder %v1835_v1, 2 }
 0x33b   :  { %v468_v5 = vmul.f32 %v465_v54, %v1906_v39 }
 0x398   :  { %v471_v49 = vpop.permute.xlu0 %470 }
 0x399   :  { %v473_v58 = vmul.f32 %v471_v49, %v465_v54 }
 0x39b   :  { %475 = vrot.lane.b32.xlu2 %v473_v58, %s1654_s1 }
 0x3a3   :  { %501 = vperm.xlu2 %1497, %v499_v61  }
 0x3a4   :  { %v439_v0 = vpop.permute.xlu1 %438 }
 0x3a5   :  { %v1897_v2 = vadd.f32 %v439_v0, %v431_v63 }
 0x3a7   :  { %1526 = vtanh.f32 %v1897_v2 }
 0x3ad   :  { %v1527_v3 = vpop.eup %1526 }
 0x3ae   :  { %444 = vrot.lane.b32.xlu0 %v1527_v3, %s1653_s0 }
 0x3b6   :  { %508 = vperm.xlu0 %1495, %v506_v4  }
 0x3f5   :  { %v476_v6 = vpop.permute.xlu2 %475 }
 0x3f6   :  { %v1909_v7 = vadd.f32 %v476_v6, %v468_v5 }
 0x3f8   :  { %1528 = vtanh.f32 %v1909_v7 }
 0x3fd   :  { %v1913_v9 = vpop.permute.xlu2 %501 }
 0x3fe   :  { %v1529_v8 = vpop.eup %1528  ;;  %vm503_vm8 = vcmp.eq.s32.totalorder %v1913_v9, 1 }
 0x3ff   :  { %481 = vrot.lane.b32.xlu1 %v1529_v8, %s1653_s0 }
 0x420   :  { %v445_v11 = vpop.permute.xlu0 %444 }
 0x421   :  { %v1915_v13 = vmul.f32 %v445_v11, %v428_v27 }
 0x423   :  { %v1922_v45 = vsel %vm503_vm8, %v1915_v13, %v1859_v52 }
 0x424   :  { %v514_v14 = vpack.c.bf16 %v1922_v45, %v1922_v45 }
 0x426   :  { %516 = vrot.lane.b32.xlu1 %v514_v14, %s1654_s1 }
 0x428   :  { %v1927_v15 = vpop.permute.xlu0 %508 }
 0x429   :  { %vm510_vm9 = vcmp.eq.s32.totalorder %v1927_v15, 1  ;;  %v344_v15 = vpack.c.bf16 %v1866_v59, %v1866_v59 }
 0x471   :  { %v482_v17 = vpop.permute.xlu1 %481 }
 0x472   :  { %v1929_v18 = vmul.f32 %v482_v17, %v465_v54 }
 0x474   :  { %v1936_v19 = vsel %vm510_vm9, %v1929_v18, %v1872_v60  ;;  %v136_v60 = vpop.f32.mrf.mxu0 }
 0x475   :  { %v536_v52 = vpack.c.bf16 %v1936_v19, %v1936_v19  ;;  %v137_v22 = vadd.f32 %v136_v60, %v1813_v34 }
 0x477   :  { %538 = vrot.lane.b32.xlu2 %v536_v52, %s1654_s1 }
 0x498   :  { %v517_v20 = vpop.permute.xlu1 %516 }
 0x499   :  { %1450 = vmatmul.msk.bf16.vlgmr.msra.gmra.mxu2 %vm218_vm13, %v517_v20 }
 0x49a   :  { %819 = vmatpush.bf16.msra.mxu2 %v1724_v10 }
 0x49e   :  { %820 = vmatpush.bf16.msra.mxu2 %v1737_v16 }
 0x4d1   :  { %v539_v21 = vpop.permute.xlu2 %538 }
 0x4d2   :  { %1451 = vmatmul.msk.bf16.vlgmr.msra.gmra.mxu3 %vm218_vm13, %v539_v21 }
 0x4d3   :  { %841 = vmatpush.bf16.msra.mxu3 %v1774_v28 }
 0x4d7   :  { %842 = vmatpush.bf16.msra.mxu3 %v1781_v29 }
 0x51c   :  { %v530_v23 = vpop.f32.mrf.mxu2 }
 0x51d   :  { %v534_v24 = vadd.f32 %v530_v23, %v137_v22  ;;  %v645_v23 = vsel %vm643_vm5, 1, %v1652_v12 }
 0x51f   :  { %1530 = vtanh.f32 %v534_v24  ;;  %v1452_v32 = vmul.f32 -1.442695, %v534_v24  ;;  %v1959_v24 = vsel %vm503_vm8, %v1897_v2, %v1894_v62  ;;  %v1972_v62 = vsel %vm510_vm9, %v1909_v7, %v1906_v39 }
 0x524   :  { %v532_v25 = vpop.f32.mrf.mxu2 }
 0x525   :  { %v1531_v26 = vpop.eup %1530 }
 0x526   :  { %579 = vrot.lane.b32.xlu0 %v1531_v26, %s1653_s0 }
 0x555   :  { %v552_v27 = vpop.f32.mrf.mxu3 }
 0x556   :  { %v556_v30 = vadd.f32 %v552_v27, %v1827_v55 }
 0x558   :  { %1532 = vtanh.f32 %v556_v30  ;;  %v1453_v63 = vmul.f32 -1.442695, %v556_v30 }
 0x559   :  { %1534 = vpow2.f32 %v1452_v32 }
 0x55d   :  { %v554_v57 = vpop.f32.mrf.mxu3 }
 0x55e   :  { %v1533_v31 = vpop.eup %1532  ;;  %v652_v57 = vsel %vm644_vm6, 1, %v1652_v12  ;;  %vm789_vm6 = vcmp.gt.s32.totalorder %v1835_v1, 3 }
 0x55f   :  { %616 = vrot.lane.b32.xlu1 %v1533_v31, %s1653_s0  ;;  %v1535_v33 = vpop.eup %1534 }
 0x560   :  { %v560_v35 = vadd.f32 1.0, %v1535_v33 }
 0x562   :  { %1536 = vrcp.f32 %v560_v35  ;;  %v572_v43 = vand.u32 2147483648, %v560_v35  ;;  %vm566_vm14 = vweird.f32 %v560_v35  ;;  %v570_v46 = vand.u32 2147483647, %v560_v35 }
 0x563   :  { %1538 = vpow2.f32 %v1453_v63 }
 0x564   :  { %v573_v49 = vor.u32 1.1754944e-38, %v572_v43  ;;  %vm571_vm0 = vcmp.eq.f32.partialorder %v570_v46, 8.507059e+37 }
 0x568   :  { %v1537_v36 = vpop.eup %1536 }
 0x569   :  { %v562_v37 = vmul.f32 %v1537_v36, %v560_v35  ;;  %vm567_vm10 = vweird.f32 %v1537_v36  ;;  %v1539_v0 = vpop.eup %1538 }
 0x56a   :  { %vm568_vm15 = vmor %vm566_vm14, %vm567_vm10  ;;  %v597_v3 = vadd.f32 1.0, %v1539_v0 }
 0x56b   :  { %v563_v38 = vsub.f32 1.0, %v562_v37 }
 0x56c   :  { %1540 = vrcp.f32 %v597_v3  ;;  %v609_v14 = vand.u32 2147483648, %v597_v3  ;;  %vm603_vm2 = vweird.f32 %v597_v3  ;;  %v607_v17 = vand.u32 2147483647, %v597_v3 }
 0x56d   :  { %v564_v41 = vmul.f32 %v1537_v36, %v563_v38 }
 0x56e   :  { %v610_v20 = vor.u32 1.1754944e-38, %v609_v14  ;;  %vm608_vm4 = vcmp.eq.f32.partialorder %v607_v17, 8.507059e+37 }
 0x56f   :  { %v565_v42 = vadd.f32 %v1537_v36, %v564_v41 }
 0x571   :  { %v569_v55 = vsel %vm568_vm15, %v1537_v36, %v565_v42 }
 0x572   :  { %v574_v58 = vsel %vm571_vm0, %v573_v49, %v569_v55  ;;  %v1541_v4 = vpop.eup %1540 }
 0x573   :  { %v599_v5 = vmul.f32 %v1541_v4, %v597_v3  ;;  %vm604_vm1 = vweird.f32 %v1541_v4  ;;  %v577_v25 = vmul.f32 %v574_v58, %v1959_v24 }
 0x574   :  { %vm605_vm3 = vmor %vm603_vm2, %vm604_vm1 }
 0x575   :  { %v600_v6 = vsub.f32 1.0, %v599_v5 }
 0x577   :  { %v601_v8 = vmul.f32 %v1541_v4, %v600_v6 }
 0x579   :  { %v602_v11 = vadd.f32 %v1541_v4, %v601_v8 }
 0x57b   :  { %v606_v52 = vsel %vm605_vm3, %v1541_v4, %v602_v11 }
 0x57c   :  { %v611_v60 = vsel %vm608_vm4, %v610_v20, %v606_v52 }
 0x57d   :  { %v614_v2 = vmul.f32 %v611_v60, %v1972_v62 }
 0x598   :  { %v580_v54 = vpop.permute.xlu0 %579 }
 0x599   :  { %v582_v61 = vmul.f32 %v580_v54, %v574_v58 }
 0x59b   :  { %584 = vrot.lane.b32.xlu2 %v582_v61, %s1654_s1 }
 0x5d1   :  { %v617_v21 = vpop.permute.xlu1 %616 }
 0x5d2   :  { %v619_v22 = vmul.f32 %v617_v21, %v611_v60 }
 0x5d4   :  { %621 = vrot.lane.b32.xlu0 %v619_v22, %s1654_s1 }
 0x5dc   :  { %647 = vperm.xlu0 %1495, %v645_v23  }
 0x5f5   :  { %v585_v26 = vpop.permute.xlu2 %584 }
 0x5f6   :  { %v1962_v27 = vadd.f32 %v585_v26, %v577_v25 }
 0x5f8   :  { %1542 = vtanh.f32 %v1962_v27 }
 0x5fe   :  { %v1543_v30 = vpop.eup %1542 }
 0x5ff   :  { %590 = vrot.lane.b32.xlu1 %v1543_v30, %s1653_s0 }
 0x607   :  { %654 = vperm.xlu1 %1496, %v652_v57  }
 0x646   :  { %v622_v31 = vpop.permute.xlu0 %621 }
 0x647   :  { %v1975_v32 = vadd.f32 %v622_v31, %v614_v2 }
 0x649   :  { %1544 = vtanh.f32 %v1975_v32 }
 0x64e   :  { %v1979_v35 = vpop.permute.xlu0 %647 }
 0x64f   :  { %v1545_v33 = vpop.eup %1544  ;;  %vm649_vm7 = vcmp.eq.s32.totalorder %v1979_v35, 1 }
 0x650   :  { %627 = vrot.lane.b32.xlu2 %v1545_v33, %s1653_s0 }
 0x671   :  { %v591_v36 = vpop.permute.xlu1 %590 }
 0x672   :  { %v1981_v37 = vmul.f32 %v591_v36, %v574_v58 }
 0x674   :  { %v1988_v39 = vsel %vm649_vm7, %v1981_v37, %v1922_v45 }
 0x675   :  { %v660_v7 = vpack.c.bf16 %v1988_v39, %v1988_v39 }
 0x677   :  { %662 = vrot.lane.b32.xlu2 %v660_v7, %s1654_s1 }
 0x679   :  { %v1993_v38 = vpop.permute.xlu1 %654 }
 0x67a   :  { %vm656_vm10 = vcmp.eq.s32.totalorder %v1993_v38, 1 }
 0x6aa   :  { %v628_v41 = vpop.permute.xlu2 %627 }
 0x6ab   :  { %v1995_v42 = vmul.f32 %v628_v41, %v611_v60 }
 0x6ad   :  { %v2002_v43 = vsel %vm656_vm10, %v1995_v42, %v1936_v19  ;;  %v138_v19 = vpop.f32.mrf.mxu0  ;;  %v637_v9 = vpack.c.bf16 %v1995_v42, %v1995_v42 }
 0x6ae   :  { %v682_v45 = vpack.c.bf16 %v2002_v43, %v2002_v43  ;;  %v139_v49 = vadd.f32 %v138_v19, %v1813_v34 }
 0x6b0   :  { %684 = vrot.lane.b32.xlu0 %v682_v45, %s1654_s1 }
 0x6d1   :  { %v663_v46 = vpop.permute.xlu2 %662 }
 0x6d2   :  { %1454 = vmatmul.msk.bf16.vlgmr.msrb.gmra.mxu2 %vm218_vm13, %v663_v46 }
 0x6d3   :  { %1087 = vmatpush.bf16.msrb.mxu2 %v1724_v10 }
 0x6d7   :  { %1088 = vmatpush.bf16.msrb.mxu2 %v1737_v16 }
 0x722   :  { %v685_v55 = vpop.permute.xlu0 %684 }
 0x723   :  { %1455 = vmatmul.msk.bf16.vlgmr.msrb.gmra.mxu3 %vm218_vm13, %v685_v55 }
 0x724   :  { %1109 = vmatpush.bf16.msrb.mxu3 %v1774_v28 }
 0x728   :  { %1110 = vmatpush.bf16.msrb.mxu3 %v1781_v29 }
 0x755   :  { %v676_v54 = vpop.f32.mrf.mxu2 }
 0x756   :  { %v680_v58 = vadd.f32 %v676_v54, %v139_v49  ;;  %v791_v49 = vsel %vm789_vm6, 1, %v1652_v12  ;;  %v2025_v54 = vsel %vm649_vm7, %v1962_v27, %v1959_v24  ;;  %v2038_v24 = vsel %vm656_vm10, %v1975_v32, %v1972_v62 }
 0x758   :  { %1546 = vtanh.f32 %v680_v58  ;;  %v1456_v10 = vmul.f32 -1.442695, %v680_v58 }
 0x75a   :  { %1548 = vpow2.f32 %v1456_v10 }
 0x75d   :  { %v678_v61 = vpop.f32.mrf.mxu2 }
 0x75e   :  { %v1547_v63 = vpop.eup %1546 }
 0x75f   :  { %725 = vrot.lane.b32.xlu1 %v1547_v63, %s1653_s0 }
 0x760   :  { %v1549_v3 = vpop.eup %1548 }
 0x761   :  { %v706_v29 = vadd.f32 1.0, %v1549_v3 }
 0x763   :  { %v718_v17 = vand.u32 2147483648, %v706_v29  ;;  %vm712_vm15 = vweird.f32 %v706_v29  ;;  %v716_v52 = vand.u32 2147483647, %v706_v29 }
 0x765   :  { %v719_v20 = vor.u32 1.1754944e-38, %v718_v17  ;;  %vm717_vm1 = vcmp.eq.f32.partialorder %v716_v52, 8.507059e+37  ;;  %v141_v17 = vpop.f32.mrf.mxu0 }
 0x766   :  { %v142_v52 = vadd.f32 %v141_v17, %v1813_v34 }
 0x7a6   :  { %v698_v0 = vpop.f32.mrf.mxu3 }
 0x7a7   :  { %v702_v16 = vadd.f32 %v698_v0, %v1825_v53 }
 0x7a9   :  { %1550 = vtanh.f32 %v702_v16  ;;  %v1457_v23 = vmul.f32 -1.442695, %v702_v16 }
 0x7aa   :  { %1552 = vrcp.f32 %v706_v29 }
 0x7ab   :  { %1554 = vpow2.f32 %v1457_v23 }
 0x7ae   :  { %v700_v28 = vpop.f32.mrf.mxu3 }
 0x7af   :  { %v1551_v4 = vpop.eup %1550 }
 0x7b0   :  { %762 = vrot.lane.b32.xlu2 %v1551_v4, %s1653_s0  ;;  %v1553_v5 = vpop.eup %1552 }
 0x7b1   :  { %v708_v6 = vmul.f32 %v1553_v5, %v706_v29  ;;  %vm713_vm14 = vweird.f32 %v1553_v5  ;;  %v1555_v25 = vpop.eup %1554 }
 0x7b2   :  { %vm714_vm0 = vmor %vm712_vm15, %vm713_vm14  ;;  %v743_v26 = vadd.f32 1.0, %v1555_v25  ;;  %vm790_vm14 = vcmp.gt.s32.totalorder %v1835_v1, 4 }
 0x7b3   :  { %v709_v8 = vsub.f32 1.0, %v708_v6  ;;  %v798_v0 = vsel %vm790_vm14, 1, %v1652_v12 }
 0x7b4   :  { %1556 = vrcp.f32 %v743_v26  ;;  %v755_v36 = vand.u32 2147483648, %v743_v26  ;;  %vm749_vm3 = vweird.f32 %v743_v26  ;;  %v753_v7 = vand.u32 2147483647, %v743_v26 }
 0x7b5   :  { %v710_v11 = vmul.f32 %v1553_v5, %v709_v8 }
 0x7b6   :  { %v756_v45 = vor.u32 1.1754944e-38, %v755_v36  ;;  %vm754_vm5 = vcmp.eq.f32.partialorder %v753_v7, 8.507059e+37 }
 0x7b7   :  { %v711_v14 = vadd.f32 %v1553_v5, %v710_v11 }
 0x7b9   :  { %v715_v53 = vsel %vm714_vm0, %v1553_v5, %v711_v14 }
 0x7ba   :  { %v720_v60 = vsel %vm717_vm1, %v719_v20, %v715_v53  ;;  %v1557_v30 = vpop.eup %1556 }
 0x7bb   :  { %v745_v57 = vmul.f32 %v1557_v30, %v743_v26  ;;  %vm750_vm2 = vweird.f32 %v1557_v30  ;;  %v723_v58 = vmul.f32 %v720_v60, %v2025_v54 }
 0x7bc   :  { %vm751_vm4 = vmor %vm749_vm3, %vm750_vm2 }
 0x7bd   :  { %v746_v2 = vsub.f32 1.0, %v745_v57 }
 0x7bf   :  { %v747_v31 = vmul.f32 %v1557_v30, %v746_v2 }
 0x7c1   :  { %v748_v33 = vadd.f32 %v1557_v30, %v747_v31 }
 0x7c3   :  { %v752_v41 = vsel %vm751_vm4, %v1557_v30, %v748_v33 }
 0x7c4   :  { %v757_v55 = vsel %vm754_vm5, %v756_v45, %v752_v41 }
 0x7c5   :  { %v760_v27 = vmul.f32 %v757_v55, %v2038_v24 }
 0x7d1   :  { %v726_v21 = vpop.permute.xlu1 %725 }
 0x7d2   :  { %v728_v22 = vmul.f32 %v726_v21, %v720_v60 }
 0x7d4   :  { %730 = vrot.lane.b32.xlu0 %v728_v22, %s1654_s1 }
 0x80a   :  { %v763_v46 = vpop.permute.xlu2 %762 }
 0x80b   :  { %v765_v19 = vmul.f32 %v763_v46, %v757_v55 }
 0x80d   :  { %767 = vrot.lane.b32.xlu1 %v765_v19, %s1654_s1 }
 0x815   :  { %793 = vperm.xlu1 %1496, %v791_v49  }
 0x846   :  { %v731_v61 = vpop.permute.xlu0 %730 }
 0x847   :  { %v2028_v63 = vadd.f32 %v731_v61, %v723_v58 }
 0x849   :  { %1558 = vtanh.f32 %v2028_v63 }
 0x84f   :  { %v1559_v10 = vpop.eup %1558 }
 0x850   :  { %736 = vrot.lane.b32.xlu2 %v1559_v10, %s1653_s0 }
 0x858   :  { %800 = vperm.xlu2 %1497, %v798_v0  }
 0x87f   :  { %v768_v16 = vpop.permute.xlu1 %767 }
 0x880   :  { %v2041_v3 = vadd.f32 %v768_v16, %v760_v27 }
 0x882   :  { %1560 = vtanh.f32 %v2041_v3 }
 0x887   :  { %v2045_v1 = vpop.permute.xlu1 %793 }
 0x888   :  { %v1561_v28 = vpop.eup %1560  ;;  %vm795_vm15 = vcmp.eq.s32.totalorder %v2045_v1, 1 }
 0x889   :  { %773 = vrot.lane.b32.xlu0 %v1561_v28, %s1653_s0 }
 0x8aa   :  { %v737_v12 = vpop.permute.xlu2 %736 }
 0x8ab   :  { %v2047_v4 = vmul.f32 %v737_v12, %v720_v60 }
 0x8ad   :  { %v2054_v62 = vsel %vm795_vm15, %v2047_v4, %v1988_v39 }
 0x8ae   :  { %v806_v32 = vpack.c.bf16 %v2054_v62, %v2054_v62 }
 0x8b0   :  { %808 = vrot.lane.b32.xlu0 %v806_v32, %s1654_s1 }
 0x8b2   :  { %v2059_v29 = vpop.permute.xlu2 %800 }
 0x8b3   :  { %vm802_vm0 = vcmp.eq.s32.totalorder %v2059_v29, 1 }
 0x8fb   :  { %v774_v5 = vpop.permute.xlu0 %773 }
 0x8fc   :  { %v2061_v6 = vmul.f32 %v774_v5, %v757_v55 }
 0x8fe   :  { %v2068_v8 = vsel %vm802_vm0, %v2061_v6, %v2002_v43  ;;  %v783_v59 = vpack.c.bf16 %v2061_v6, %v2061_v6 }
 0x8ff   :  { %v828_v39 = vpack.c.bf16 %v2068_v8, %v2068_v8 }
 0x901   :  { %830 = vrot.lane.b32.xlu1 %v828_v39, %s1654_s1 }
 0x922   :  { %v809_v11 = vpop.permute.xlu0 %808 }
 0x923   :  { %1458 = vmatmul.msk.bf16.vlgmr.msra.gmra.mxu2 %vm218_vm13, %v809_v11 }
 0x973   :  { %v831_v14 = vpop.permute.xlu1 %830 }
 0x974   :  { %1459 = vmatmul.msk.bf16.vlgmr.msra.gmra.mxu3 %vm218_vm13, %v831_v14 }
 0x9a6   :  { %v822_v53 = vpop.f32.mrf.mxu2 }
 0x9a7   :  { %v826_v20 = vadd.f32 %v822_v53, %v142_v52  ;;  %v2085_v53 = vsel %vm795_vm15, %v2028_v63, %v2025_v54 }
 0x9a9   :  { %1562 = vtanh.f32 %v826_v20  ;;  %v1460_v60 = vmul.f32 -1.442695, %v826_v20 }
 0x9ab   :  { %1564 = vpow2.f32 %v1460_v60 }
 0x9ae   :  { %v824_v21 = vpop.f32.mrf.mxu2 }
 0x9af   :  { %v1563_v43 = vpop.eup %1562 }
 0x9b0   :  { %871 = vrot.lane.b32.xlu2 %v1563_v43, %s1653_s0 }
 0x9b1   :  { %v1565_v22 = vpop.eup %1564 }
 0x9b2   :  { %v852_v23 = vadd.f32 1.0, %v1565_v22  ;;  %v2096_v22 = vsel %vm802_vm0, %v2041_v3, %v2038_v24 }
 0x9b4   :  { %1566 = vrcp.f32 %v852_v23  ;;  %v864_v41 = vand.u32 2147483648, %v852_v23  ;;  %vm858_vm2 = vweird.f32 %v852_v23  ;;  %v862_v45 = vand.u32 2147483647, %v852_v23 }
 0x9b6   :  { %v865_v55 = vor.u32 1.1754944e-38, %v864_v41  ;;  %vm863_vm4 = vcmp.eq.f32.partialorder %v862_v45, 8.507059e+37 }
 0x9ba   :  { %v1567_v25 = vpop.eup %1566 }
 0x9bb   :  { %v854_v30 = vmul.f32 %v1567_v25, %v852_v23  ;;  %vm859_vm1 = vweird.f32 %v1567_v25 }
 0x9bc   :  { %vm860_vm3 = vmor %vm858_vm2, %vm859_vm1 }
 0x9bd   :  { %v855_v2 = vsub.f32 1.0, %v854_v30 }
 0x9bf   :  { %v856_v33 = vmul.f32 %v1567_v25, %v855_v2 }
 0x9c1   :  { %v857_v7 = vadd.f32 %v1567_v25, %v856_v33 }
 0x9c3   :  { %v861_v46 = vsel %vm860_vm3, %v1567_v25, %v857_v7 }
 0x9c4   :  { %v866_v49 = vsel %vm863_vm4, %v865_v55, %v861_v46 }
 0x9c5   :  { %v869_v20 = vmul.f32 %v866_v49, %v2085_v53 }
 0x9f7   :  { %v844_v26 = vpop.f32.mrf.mxu3 }
 0x9f8   :  { %v848_v57 = vadd.f32 %v844_v26, %v1823_v50 }
 0x9fa   :  { %1568 = vtanh.f32 %v848_v57  ;;  %v1461_v50 = vmul.f32 -1.442695, %v848_v57 }
 0x9fc   :  { %1570 = vpow2.f32 %v1461_v50 }
 0x9ff   :  { %v846_v31 = vpop.f32.mrf.mxu3 }
 0xa00   :  { %v1569_v36 = vpop.eup %1568 }
 0xa01   :  { %908 = vrot.lane.b32.xlu0 %v1569_v36, %s1653_s0  ;;  %v143_v36 = vpop.f32.mrf.mxu0 }
 0xa02   :  { %v1571_v61 = vpop.eup %1570  ;;  %v144_v46 = vadd.f32 %v143_v36, %v1813_v34 }
 0xa03   :  { %v889_v10 = vadd.f32 1.0, %v1571_v61 }
 0xa05   :  { %1572 = vrcp.f32 %v889_v10  ;;  %v901_v32 = vand.u32 2147483648, %v889_v10  ;;  %vm895_vm6 = vweird.f32 %v889_v10  ;;  %v899_v5 = vand.u32 2147483647, %v889_v10 }
 0xa07   :  { %v902_v11 = vor.u32 1.1754944e-38, %v901_v32  ;;  %vm900_vm1 = vcmp.eq.f32.partialorder %v899_v5, 8.507059e+37 }
 0xa09   :  { %v2127_v41 = vpop.f32.mrf.mxu0 }
 0xa0a   :  { %v872_v19 = vpop.permute.xlu2 %871 }
 0xa0b   :  { %v874_v58 = vmul.f32 %v872_v19, %v866_v49  ;;  %v1573_v0 = vpop.eup %1572 }
 0xa0c   :  { %v891_v27 = vmul.f32 %v1573_v0, %v889_v10  ;;  %vm896_vm5 = vweird.f32 %v1573_v0 }
 0xa0d   :  { %876 = vrot.lane.b32.xlu1 %v874_v58, %s1654_s1  ;;  %vm897_vm14 = vmor %vm895_vm6, %vm896_vm5 }
 0xa0e   :  { %v892_v16 = vsub.f32 1.0, %v891_v27 }
 0xa10   :  { %v893_v28 = vmul.f32 %v1573_v0, %v892_v16 }
 0xa11   :  { %v2129_v45 = vpop.f32.mrf.mxu0 }
 0xa12   :  { %v894_v12 = vadd.f32 %v1573_v0, %v893_v28 }
 0xa14   :  { %v898_v39 = vsel %vm897_vm14, %v1573_v0, %v894_v12 }
 0xa15   :  { %v903_v17 = vsel %vm900_vm1, %v902_v11, %v898_v39 }
 0xa16   :  { %v906_v23 = vmul.f32 %v903_v17, %v2096_v22 }
 0xa73   :  { %v909_v14 = vpop.permute.xlu0 %908 }
 0xa74   :  { %v911_v52 = vmul.f32 %v909_v14, %v903_v17 }
 0xa76   :  { %913 = vrot.lane.b32.xlu2 %v911_v52, %s1654_s1 }
 0xa7f   :  { %v877_v21 = vpop.permute.xlu1 %876 }
 0xa80   :  { %v2088_v43 = vadd.f32 %v877_v21, %v869_v20 }
 0xa82   :  { %1574 = vtanh.f32 %v2088_v43 }
 0xa88   :  { %v1575_v60 = vpop.eup %1574 }
 0xa89   :  { %882 = vrot.lane.b32.xlu0 %v1575_v60, %s1653_s0 }
 0xad0   :  { %v914_v54 = vpop.permute.xlu2 %913 }
 0xad1   :  { %v2099_v63 = vadd.f32 %v914_v54, %v906_v23 }
 0xad3   :  { %1576 = vtanh.f32 %v2099_v63 }
 0xad9   :  { %v1577_v25 = vpop.eup %1576 }
 0xada   :  { %919 = vrot.lane.b32.xlu1 %v1577_v25, %s1653_s0 }
 0xafb   :  { %v883_v26 = vpop.permute.xlu0 %882 }
 0xafc   :  { %v2103_v30 = vmul.f32 %v883_v26, %v866_v49 }
 0xafe   :  { %v2109_v57 = vsel %vm802_vm0, %v2103_v30, %v2054_v62 }
 0xaff   :  { %v940_v24 = vpack.c.bf16 %v2109_v57, %v2109_v57 }
 0xb01   :  { %942 = vrot.lane.b32.xlu2 %v940_v24, %s1654_s1 }
 0xb4c   :  { %v920_v3 = vpop.permute.xlu1 %919 }
 0xb4d   :  { %v2114_v2 = vmul.f32 %v920_v3, %v903_v17 }
 0xb4f   :  { %v2120_v31 = vsel %vm795_vm15, %v2114_v2, %v2068_v8 }
 0xb50   :  { %v962_v33 = vpack.c.bf16 %v2120_v31, %v2120_v31 }
 0xb52   :  { %964 = vrot.lane.b32.xlu0 %v962_v33, %s1654_s1 }
 0xb5b   :  { %v943_v62 = vpop.permute.xlu2 %942 }
 0xb5c   :  { %1462 = vmatmul.msk.bf16.vlgmr.msrb.gmra.mxu0 %vm218_vm13, %v943_v62 }
 0xbc4   :  { %v965_v7 = vpop.permute.xlu0 %964 }
 0xbc5   :  { %1463 = vmatmul.msk.bf16.vlgmr.msrb.gmra.mxu1 %vm218_vm13, %v965_v7 }
 0xbd9   :  { %v956_v8 = vpop.f32.mrf.mxu0 }
 0xbda   :  { %v960_v55 = vadd.f32 %v956_v8, %v144_v46 }
 0xbdc   :  { %1578 = vtanh.f32 %v960_v55  ;;  %v1464_v58 = vmul.f32 -1.442695, %v960_v55 }
 0xbde   :  { %1580 = vpow2.f32 %v1464_v58 }
 0xbe1   :  { %v958_v19 = vpop.f32.mrf.mxu0 }
 0xbe2   :  { %v1579_v49 = vpop.eup %1578 }
 0xbe3   :  { %1005 = vrot.lane.b32.xlu1 %v1579_v49, %s1653_s0  ;;  %v2141_v49 = vsel %vm802_vm0, %v2088_v43, %v2085_v53 }
 0xbe4   :  { %v1581_v50 = vpop.eup %1580 }
 0xbe5   :  { %v986_v61 = vadd.f32 1.0, %v1581_v50 }
 0xbe7   :  { %1582 = vrcp.f32 %v986_v61  ;;  %v998_v11 = vand.u32 2147483648, %v986_v61  ;;  %vm992_vm3 = vweird.f32 %v986_v61  ;;  %v996_v14 = vand.u32 2147483647, %v986_v61 }
 0xbe9   :  { %v999_v52 = vor.u32 1.1754944e-38, %v998_v11  ;;  %vm997_vm5 = vcmp.eq.f32.partialorder %v996_v14, 8.507059e+37  ;;  %v147_v11 = vadd.f32 %v2127_v41, %v1813_v34 }
 0xbed   :  { %v1583_v10 = vpop.eup %1582 }
 0xbee   :  { %v988_v27 = vmul.f32 %v1583_v10, %v986_v61  ;;  %vm993_vm2 = vweird.f32 %v1583_v10 }
 0xbef   :  { %vm994_vm4 = vmor %vm992_vm3, %vm993_vm2 }
 0xbf0   :  { %v989_v28 = vsub.f32 1.0, %v988_v27 }
 0xbf2   :  { %v990_v32 = vmul.f32 %v1583_v10, %v989_v28 }
 0xbf4   :  { %v991_v39 = vadd.f32 %v1583_v10, %v990_v32 }
 0xbf6   :  { %v995_v17 = vsel %vm994_vm4, %v1583_v10, %v991_v39 }
 0xbf7   :  { %v1000_v21 = vsel %vm997_vm5, %v999_v52, %v995_v17 }
 0xbf8   :  { %v1003_v58 = vmul.f32 %v1000_v21, %v2141_v49 }
 0xc42   :  { %v978_v0 = vpop.f32.mrf.mxu1 }
 0xc43   :  { %v982_v16 = vadd.f32 %v978_v0, %v1821_v47  ;;  %v2152_v0 = vsel %vm795_vm15, %v2099_v63, %v2096_v22 }
 0xc45   :  { %1584 = vtanh.f32 %v982_v16  ;;  %v1465_v47 = vmul.f32 -1.442695, %v982_v16 }
 0xc47   :  { %1586 = vpow2.f32 %v1465_v47 }
 0xc4a   :  { %v980_v12 = vpop.f32.mrf.mxu1 }
 0xc4b   :  { %v1585_v5 = vpop.eup %1584 }
 0xc4c   :  { %1042 = vrot.lane.b32.xlu2 %v1585_v5, %s1653_s0 }
 0xc4d   :  { %v1587_v23 = vpop.eup %1586 }
 0xc4e   :  { %v1023_v54 = vadd.f32 1.0, %v1587_v23 }
 0xc50   :  { %1588 = vrcp.f32 %v1023_v54  ;;  %v1035_v62 = vand.u32 2147483648, %v1023_v54  ;;  %vm1029_vm14 = vweird.f32 %v1023_v54  ;;  %v1033_v36 = vand.u32 2147483647, %v1023_v54 }
 0xc52   :  { %v1036_v46 = vor.u32 1.1754944e-38, %v1035_v62  ;;  %vm1034_vm2 = vcmp.eq.f32.partialorder %v1033_v36, 8.507059e+37 }
 0xc55   :  { %v1006_v20 = vpop.permute.xlu1 %1005 }
 0xc56   :  { %v1008_v60 = vmul.f32 %v1006_v20, %v1000_v21  ;;  %v1589_v25 = vpop.eup %1588 }
 0xc57   :  { %v1025_v26 = vmul.f32 %v1589_v25, %v1023_v54  ;;  %vm1030_vm6 = vweird.f32 %v1589_v25 }
 0xc58   :  { %1010 = vrot.lane.b32.xlu0 %v1008_v60, %s1654_s1  ;;  %vm1031_vm1 = vmor %vm1029_vm14, %vm1030_vm6 }
 0xc59   :  { %v1026_v24 = vsub.f32 1.0, %v1025_v26 }
 0xc5b   :  { %v1027_v3 = vmul.f32 %v1589_v25, %v1026_v24 }
 0xc5d   :  { %v1028_v33 = vadd.f32 %v1589_v25, %v1027_v3 }
 0xc5f   :  { %v1032_v7 = vsel %vm1031_vm1, %v1589_v25, %v1028_v33 }
 0xc60   :  { %v1037_v55 = vsel %vm1034_vm2, %v1036_v46, %v1032_v7 }
 0xc61   :  { %v1040_v29 = vmul.f32 %v1037_v55, %v2152_v0 }
 0xca6   :  { %v1043_v8 = vpop.permute.xlu2 %1042 }
 0xca7   :  { %v1045_v19 = vmul.f32 %v1043_v8, %v1037_v55 }
 0xca9   :  { %1047 = vrot.lane.b32.xlu1 %v1045_v19, %s1654_s1 }
 0xcca   :  { %v1011_v50 = vpop.permute.xlu0 %1010 }
 0xccb   :  { %v2144_v61 = vadd.f32 %v1011_v50, %v1003_v58 }
 0xccd   :  { %1590 = vtanh.f32 %v2144_v61 }
 0xcd3   :  { %v1591_v10 = vpop.eup %1590 }
 0xcd4   :  { %1016 = vrot.lane.b32.xlu2 %v1591_v10, %s1653_s0 }
 0xd1b   :  { %v1048_v53 = vpop.permute.xlu1 %1047 }
 0xd1c   :  { %v2155_v43 = vadd.f32 %v1048_v53, %v1040_v29 }
 0xd1e   :  { %1592 = vtanh.f32 %v2155_v43 }
 0xd24   :  { %v1593_v27 = vpop.eup %1592 }
 0xd25   :  { %1053 = vrot.lane.b32.xlu0 %v1593_v27, %s1653_s0 }
 0xd2e   :  { %v1017_v16 = vpop.permute.xlu2 %1016 }
 0xd2f   :  { %v2159_v28 = vmul.f32 %v1017_v16, %v1000_v21 }
 0xd31   :  { %v2165_v1 = vsel %vm656_vm10, %v2159_v28, %v2109_v57 }
 0xd32   :  { %v1074_v22 = vpack.c.bf16 %v2165_v1, %v2165_v1 }
 0xd34   :  { %1076 = vrot.lane.b32.xlu1 %v1074_v22, %s1654_s1 }
 0xd97   :  { %v1054_v63 = vpop.permute.xlu0 %1053 }
 0xd98   :  { %v2170_v12 = vmul.f32 %v1054_v63, %v1037_v55 }
 0xd9a   :  { %v2176_v32 = vsel %vm649_vm7, %v2170_v12, %v2120_v31 }
 0xd9b   :  { %v1096_v5 = vpack.c.bf16 %v2176_v32, %v2176_v32 }
 0xd9d   :  { %1098 = vrot.lane.b32.xlu2 %v1096_v5, %s1654_s1 }
 0xda6   :  { %v1077_v57 = vpop.permute.xlu1 %1076 }
 0xda7   :  { %1466 = vmatmul.msk.bf16.vlgmr.msrb.gmra.mxu2 %vm218_vm13, %v1077_v57 }
 0xdf7   :  { %v1099_v39 = vpop.permute.xlu2 %1098 }
 0xdf8   :  { %1467 = vmatmul.msk.bf16.vlgmr.msrb.gmra.mxu3 %vm218_vm13, %v1099_v39 }
 0xe2a   :  { %v1090_v14 = vpop.f32.mrf.mxu2 }
 0xe2b   :  { %v1094_v17 = vadd.f32 %v1090_v14, %v147_v11 }
 0xe2d   :  { %1594 = vtanh.f32 %v1094_v17  ;;  %v1468_v20 = vmul.f32 -1.442695, %v1094_v17  ;;  %v2194_v17 = vsel %vm656_vm10, %v2144_v61, %v2141_v49 }
 0xe2f   :  { %1596 = vpow2.f32 %v1468_v20 }
 0xe32   :  { %v1092_v52 = vpop.f32.mrf.mxu2 }
 0xe33   :  { %v1595_v31 = vpop.eup %1594 }
 0xe34   :  { %1139 = vrot.lane.b32.xlu0 %v1595_v31, %s1653_s0 }
 0xe35   :  { %v1597_v47 = vpop.eup %1596 }
 0xe36   :  { %v1120_v25 = vadd.f32 1.0, %v1597_v47 }
 0xe38   :  { %v1132_v62 = vand.u32 2147483648, %v1120_v25  ;;  %vm1126_vm0 = vweird.f32 %v1120_v25  ;;  %v1130_v36 = vand.u32 2147483647, %v1120_v25 }
 0xe3a   :  { %v1133_v7 = vor.u32 1.1754944e-38, %v1132_v62  ;;  %vm1131_vm4 = vcmp.eq.f32.partialorder %v1130_v36, 8.507059e+37 }
 0xe7b   :  { %v1112_v21 = vpop.f32.mrf.mxu3 }
 0xe7c   :  { %v1116_v60 = vadd.f32 %v1112_v21, %v1818_v44 }
 0xe7e   :  { %1598 = vtanh.f32 %v1116_v60  ;;  %v1469_v19 = vmul.f32 -1.442695, %v1116_v60  ;;  %v2205_v60 = vsel %vm649_vm7, %v2155_v43, %v2152_v0 }
 0xe7f   :  { %1600 = vrcp.f32 %v1120_v25 }
 0xe80   :  { %1602 = vpow2.f32 %v1469_v19 }
 0xe83   :  { %v1114_v23 = vpop.f32.mrf.mxu3 }
 0xe84   :  { %v1599_v54 = vpop.eup %1598 }
 0xe85   :  { %1176 = vrot.lane.b32.xlu1 %v1599_v54, %s1653_s0  ;;  %v1601_v41 = vpop.eup %1600 }
 0xe86   :  { %v1122_v26 = vmul.f32 %v1601_v41, %v1120_v25  ;;  %vm1127_vm15 = vweird.f32 %v1601_v41  ;;  %v1603_v58 = vpop.eup %1602 }
 0xe87   :  { %vm1128_vm3 = vmor %vm1126_vm0, %vm1127_vm15  ;;  %v1157_v50 = vadd.f32 1.0, %v1603_v58 }
 0xe88   :  { %v1123_v24 = vsub.f32 1.0, %v1122_v26 }
 0xe89   :  { %1604 = vrcp.f32 %v1157_v50  ;;  %v1169_v22 = vand.u32 2147483648, %v1157_v50  ;;  %vm1163_vm6 = vweird.f32 %v1157_v50  ;;  %v1167_v63 = vand.u32 2147483647, %v1157_v50 }
 0xe8a   :  { %v1124_v3 = vmul.f32 %v1601_v41, %v1123_v24 }
 0xe8b   :  { %v1170_v57 = vor.u32 1.1754944e-38, %v1169_v22  ;;  %vm1168_vm1 = vcmp.eq.f32.partialorder %v1167_v63, 8.507059e+37 }
 0xe8c   :  { %v1125_v33 = vadd.f32 %v1601_v41, %v1124_v3  ;;  %v149_v3 = vadd.f32 %v2129_v45, %v1813_v34 }
 0xe8e   :  { %v1129_v44 = vsel %vm1128_vm3, %v1601_v41, %v1125_v33 }
 0xe8f   :  { %v1134_v8 = vsel %vm1131_vm4, %v1133_v7, %v1129_v44  ;;  %v1605_v10 = vpop.eup %1604 }
 0xe90   :  { %v1159_v29 = vmul.f32 %v1605_v10, %v1157_v50  ;;  %vm1164_vm5 = vweird.f32 %v1605_v10  ;;  %v1137_v52 = vmul.f32 %v1134_v8, %v2194_v17 }
 0xe91   :  { %vm1165_vm14 = vmor %vm1163_vm6, %vm1164_vm5  ;;  %vm349_vm6 = vcmask 519424  }
 0xe92   :  { %v1160_v53 = vsub.f32 1.0, %v1159_v29 }
 0xe94   :  { %v1161_v27 = vmul.f32 %v1605_v10, %v1160_v53 }
 0xe96   :  { %v1162_v16 = vadd.f32 %v1605_v10, %v1161_v27 }
 0xe98   :  { %v1166_v5 = vsel %vm1165_vm14, %v1605_v10, %v1162_v16 }
 0xe99   :  { %v1171_v11 = vsel %vm1168_vm1, %v1170_v57, %v1166_v5 }
 0xe9a   :  { %v1174_v38 = vmul.f32 %v1171_v11, %v2205_v60 }
 0xea6   :  { %v1140_v46 = vpop.permute.xlu0 %1139 }
 0xea7   :  { %v1142_v55 = vmul.f32 %v1140_v46, %v1134_v8 }
 0xea9   :  { %1144 = vrot.lane.b32.xlu2 %v1142_v55, %s1654_s1 }
 0xef7   :  { %v1177_v39 = vpop.permute.xlu1 %1176 }
 0xef8   :  { %v1179_v14 = vmul.f32 %v1177_v39, %v1171_v11 }
 0xefa   :  { %1181 = vrot.lane.b32.xlu0 %v1179_v14, %s1654_s1 }
 0xf03   :  { %v1145_v31 = vpop.permute.xlu2 %1144 }
 0xf04   :  { %v2197_v20 = vadd.f32 %v1145_v31, %v1137_v52 }
 0xf06   :  { %1606 = vtanh.f32 %v2197_v20 }
 0xf0c   :  { %v1607_v21 = vpop.eup %1606 }
 0xf0d   :  { %1150 = vrot.lane.b32.xlu1 %v1607_v21, %s1653_s0 }
 0xf6c   :  { %v1182_v49 = vpop.permute.xlu0 %1181 }
 0xf6d   :  { %v2208_v61 = vadd.f32 %v1182_v49, %v1174_v38 }
 0xf6f   :  { %1608 = vtanh.f32 %v2208_v61 }
 0xf75   :  { %v1609_v47 = vpop.eup %1608 }
 0xf76   :  { %1187 = vrot.lane.b32.xlu2 %v1609_v47, %s1653_s0 }
 0xf7f   :  { %v1151_v23 = vpop.permute.xlu1 %1150 }
 0xf80   :  { %v2212_v54 = vmul.f32 %v1151_v23, %v1134_v8 }
 0xf82   :  { %v2218_v35 = vsel %vm510_vm9, %v2212_v54, %v2165_v1 }
 0xf83   :  { %v1208_v0 = vpack.c.bf16 %v2218_v35, %v2218_v35 }
 0xf85   :  { %1210 = vrot.lane.b32.xlu0 %v1208_v0, %s1654_s1 }
 0xfd0   :  { %v1188_v43 = vpop.permute.xlu2 %1187 }
 0xfd1   :  { %v2223_v25 = vmul.f32 %v1188_v43, %v1171_v11 }
 0xfd3   :  { %v2229_v41 = vsel %vm503_vm8, %v2223_v25, %v2176_v32 }
 0xfd4   :  { %v1230_v26 = vpack.c.bf16 %v2229_v41, %v2229_v41 }
 0xfd6   :  { %1232 = vrot.lane.b32.xlu1 %v1230_v26, %s1654_s1 }
 0xff7   :  { %v1211_v1 = vpop.permute.xlu0 %1210 }
 0xff8   :  { %1470 = vmatmul.msk.bf16.vlgmr.msra.gmra.mxu0 %vm218_vm13, %v1211_v1 }
0x1048   :  { %v1233_v24 = vpop.permute.xlu1 %1232 }
0x1049   :  { %1471 = vmatmul.msk.bf16.vlgmr.msra.gmra.mxu1 %vm218_vm13, %v1233_v24  ;;  %v337_v24 = vpack.c.bf16 %v1853_v51, %v1853_v51  ;;  %v777_v51 = vpack.c.bf16 %v2047_v4, %v2047_v4  ;;  %v1191_v4 = vpack.c.bf16 %v2212_v54, %v2212_v54 }
0x1075   :  { %v1224_v33 = vpop.f32.mrf.mxu0 }
0x1076   :  { %v1228_v62 = vadd.f32 %v1224_v33, %v149_v3  ;;  %v1204_v3 = vsel %vm510_vm9, %v2197_v20, %v2194_v17  ;;  %v929_v17 = vpack.c.bf16 %v2114_v2, %v2114_v2  ;;  %v1057_v2 = vpack.c.bf16 %v2159_v28, %v2159_v28 }
0x1077   :  { %v1206_v20 = vsel %vm503_vm8, %v2208_v61, %v2205_v60  ;;  %vm342_vm9 = vcmask 257024   ;;  %v923_v61 = vpack.c.bf16 %v2103_v30, %v2103_v30 }
0x1078   :  { %1610 = vtanh.f32 %v1228_v62  ;;  %v1472_v44 = vmul.f32 -1.442695, %v1228_v62 }
0x107a   :  { %1612 = vpow2.f32 %v1472_v44 }
0x107d   :  { %v1226_v36 = vpop.f32.mrf.mxu0 }
0x107e   :  { %v1611_v32 = vpop.eup %1610 }
0x107f   :  { %1273 = vrot.lane.b32.xlu2 %v1611_v32, %s1653_s0  ;;  %v491_v32 = vpack.c.bf16 %v1929_v18, %v1929_v18  ;;  %v631_v18 = vpack.c.bf16 %v1981_v37, %v1981_v37  ;;  %v1197_v37 = vpack.c.bf16 %v2223_v25, %v2223_v25  ;;  %v485_v25 = vpack.c.bf16 %v1915_v13, %v1915_v13 }
0x1080   :  { %v1613_v7 = vpop.eup %1612  ;;  %v1063_v13 = vpack.c.bf16 %v2170_v12, %v2170_v12 }
0x1081   :  { %v1254_v46 = vadd.f32 1.0, %v1613_v7 }
0x1083   :  { %1614 = vrcp.f32 %v1254_v46  ;;  %v1266_v53 = vand.u32 2147483648, %v1254_v46  ;;  %vm1260_vm10 = vweird.f32 %v1254_v46  ;;  %v1264_v27 = vand.u32 2147483647, %v1254_v46 }
0x1085   :  { %v1267_v22 = vor.u32 1.1754944e-38, %v1266_v53  ;;  %vm1265_vm15 = vcmp.eq.f32.partialorder %v1264_v27, 8.507059e+37 }
0x1089   :  { %v1615_v8 = vpop.eup %1614 }
0x108a   :  { %v1256_v19 = vmul.f32 %v1615_v8, %v1254_v46  ;;  %vm1261_vm7 = vweird.f32 %v1615_v8 }
0x108b   :  { %vm1262_vm2 = vmor %vm1260_vm10, %vm1261_vm7 }
0x108c   :  { %v1257_v50 = vsub.f32 1.0, %v1256_v19 }
0x108e   :  { %v1258_v45 = vmul.f32 %v1615_v8, %v1257_v50 }
0x1090   :  { %v1259_v29 = vadd.f32 %v1615_v8, %v1258_v45 }
0x1092   :  { %v1263_v16 = vsel %vm1262_vm2, %v1615_v8, %v1259_v29 }
0x1093   :  { %v2241_v5 = vsel %vm1265_vm15, %v1267_v22, %v1263_v16 }
0x1094   :  { %v1271_v33 = vmul.f32 %v2241_v5, %v1204_v3 }
0x10c6   :  { %v1246_v55 = vpop.f32.mrf.mxu1 }
0x10c7   :  { %v1250_v58 = vadd.f32 %v1246_v55, %v1816_v40 }
0x10c9   :  { %1616 = vtanh.f32 %v1250_v58  ;;  %v1473_v57 = vmul.f32 -1.442695, %v1250_v58 }
0x10cb   :  { %1618 = vpow2.f32 %v1473_v57 }
0x10ce   :  { %v1248_v34 = vpop.f32.mrf.mxu1 }
0x10cf   :  { %v1617_v10 = vpop.eup %1616 }
0x10d0   :  { %1310 = vrot.lane.b32.xlu0 %v1617_v10, %s1653_s0 }
0x10d1   :  { %v1619_v39 = vpop.eup %1618 }
0x10d2   :  { %v1291_v11 = vadd.f32 1.0, %v1619_v39 }
0x10d4   :  { %1620 = vrcp.f32 %v1291_v11  ;;  %v1303_v49 = vand.u32 2147483648, %v1291_v11  ;;  %vm1297_vm3 = vweird.f32 %v1291_v11  ;;  %v1301_v47 = vand.u32 2147483647, %v1291_v11 }
0x10d6   :  { %v1304_v0 = vor.u32 1.1754944e-38, %v1303_v49  ;;  %vm1302_vm5 = vcmp.eq.f32.partialorder %v1301_v47, 8.507059e+37 }
0x10d9   :  { %v1274_v63 = vpop.permute.xlu2 %1273 }
0x10da   :  { %v1276_v40 = vmul.f32 %v1274_v63, %v2241_v5  ;;  %v1621_v14 = vpop.eup %1620 }
0x10db   :  { %v1293_v52 = vmul.f32 %v1621_v14, %v1291_v11  ;;  %vm1298_vm0 = vweird.f32 %v1621_v14 }
0x10dc   :  { %1278 = vrot.lane.b32.xlu1 %v1276_v40, %s1654_s1  ;;  %vm1299_vm4 = vmor %vm1297_vm3, %vm1298_vm0 }
0x10dd   :  { %v1294_v31 = vsub.f32 1.0, %v1293_v52 }
0x10df   :  { %v1295_v21 = vmul.f32 %v1621_v14, %v1294_v31 }
0x10e1   :  { %v1296_v38 = vadd.f32 %v1621_v14, %v1295_v21 }
0x10e3   :  { %v1300_v23 = vsel %vm1299_vm4, %v1621_v14, %v1296_v38 }
0x10e4   :  { %v2245_v26 = vsel %vm1302_vm5, %v1304_v0, %v1300_v23 }
0x10e5   :  { %v1308_v54 = vmul.f32 %v2245_v26, %v1206_v20 }
0x1142   :  { %v1311_v43 = vpop.permute.xlu0 %1310 }
0x1143   :  { %v1313_v1 = vmul.f32 %v1311_v43, %v2245_v26 }
0x1145   :  { %1315 = vrot.lane.b32.xlu2 %v1313_v1, %s1654_s1 }
0x114d   :  { %339 = vrot.lane.b32.xlu2 %v337_v24, %s1654_s1 }
0x114e   :  { %v1279_v62 = vpop.permute.xlu1 %1278 }
0x114f   :  { %v1281_v36 = vadd.f32 %v1279_v62, %v1271_v33 }
0x1151   :  { %1622 = vtanh.f32 %v1281_v36 }
0x1155   :  { %493 = vrot.lane.b32.xlu2 %v491_v32, %s1653_s0 }
0x1157   :  { %v1623_v44 = vpop.eup %1622 }
0x1158   :  { %1284 = vrot.lane.b32.xlu0 %v1623_v44, %s1653_s0 }
0x115d   :  { %779 = vrot.lane.b32.xlu2 %v777_v51, %s1654_s1 }
0x1160   :  { %346 = vrot.lane.b32.xlu0 %v344_v15, %s1653_s0 }
0x1165   :  { %931 = vrot.lane.b32.xlu2 %v929_v17, %s1653_s0 }
0x1168   :  { %633 = vrot.lane.b32.xlu0 %v631_v18, %s1654_s1 }
0x116d   :  { %1193 = vrot.lane.b32.xlu2 %v1191_v4, %s1654_s1 }
0x1170   :  { %785 = vrot.lane.b32.xlu0 %v783_v59, %s1653_s0 }
0x1178   :  { %1059 = vrot.lane.b32.xlu0 %v1057_v2, %s1654_s1 }
0x1180   :  { %1199 = vrot.lane.b32.xlu0 %v1197_v37, %s1653_s0 }
0x119f   :  { %v1316_v6 = vpop.permute.xlu2 %1315 }
0x11a0   :  { %v1318_v7 = vadd.f32 %v1316_v6, %v1308_v54 }
0x11a2   :  { %1624 = vtanh.f32 %v1318_v7 }
0x11a7   :  { %v340_v46 = vpop.permute.xlu2 %339 }
0x11a8   :  { %v1625_v28 = vpop.eup %1624  ;;  %343 = vst.msk [vmem:[#allocation3] sm:$0xf] %vm342_vm9, %v340_v46 }
0x11a9   :  { %1321 = vrot.lane.b32.xlu1 %v1625_v28, %s1653_s0 }
0x11af   :  { %v494_v8 = vpop.permute.xlu2 %493 }
0x11b0   :  { %496 = vst.msk [vmem:[#allocation3 + $0x18] sm:$0xf] %vm349_vm6, %v494_v8 }
0x11b1   :  { %487 = vrot.lane.b32.xlu1 %v485_v25, %s1654_s1 }
0x11b7   :  { %v780_v60 = vpop.permute.xlu2 %779 }
0x11b8   :  { %782 = vst.msk [vmem:[#allocation3 + $0xc] sm:$0xf] %vm342_vm9, %v780_v60 }
0x11b9   :  { %639 = vrot.lane.b32.xlu1 %v637_v9, %s1653_s0 }
0x11bf   :  { %v932_v55 = vpop.permute.xlu2 %931 }
0x11c0   :  { %934 = vst.msk [vmem:[#allocation3 + $0xc] sm:$0xf] %vm349_vm6, %v932_v55 }
0x11c1   :  { %925 = vrot.lane.b32.xlu1 %v923_v61, %s1654_s1 }
0x11c7   :  { %v1194_v19 = vpop.permute.xlu2 %1193 }
0x11c8   :  { %1196 = vst.msk [vmem:[#allocation3 + $0x18] sm:$0xf] %vm342_vm9, %v1194_v19 }
0x11c9   :  { %1065 = vrot.lane.b32.xlu1 %v1063_v13, %s1653_s0 }
0x11ca   :  { %v1285_v42 = vpop.permute.xlu0 %1284 }
0x11cb   :  { %v1287_v58 = vmul.f32 %v1285_v42, %v2241_v5 }
0x11cd   :  { %v1325_v50 = vpack.c.bf16 %v1287_v58, %v1287_v58  ;;  %v1337_v30 = vsel %vm364_vm12, %v1287_v58, %v2218_v35 }
0x11ce   :  { %1340 = vrot.lane.b32.xlu0 %v1337_v30, %s1654_s1 }
0x11d1   :  { %1327 = vrot.lane.b32.xlu1 %v1325_v50, %s1654_s1 }
0x11d2   :  { %v347_v34 = vpop.permute.xlu0 %346 }
0x11d3   :  { %350 = vst.msk [vmem:[#allocation3 + $0x1c] sm:$0xf] %vm349_vm6, %v347_v34 }
0x11da   :  { %v634_v12 = vpop.permute.xlu0 %633 }
0x11db   :  { %636 = vst.msk [vmem:[#allocation3 + $0x8] sm:$0xf] %vm342_vm9, %v634_v12 }
0x11e2   :  { %v786_v45 = vpop.permute.xlu0 %785 }
0x11e3   :  { %788 = vst.msk [vmem:[#allocation3 + $0x10] sm:$0xf] %vm349_vm6, %v786_v45 }
0x11ea   :  { %v1060_v10 = vpop.permute.xlu0 %1059 }
0x11f2   :  { %v1200_v16 = vpop.permute.xlu0 %1199 }
0x121b   :  { %v1322_v29 = vpop.permute.xlu1 %1321 }
0x121c   :  { %v1324_v53 = vmul.f32 %v1322_v29, %v2245_v26 }
0x121e   :  { %v1331_v27 = vpack.c.bf16 %v1324_v53, %v1324_v53  ;;  %v1338_v56 = vsel %vm357_vm11, %v1324_v53, %v2229_v41  ;;  %vm1348_vm11 = vcmask 523520  }
0x121f   :  { %1345 = vrot.lane.b32.xlu1 %v1338_v56, %s1653_s0 }
0x1220   :  { %1333 = vrot.lane.b32.xlu2 %v1331_v27, %s1653_s0 }
0x1223   :  { %v488_v35 = vpop.permute.xlu1 %487 }
0x1224   :  { %490 = vst.msk [vmem:[#allocation3 + $0x4] sm:$0xf] %vm342_vm9, %v488_v35 }
0x1225   :  { %1202 = vst.msk [vmem:[#allocation3 + $0x4] sm:$0xf] %vm349_vm6, %v1200_v16 }
0x122b   :  { %v640_v22 = vpop.permute.xlu1 %639 }
0x122c   :  { %642 = vst.msk [vmem:[#allocation3 + $0x14] sm:$0xf] %vm349_vm6, %v640_v22 }
0x122d   :  { %1062 = vst.msk [vmem:[#allocation3 + $0x14] sm:$0xf] %vm342_vm9, %v1060_v10 }
0x1233   :  { %v926_v63 = vpop.permute.xlu1 %925 }
0x1234   :  { %928 = vst.msk [vmem:[#allocation3 + $0x10] sm:$0xf] %vm342_vm9, %v926_v63 }
0x123b   :  { %v1066_v48 = vpop.permute.xlu1 %1065 }
0x123c   :  { %1068 = vst.msk [vmem:[#allocation3 + $0x8] sm:$0xf] %vm349_vm6, %v1066_v48 }
0x1240   :  { %v1341_v41 = vpop.permute.xlu0 %1340 }
0x1241   :  { %1343 = vst.msk [vmem:[%s2350_s7] sm:$0xff] %vm218_vm13, %v1341_v41 }
0x1243   :  { %v1328_v5 = vpop.permute.xlu1 %1327 }
0x1244   :  { %1330 = vst.msk [vmem:[#allocation3 + $0x1c] sm:$0xf] %vm342_vm9, %v1328_v5 }
0x127a   :  { %v1334_v40 = vpop.permute.xlu2 %1333 }
0x127b   :  { %1336 = vst.msk [vmem:[#allocation3] sm:$0xf] %vm349_vm6, %v1334_v40 }
0x127c   :  { %1362 = dma.vmem_to_hbm [thread:$0]  %s1355_s3, 512, %s1357_s8, [#allocation4], %s1653_s0, %s1653_s0, %s1656_s9  }
0x1291   :  { %v1346_v57 = vpop.permute.xlu1 %1345 }
0x1292   :  { %1349 = vst.msk [vmem:[%s2350_s7] sm:$0xff] %vm1348_vm11, %v1346_v57 }
0x1293   :  { %1650 = dma.done.wait [#allocation4], 512  }
0x1294   :  { %1651 = vsyncadd [#allocation4], 4294966784 }
0x1295   :  { %1371 = vsyncpa [#allocation4], 1 }

// kernel: bilstm_forward.2
= control target key start
LH: loop header
LB: loop body
LE: loop exit
PB: predicated region body
PF: predicated region fallthrough
CT: control target
= control target key end

     0   :  { %v1604_v13 = vmov 0   ;;  %s2313_s0 = inlined_call_operand.vmem [shape: bf16[64,32], index: 0, kind: input, shape index: {}]   ;;  %s2314_s1 = inlined_call_operand.vmem [shape: s32[8,1], index: 1, kind: input, shape index: {}]   ;;  %s2315_s2 = inlined_call_operand.vmem [shape: bf16[32,256], index: 2, kind: input, shape index: {}]   ;;  %s2316_s3 = inlined_call_operand.vmem [shape: bf16[32,128], index: 3, kind: input, shape index: {}]   ;;  %s2317_s4 = inlined_call_operand.vmem [shape: bf16[32,128], index: 4, kind: input, shape index: {}]   ;;  %s2318_s5 = inlined_call_operand.vmem [shape: f32[1,256], index: 5, kind: input, shape index: {}]   ;;  %s2319_s6 = inlined_call_operand.vmem [shape: bf16[64,64], index: 6, kind: output, shape index: {0}]   ;;  %s2320_s7 = inlined_call_operand.hbm [shape: f32[8,64], index: 7, kind: output, shape index: {1}]  }
   0x1   :  { %v1437_v0 = vld [vmem:[%s2315_s2 + $0x14] sm:$0xf]  ;;  %v1373_v1 = vld [vmem:[%s2315_s2 + $0x18] sm:$0xf0]  ;;  %v1657_v2 = vld [vmem:[%s2316_s3 + $0x8] sm:$0xff]  ;;  %1447 = vset.pattern.permute.xlu0 %v1604_v13  ;;  %1448 = vset.pattern.permute.xlu1 %v1604_v13 }
   0x2   :  { %v1376_v3 = vor.u32 %v1437_v0, %v1373_v1  ;;  %v1371_v4 = vld [vmem:[%s2315_s2 + $0x10] sm:$0xf]  ;;  %v1438_v5 = vld [vmem:[%s2315_s2 + $0x14] sm:$0xf0]  ;;  %v1435_v6 = vld [vmem:[%s2315_s2 + $0x4] sm:$0xf]  ;;  %203 = vmatpush.bf16.msra.mxu2 %v1657_v2 }
   0x3   :  { %v1372_v7 = vor.u32 %v1438_v5, %v1371_v4  ;;  %v1365_v8 = vld [vmem:[%s2315_s2 + $0x8] sm:$0xf0]  ;;  %v1675_v9 = vld [vmem:[%s2316_s3] sm:$0xff]  ;;  %v1436_v12 = vld [vmem:[%s2315_s2 + $0x4] sm:$0xf0] }
   0x4   :  { %133 = vmatpush.bf16.msra.mxu1 %v1376_v3  ;;  %v1368_v10 = vor.u32 %v1435_v6, %v1365_v8  ;;  %v1363_v11 = vld [vmem:[%s2315_s2] sm:$0xf] }
   0x5   :  { %104 = vmatpush.bf16.msra.mxu0 %v1372_v7  ;;  %v1364_v14 = vor.u32 %v1436_v12, %v1363_v11 }
   0x6   :  { %13 = vsyncpa [#allocation4], 0  ;;  %1449 = vset.pattern.permute.xlu2 %v1604_v13  ;;  %204 = vmatpush.bf16.msra.mxu2 %v1675_v9  ;;  %v1431_v15 = vld [vmem:[%s2313_s0] sm:$0xff]  ;;  %vm85_vm0 = vcmask 261120   ;;  %v1697_v16 = vld [vmem:[%s2317_s4 + $0x8] sm:$0xff]  ;;  %s1334_s13 = sshll.u32 %s2320_s7, 4  ;;  %s1335_s13 = int_to_ptr.hbm [resolvable:$true] %s1334_s13 }
   0x7   :  { %230 = vmatpush.bf16.msra.mxu3 %v1697_v16  ;;  %v1705_v17 = vld [vmem:[%s2317_s4] sm:$0xff]  ;;  %v1432_v18 = vld [vmem:[%s2313_s0 + $0x8] sm:$0xff]  ;;  %v1433_v19 = vld [vmem:[%s2313_s0 + $0x10] sm:$0xff] }
   0x8   :  { %134 = vmatpush.bf16.msra.mxu1 %v1368_v10  ;;  %v1434_v20 = vld [vmem:[%s2313_s0 + $0x18] sm:$0xff]  ;;  %v39_v21 = vld [vmem:[%s2318_s5] sm:$0x3]  ;;  %s1605_s0 = smov 64  }
   0x9   :  { %105 = vmatpush.bf16.msra.mxu0 %v1364_v14  ;;  %205 = vmatmul.bf16.vlgmr.msra.gmra.mxu2 %v1604_v13  ;;  %v42_v22 = vperm.slane %v39_v21, 1  ;;  %v1740_v23 = vperm.slane %v39_v21, 0  ;;  %v1762_v53 = vld [vmem:[%s2314_s1] sm:$0xff]  ;;  %s1606_s1 = smov 32  }
   0xa   :  { %356 = vmatpush.bf16.msrb.mxu2 %v1657_v2  ;;  %vm326_vm1 = vcmp.gt.s32.totalorder %v1762_v53, 0  ;;  %vm327_vm10 = vcmp.gt.s32.totalorder %v1762_v53, 7 }
   0xb   :  { %1381 = vmatmul.msk.bf16.vlgmr.msra.gmra.mxu1 %vm85_vm0, %v1431_v15  ;;  %231 = vmatpush.bf16.msra.mxu3 %v1705_v17  ;;  %v328_v54 = vsel %vm326_vm1, 1, %v1604_v13 }
   0xc   :  { %1377 = vmatmul.msk.bf16.vlgmr.msra.gmra.mxu0 %vm85_vm0, %v1431_v15  ;;  %816 = vmatpush.bf16.msrb.mxu1 %v1697_v16 }
   0xd   :  { %794 = vmatpush.bf16.msrb.mxu0 %v1657_v2 }
   0xe   :  { %357 = vmatpush.bf16.msrb.mxu2 %v1675_v9  ;;  %232 = vmatmul.bf16.vlgmr.msra.gmra.mxu3 %v1604_v13 }
   0xf   :  { %378 = vmatpush.bf16.msrb.mxu3 %v1697_v16 }
  0x10   :  { %817 = vmatpush.bf16.msrb.mxu1 %v1705_v17 }
  0x11   :  { %795 = vmatpush.bf16.msrb.mxu0 %v1675_v9 }
  0x12   :  { %502 = vmatpush.bf16.msra.mxu2 %v1657_v2 }
  0x13   :  { %379 = vmatpush.bf16.msrb.mxu3 %v1705_v17 }
  0x14   :  { %1084 = vmatpush.bf16.msra.mxu1 %v1697_v16 }
  0x15   :  { %1062 = vmatpush.bf16.msra.mxu0 %v1657_v2 }
  0x16   :  { %503 = vmatpush.bf16.msra.mxu2 %v1675_v9 }
  0x17   :  { %524 = vmatpush.bf16.msra.mxu3 %v1697_v16 }
  0x18   :  { %1085 = vmatpush.bf16.msra.mxu1 %v1705_v17 }
  0x19   :  { %1063 = vmatpush.bf16.msra.mxu0 %v1675_v9 }
  0x1b   :  { %1382 = vmatmul.msk.bf16.gmra.mxu1 %vm85_vm0, %v1432_v18  ;;  %525 = vmatpush.bf16.msra.mxu3 %v1705_v17 }
  0x1c   :  { %1378 = vmatmul.msk.bf16.gmra.mxu0 %vm85_vm0, %v1432_v18 }
  0x2b   :  { %1383 = vmatmul.msk.bf16.gmra.mxu1 %vm85_vm0, %v1433_v19 }
  0x2c   :  { %1379 = vmatmul.msk.bf16.gmra.mxu0 %vm85_vm0, %v1433_v19 }
  0x3b   :  { %1384 = vmatmul.msk.bf16.gmra.mxu1 %vm85_vm0, %v1434_v20 }
  0x3c   :  { %1380 = vmatmul.msk.bf16.gmra.mxu0 %vm85_vm0, %v1434_v20 }
  0x88   :  { %v136_v24 = vpop.f32.mrf.mxu1 }
  0x89   :  { %v1742_v25 = vadd.f32 %v136_v24, %v42_v22  ;;  %v107_v26 = vpop.f32.mrf.mxu0  ;;  %v335_v24 = vsel %vm327_vm10, 1, %v1604_v13 }
  0x8a   :  { %v108_v27 = vadd.f32 %v107_v26, %v1740_v23 }
  0x8c   :  { %v206_v28 = vpop.f32.mrf.mxu2 }
  0x8d   :  { %v210_v29 = vadd.f32 %v206_v28, %v108_v27 }
  0x8f   :  { %1450 = vtanh.f32 %v210_v29  ;;  %v1401_v50 = vmul.f32 -1.442695, %v210_v29 }
  0x90   :  { %v138_v30 = vpop.f32.mrf.mxu1 }
  0x91   :  { %v1745_v31 = vadd.f32 %v138_v30, %v42_v22  ;;  %v233_v36 = vpop.f32.mrf.mxu3 }
  0x94   :  { %v208_v32 = vpop.f32.mrf.mxu2 }
  0x95   :  { %v1451_v33 = vpop.eup %1450 }
  0x96   :  { %260 = vrot.lane.b32.xlu0 %v1451_v33, %s1605_s0 }
  0x98   :  { %v141_v34 = vpop.f32.mrf.mxu1 }
  0x99   :  { %v1748_v35 = vadd.f32 %v141_v34, %v42_v22  ;;  %v235_v39 = vpop.f32.mrf.mxu3 }
  0xa0   :  { %v143_v37 = vpop.f32.mrf.mxu1 }
  0xa1   :  { %v1750_v38 = vadd.f32 %v143_v37, %v42_v22 }
  0xa8   :  { %v146_v40 = vpop.f32.mrf.mxu1 }
  0xa9   :  { %v1752_v41 = vadd.f32 %v146_v40, %v42_v22 }
  0xb0   :  { %v148_v42 = vpop.f32.mrf.mxu1 }
  0xb1   :  { %v1754_v43 = vadd.f32 %v148_v42, %v42_v22 }
  0xb8   :  { %v151_v44 = vpop.f32.mrf.mxu1 }
  0xb9   :  { %v1756_v45 = vadd.f32 %v151_v44, %v42_v22 }
  0xc0   :  { %v153_v46 = vpop.f32.mrf.mxu1 }
  0xc1   :  { %v154_v47 = vadd.f32 %v153_v46, %v42_v22 }
  0xc3   :  { %v237_v48 = vadd.f32 %v233_v36, %v154_v47 }
  0xc5   :  { %1452 = vtanh.f32 %v237_v48  ;;  %v1402_v4 = vmul.f32 -1.442695, %v237_v48 }
  0xc6   :  { %1454 = vpow2.f32 %v1401_v50 }
  0xcb   :  { %v1453_v49 = vpop.eup %1452 }
  0xcc   :  { %297 = vrot.lane.b32.xlu0 %v1453_v49, %s1605_s0  ;;  %v1455_v51 = vpop.eup %1454 }
  0xcd   :  { %v241_v52 = vadd.f32 1.0, %v1455_v51 }
  0xcf   :  { %1456 = vrcp.f32 %v241_v52  ;;  %vm247_vm2 = vweird.f32 %v241_v52  ;;  %v253_v59 = vand.u32 2147483648, %v241_v52  ;;  %v251_v61 = vand.u32 2147483647, %v241_v52 }
  0xd0   :  { %1458 = vpow2.f32 %v1402_v4 }
  0xd1   :  { %v254_v62 = vor.u32 1.1754944e-38, %v253_v59  ;;  %vm252_vm5 = vcmp.eq.f32.partialorder %v251_v61, 8.507059e+37 }
  0xd4   :  { %330 = vperm.xlu0 %1447, %v328_v54  }
  0xd5   :  { %v1457_v55 = vpop.eup %1456 }
  0xd6   :  { %v243_v56 = vmul.f32 %v1457_v55, %v241_v52  ;;  %vm248_vm3 = vweird.f32 %v1457_v55  ;;  %v1459_v5 = vpop.eup %1458  ;;  %v109_v52 = vpop.f32.mrf.mxu0 }
  0xd7   :  { %vm249_vm4 = vmor %vm247_vm2, %vm248_vm3  ;;  %v278_v6 = vadd.f32 1.0, %v1459_v5  ;;  %v110_v54 = vadd.f32 %v109_v52, %v1740_v23 }
  0xd8   :  { %v244_v57 = vsub.f32 1.0, %v243_v56 }
  0xd9   :  { %1460 = vrcp.f32 %v278_v6  ;;  %v290_v14 = vand.u32 2147483648, %v278_v6  ;;  %vm284_vm7 = vweird.f32 %v278_v6  ;;  %v288_v15 = vand.u32 2147483647, %v278_v6 }
  0xda   :  { %v245_v58 = vmul.f32 %v1457_v55, %v244_v57 }
  0xdb   :  { %v291_v19 = vor.u32 1.1754944e-38, %v290_v14  ;;  %vm289_vm9 = vcmp.eq.f32.partialorder %v288_v15, 8.507059e+37 }
  0xdc   :  { %v246_v60 = vadd.f32 %v1457_v55, %v245_v58 }
  0xde   :  { %v250_v63 = vsel %vm249_vm4, %v1457_v55, %v246_v60 }
  0xdf   :  { %v255_v1 = vsel %vm252_vm5, %v254_v62, %v250_v63  ;;  %v1461_v7 = vpop.eup %1460 }
  0xe0   :  { %v280_v8 = vmul.f32 %v1461_v7, %v278_v6  ;;  %vm285_vm6 = vweird.f32 %v1461_v7  ;;  %v258_v26 = vmul.f32 0.0, %v255_v1 }
  0xe1   :  { %vm286_vm8 = vmor %vm284_vm7, %vm285_vm6  ;;  %vm472_vm6 = vcmp.gt.s32.totalorder %v1762_v53, 1  ;;  %vm473_vm7 = vcmp.gt.s32.totalorder %v1762_v53, 6 }
  0xe2   :  { %v281_v10 = vsub.f32 1.0, %v280_v8 }
  0xe4   :  { %v282_v11 = vmul.f32 %v1461_v7, %v281_v10 }
  0xe6   :  { %v283_v12 = vadd.f32 %v1461_v7, %v282_v11 }
  0xe8   :  { %v287_v18 = vsel %vm286_vm8, %v1461_v7, %v283_v12 }
  0xe9   :  { %v292_v20 = vsel %vm289_vm9, %v291_v19, %v287_v18 }
  0xea   :  { %v295_v30 = vmul.f32 0.0, %v292_v20 }
 0x108   :  { %v261_v0 = vpop.permute.xlu0 %260 }
 0x109   :  { %v263_v3 = vmul.f32 %v261_v0, %v255_v1 }
 0x10b   :  { %265 = vrot.lane.b32.xlu1 %v263_v3, %s1606_s1 }
 0x13e   :  { %v298_v21 = vpop.permute.xlu0 %297 }
 0x13f   :  { %v300_v22 = vmul.f32 %v298_v21, %v292_v20 }
 0x141   :  { %302 = vrot.lane.b32.xlu1 %v300_v22, %s1606_s1 }
 0x146   :  { %v1778_v36 = vpop.permute.xlu0 %330 }
 0x147   :  { %vm332_vm11 = vcmp.eq.s32.totalorder %v1778_v36, 1 }
 0x149   :  { %337 = vperm.xlu1 %1448, %v335_v24  }
 0x17d   :  { %v266_v27 = vpop.permute.xlu1 %265 }
 0x17e   :  { %v1770_v28 = vadd.f32 %v266_v27, %v258_v26 }
 0x180   :  { %1462 = vtanh.f32 %v1770_v28 }
 0x186   :  { %v1463_v29 = vpop.eup %1462 }
 0x187   :  { %271 = vrot.lane.b32.xlu2 %v1463_v29, %s1605_s0 }
 0x1b3   :  { %v303_v32 = vpop.permute.xlu1 %302 }
 0x1b4   :  { %v1774_v33 = vadd.f32 %v303_v32, %v295_v30 }
 0x1b6   :  { %1464 = vtanh.f32 %v1774_v33 }
 0x1bb   :  { %v1791_v44 = vpop.permute.xlu1 %337 }
 0x1bc   :  { %v1465_v34 = vpop.eup %1464  ;;  %vm339_vm12 = vcmp.eq.s32.totalorder %v1791_v44, 1 }
 0x1bd   :  { %308 = vrot.lane.b32.xlu2 %v1465_v34, %s1605_s0 }
 0x1e1   :  { %v272_v37 = vpop.permute.xlu2 %271 }
 0x1e2   :  { %v1780_v39 = vmul.f32 %v272_v37, %v255_v1 }
 0x1e4   :  { %v1786_v40 = vsel %vm332_vm11, %v1780_v39, 0.0 }
 0x1e5   :  { %v343_v42 = vpack.c.bf16 %v1786_v40, %v1786_v40 }
 0x1e7   :  { %345 = vrot.lane.b32.xlu2 %v343_v42, %s1606_s1 }
 0x217   :  { %v309_v46 = vpop.permute.xlu2 %308 }
 0x218   :  { %v1793_v47 = vmul.f32 %v309_v46, %v292_v20 }
 0x21a   :  { %v1799_v48 = vsel %vm339_vm12, %v1793_v47, 0.0 }
 0x21b   :  { %v365_v49 = vpack.c.bf16 %v1799_v48, %v1799_v48 }
 0x21d   :  { %367 = vrot.lane.b32.xlu1 %v365_v49, %s1606_s1  ;;  %v474_v49 = vsel %vm472_vm6, 1, %v1604_v13  ;;  %vm619_vm6 = vcmp.gt.s32.totalorder %v1762_v53, 5 }
 0x241   :  { %v346_v50 = vpop.permute.xlu2 %345 }
 0x242   :  { %1403 = vmatmul.msk.bf16.vlgmr.msrb.gmra.mxu2 %vm85_vm0, %v346_v50  ;;  %v1821_v50 = vsel %vm332_vm11, %v1770_v28, 0.0  ;;  %v1833_v28 = vsel %vm339_vm12, %v1774_v33, 0.0 }
 0x243   :  { %648 = vmatpush.bf16.msrb.mxu2 %v1657_v2 }
 0x247   :  { %649 = vmatpush.bf16.msrb.mxu2 %v1675_v9 }
 0x28f   :  { %v368_v51 = vpop.permute.xlu1 %367 }
 0x290   :  { %1404 = vmatmul.msk.bf16.vlgmr.msrb.gmra.mxu3 %vm85_vm0, %v368_v51 }
 0x291   :  { %670 = vmatpush.bf16.msrb.mxu3 %v1697_v16 }
 0x295   :  { %671 = vmatpush.bf16.msrb.mxu3 %v1705_v17 }
 0x2c5   :  { %v359_v55 = vpop.f32.mrf.mxu2 }
 0x2c6   :  { %v363_v56 = vadd.f32 %v359_v55, %v110_v54 }
 0x2c8   :  { %1466 = vtanh.f32 %v363_v56  ;;  %v1405_v59 = vmul.f32 -1.442695, %v363_v56  ;;  %v481_v56 = vsel %vm473_vm7, 1, %v1604_v13 }
 0x2ca   :  { %1468 = vpow2.f32 %v1405_v59 }
 0x2cd   :  { %v361_v57 = vpop.f32.mrf.mxu2 }
 0x2ce   :  { %v1467_v58 = vpop.eup %1466 }
 0x2cf   :  { %408 = vrot.lane.b32.xlu2 %v1467_v58, %s1605_s0 }
 0x2d0   :  { %v1469_v60 = vpop.eup %1468 }
 0x2d1   :  { %v389_v61 = vadd.f32 1.0, %v1469_v60 }
 0x2d3   :  { %1470 = vrcp.f32 %v389_v61  ;;  %v401_v8 = vand.u32 2147483648, %v389_v61  ;;  %vm395_vm14 = vweird.f32 %v389_v61  ;;  %v399_v10 = vand.u32 2147483647, %v389_v61 }
 0x2d5   :  { %v402_v12 = vor.u32 1.1754944e-38, %v401_v8  ;;  %vm400_vm1 = vcmp.eq.f32.partialorder %v399_v10, 8.507059e+37 }
 0x2d9   :  { %v1471_v63 = vpop.eup %1470 }
 0x2da   :  { %v391_v1 = vmul.f32 %v1471_v63, %v389_v61  ;;  %vm396_vm13 = vweird.f32 %v1471_v63 }
 0x2db   :  { %vm397_vm15 = vmor %vm395_vm14, %vm396_vm13 }
 0x2dc   :  { %v392_v4 = vsub.f32 1.0, %v391_v1 }
 0x2de   :  { %v393_v6 = vmul.f32 %v1471_v63, %v392_v4 }
 0x2e0   :  { %v394_v7 = vadd.f32 %v1471_v63, %v393_v6 }
 0x2e2   :  { %v398_v11 = vsel %vm397_vm15, %v1471_v63, %v394_v7 }
 0x2e3   :  { %v403_v15 = vsel %vm400_vm1, %v402_v12, %v398_v11 }
 0x2e4   :  { %v406_v51 = vmul.f32 %v403_v15, %v1821_v50 }
 0x313   :  { %v381_v62 = vpop.f32.mrf.mxu3 }
 0x314   :  { %v385_v0 = vadd.f32 %v381_v62, %v1756_v45 }
 0x316   :  { %1472 = vtanh.f32 %v385_v0  ;;  %v1406_v18 = vmul.f32 -1.442695, %v385_v0 }
 0x318   :  { %1474 = vpow2.f32 %v1406_v18 }
 0x31b   :  { %v383_v3 = vpop.f32.mrf.mxu3 }
 0x31c   :  { %v1473_v5 = vpop.eup %1472 }
 0x31d   :  { %445 = vrot.lane.b32.xlu0 %v1473_v5, %s1605_s0 }
 0x31e   :  { %v1475_v19 = vpop.eup %1474 }
 0x31f   :  { %v426_v20 = vadd.f32 1.0, %v1475_v19 }
 0x321   :  { %1476 = vrcp.f32 %v426_v20  ;;  %v438_v29 = vand.u32 2147483648, %v426_v20  ;;  %vm432_vm3 = vweird.f32 %v426_v20  ;;  %v436_v30 = vand.u32 2147483647, %v426_v20 }
 0x323   :  { %v439_v34 = vor.u32 1.1754944e-38, %v438_v29  ;;  %vm437_vm5 = vcmp.eq.f32.partialorder %v436_v30, 8.507059e+37 }
 0x327   :  { %v1477_v21 = vpop.eup %1476 }
 0x328   :  { %v428_v22 = vmul.f32 %v1477_v21, %v426_v20  ;;  %vm433_vm2 = vweird.f32 %v1477_v21 }
 0x329   :  { %v409_v14 = vpop.permute.xlu2 %408  ;;  %vm434_vm4 = vmor %vm432_vm3, %vm433_vm2 }
 0x32a   :  { %v411_v45 = vmul.f32 %v409_v14, %v403_v15  ;;  %v429_v24 = vsub.f32 1.0, %v428_v22 }
 0x32c   :  { %413 = vrot.lane.b32.xlu1 %v411_v45, %s1606_s1  ;;  %v430_v26 = vmul.f32 %v1477_v21, %v429_v24 }
 0x32e   :  { %v431_v27 = vadd.f32 %v1477_v21, %v430_v26 }
 0x330   :  { %v435_v32 = vsel %vm434_vm4, %v1477_v21, %v431_v27 }
 0x331   :  { %v440_v42 = vsel %vm437_vm5, %v439_v34, %v435_v32  ;;  %vm618_vm5 = vcmp.gt.s32.totalorder %v1762_v53, 2 }
 0x332   :  { %v443_v57 = vmul.f32 %v440_v42, %v1833_v28 }
 0x38f   :  { %v446_v37 = vpop.permute.xlu0 %445 }
 0x390   :  { %v448_v46 = vmul.f32 %v446_v37, %v440_v42 }
 0x392   :  { %450 = vrot.lane.b32.xlu2 %v448_v46, %s1606_s1 }
 0x39a   :  { %476 = vperm.xlu2 %1449, %v474_v49  }
 0x39e   :  { %v414_v52 = vpop.permute.xlu1 %413 }
 0x39f   :  { %v1824_v54 = vadd.f32 %v414_v52, %v406_v51 }
 0x3a1   :  { %1478 = vtanh.f32 %v1824_v54 }
 0x3a7   :  { %v1479_v55 = vpop.eup %1478 }
 0x3a8   :  { %419 = vrot.lane.b32.xlu0 %v1479_v55, %s1605_s0 }
 0x3b0   :  { %483 = vperm.xlu0 %1447, %v481_v56  }
 0x3ec   :  { %v451_v58 = vpop.permute.xlu2 %450 }
 0x3ed   :  { %v1836_v59 = vadd.f32 %v451_v58, %v443_v57 }
 0x3ef   :  { %1480 = vtanh.f32 %v1836_v59 }
 0x3f4   :  { %v1840_v61 = vpop.permute.xlu2 %476 }
 0x3f5   :  { %v1481_v60 = vpop.eup %1480  ;;  %vm478_vm8 = vcmp.eq.s32.totalorder %v1840_v61, 1 }
 0x3f6   :  { %456 = vrot.lane.b32.xlu1 %v1481_v60, %s1605_s0 }
 0x41a   :  { %v420_v62 = vpop.permute.xlu0 %419 }
 0x41b   :  { %v1842_v63 = vmul.f32 %v420_v62, %v403_v15 }
 0x41d   :  { %v1849_v33 = vsel %vm478_vm8, %v1842_v63, %v1786_v40  ;;  %v460_v61 = vpack.c.bf16 %v1842_v63, %v1842_v63 }
 0x41e   :  { %v489_v0 = vpack.c.bf16 %v1849_v33, %v1849_v33 }
 0x420   :  { %491 = vrot.lane.b32.xlu1 %v489_v0, %s1606_s1 }
 0x422   :  { %v1854_v1 = vpop.permute.xlu0 %483 }
 0x423   :  { %vm485_vm9 = vcmp.eq.s32.totalorder %v1854_v1, 1  ;;  %v319_v1 = vpack.c.bf16 %v1793_v47, %v1793_v47 }
 0x468   :  { %v457_v3 = vpop.permute.xlu1 %456 }
 0x469   :  { %v1856_v4 = vmul.f32 %v457_v3, %v440_v42 }
 0x46b   :  { %v1863_v5 = vsel %vm485_vm9, %v1856_v4, %v1799_v48  ;;  %v112_v48 = vpop.f32.mrf.mxu0 }
 0x46c   :  { %v511_v40 = vpack.c.bf16 %v1863_v5, %v1863_v5  ;;  %v113_v8 = vadd.f32 %v112_v48, %v1740_v23 }
 0x46e   :  { %513 = vrot.lane.b32.xlu2 %v511_v40, %s1606_s1 }
 0x492   :  { %v492_v6 = vpop.permute.xlu1 %491 }
 0x493   :  { %1407 = vmatmul.msk.bf16.vlgmr.msra.gmra.mxu2 %vm85_vm0, %v492_v6 }
 0x494   :  { %928 = vmatpush.bf16.msra.mxu2 %v1657_v2 }
 0x498   :  { %929 = vmatpush.bf16.msra.mxu2 %v1675_v9 }
 0x4c8   :  { %v514_v7 = vpop.permute.xlu2 %513 }
 0x4c9   :  { %1408 = vmatmul.msk.bf16.vlgmr.msra.gmra.mxu3 %vm85_vm0, %v514_v7 }
 0x4ca   :  { %950 = vmatpush.bf16.msra.mxu3 %v1697_v16 }
 0x4ce   :  { %951 = vmatpush.bf16.msra.mxu3 %v1705_v17 }
 0x516   :  { %v505_v10 = vpop.f32.mrf.mxu2 }
 0x517   :  { %v509_v11 = vadd.f32 %v505_v10, %v113_v8  ;;  %v620_v10 = vsel %vm618_vm5, 1, %v1604_v13 }
 0x519   :  { %1482 = vtanh.f32 %v509_v11  ;;  %v1409_v20 = vmul.f32 -1.442695, %v509_v11  ;;  %v1886_v11 = vsel %vm478_vm8, %v1824_v54, %v1821_v50  ;;  %v1899_v50 = vsel %vm485_vm9, %v1836_v59, %v1833_v28 }
 0x51e   :  { %v507_v12 = vpop.f32.mrf.mxu2 }
 0x51f   :  { %v1483_v14 = vpop.eup %1482 }
 0x520   :  { %554 = vrot.lane.b32.xlu0 %v1483_v14, %s1605_s0 }
 0x54c   :  { %v527_v15 = vpop.f32.mrf.mxu3 }
 0x54d   :  { %v531_v45 = vadd.f32 %v527_v15, %v1754_v43 }
 0x54f   :  { %1484 = vtanh.f32 %v531_v45  ;;  %v1410_v51 = vmul.f32 -1.442695, %v531_v45 }
 0x550   :  { %1486 = vpow2.f32 %v1409_v20 }
 0x554   :  { %v529_v18 = vpop.f32.mrf.mxu3 }
 0x555   :  { %v1485_v19 = vpop.eup %1484  ;;  %v627_v18 = vsel %vm619_vm6, 1, %v1604_v13  ;;  %vm764_vm6 = vcmp.gt.s32.totalorder %v1762_v53, 3 }
 0x556   :  { %591 = vrot.lane.b32.xlu1 %v1485_v19, %s1605_s0  ;;  %v1487_v21 = vpop.eup %1486 }
 0x557   :  { %v535_v22 = vadd.f32 1.0, %v1487_v21 }
 0x559   :  { %1488 = vrcp.f32 %v535_v22  ;;  %v547_v32 = vand.u32 2147483648, %v535_v22  ;;  %vm541_vm13 = vweird.f32 %v535_v22  ;;  %v545_v34 = vand.u32 2147483647, %v535_v22 }
 0x55a   :  { %1490 = vpow2.f32 %v1410_v51 }
 0x55b   :  { %v548_v37 = vor.u32 1.1754944e-38, %v547_v32  ;;  %vm546_vm15 = vcmp.eq.f32.partialorder %v545_v34, 8.507059e+37 }
 0x55f   :  { %v1489_v24 = vpop.eup %1488 }
 0x560   :  { %v537_v26 = vmul.f32 %v1489_v24, %v535_v22  ;;  %vm542_vm10 = vweird.f32 %v1489_v24  ;;  %v1491_v52 = vpop.eup %1490 }
 0x561   :  { %vm543_vm14 = vmor %vm541_vm13, %vm542_vm10  ;;  %v572_v55 = vadd.f32 1.0, %v1491_v52 }
 0x562   :  { %v538_v27 = vsub.f32 1.0, %v537_v26 }
 0x563   :  { %1492 = vrcp.f32 %v572_v55  ;;  %v584_v0 = vand.u32 2147483648, %v572_v55  ;;  %vm578_vm2 = vweird.f32 %v572_v55  ;;  %v582_v3 = vand.u32 2147483647, %v572_v55 }
 0x564   :  { %v539_v29 = vmul.f32 %v1489_v24, %v538_v27 }
 0x565   :  { %v585_v6 = vor.u32 1.1754944e-38, %v584_v0  ;;  %vm583_vm4 = vcmp.eq.f32.partialorder %v582_v3, 8.507059e+37 }
 0x566   :  { %v540_v30 = vadd.f32 %v1489_v24, %v539_v29 }
 0x568   :  { %v544_v43 = vsel %vm543_vm14, %v1489_v24, %v540_v30 }
 0x569   :  { %v549_v46 = vsel %vm546_vm15, %v548_v37, %v544_v43  ;;  %v1493_v56 = vpop.eup %1492 }
 0x56a   :  { %v574_v57 = vmul.f32 %v1493_v56, %v572_v55  ;;  %vm579_vm1 = vweird.f32 %v1493_v56  ;;  %v552_v12 = vmul.f32 %v549_v46, %v1886_v11 }
 0x56b   :  { %vm580_vm3 = vmor %vm578_vm2, %vm579_vm1 }
 0x56c   :  { %v575_v58 = vsub.f32 1.0, %v574_v57 }
 0x56e   :  { %v576_v60 = vmul.f32 %v1493_v56, %v575_v58 }
 0x570   :  { %v577_v62 = vadd.f32 %v1493_v56, %v576_v60 }
 0x572   :  { %v581_v40 = vsel %vm580_vm3, %v1493_v56, %v577_v62 }
 0x573   :  { %v586_v48 = vsel %vm583_vm4, %v585_v6, %v581_v40 }
 0x574   :  { %v589_v54 = vmul.f32 %v586_v48, %v1899_v50 }
 0x592   :  { %v555_v42 = vpop.permute.xlu0 %554 }
 0x593   :  { %v557_v49 = vmul.f32 %v555_v42, %v549_v46 }
 0x595   :  { %559 = vrot.lane.b32.xlu2 %v557_v49, %s1606_s1 }
 0x5c8   :  { %v592_v7 = vpop.permute.xlu1 %591 }
 0x5c9   :  { %v594_v8 = vmul.f32 %v592_v7, %v586_v48 }
 0x5cb   :  { %596 = vrot.lane.b32.xlu0 %v594_v8, %s1606_s1 }
 0x5d3   :  { %622 = vperm.xlu0 %1447, %v620_v10  }
 0x5ef   :  { %v560_v14 = vpop.permute.xlu2 %559 }
 0x5f0   :  { %v1889_v15 = vadd.f32 %v560_v14, %v552_v12 }
 0x5f2   :  { %1494 = vtanh.f32 %v1889_v15 }
 0x5f8   :  { %v1495_v45 = vpop.eup %1494 }
 0x5f9   :  { %565 = vrot.lane.b32.xlu1 %v1495_v45, %s1605_s0 }
 0x601   :  { %629 = vperm.xlu1 %1448, %v627_v18  }
 0x63d   :  { %v597_v19 = vpop.permute.xlu0 %596 }
 0x63e   :  { %v1902_v20 = vadd.f32 %v597_v19, %v589_v54 }
 0x640   :  { %1496 = vtanh.f32 %v1902_v20 }
 0x645   :  { %v1906_v22 = vpop.permute.xlu0 %622 }
 0x646   :  { %v1497_v21 = vpop.eup %1496  ;;  %vm624_vm7 = vcmp.eq.s32.totalorder %v1906_v22, 1 }
 0x647   :  { %602 = vrot.lane.b32.xlu2 %v1497_v21, %s1605_s0 }
 0x66b   :  { %v566_v24 = vpop.permute.xlu1 %565 }
 0x66c   :  { %v1908_v26 = vmul.f32 %v566_v24, %v549_v46 }
 0x66e   :  { %v1915_v28 = vsel %vm624_vm7, %v1908_v26, %v1849_v33 }
 0x66f   :  { %v635_v59 = vpack.c.bf16 %v1915_v28, %v1915_v28 }
 0x671   :  { %637 = vrot.lane.b32.xlu2 %v635_v59, %s1606_s1 }
 0x673   :  { %v1920_v27 = vpop.permute.xlu1 %629 }
 0x674   :  { %vm631_vm10 = vcmp.eq.s32.totalorder %v1920_v27, 1 }
 0x6a1   :  { %v603_v29 = vpop.permute.xlu2 %602 }
 0x6a2   :  { %v1922_v30 = vmul.f32 %v603_v29, %v586_v48 }
 0x6a4   :  { %v1929_v32 = vsel %vm631_vm10, %v1922_v30, %v1863_v5  ;;  %v114_v5 = vpop.f32.mrf.mxu0 }
 0x6a5   :  { %v657_v33 = vpack.c.bf16 %v1929_v32, %v1929_v32  ;;  %v115_v37 = vadd.f32 %v114_v5, %v1740_v23 }
 0x6a7   :  { %659 = vrot.lane.b32.xlu0 %v657_v33, %s1606_s1 }
 0x6cb   :  { %v638_v34 = vpop.permute.xlu2 %637 }
 0x6cc   :  { %1411 = vmatmul.msk.bf16.vlgmr.msrb.gmra.mxu2 %vm85_vm0, %v638_v34 }
 0x6cd   :  { %1196 = vmatpush.bf16.msrb.mxu2 %v1657_v2 }
 0x6d1   :  { %1197 = vmatpush.bf16.msrb.mxu2 %v1675_v9 }
 0x719   :  { %v660_v43 = vpop.permute.xlu0 %659 }
 0x71a   :  { %1412 = vmatmul.msk.bf16.vlgmr.msrb.gmra.mxu3 %vm85_vm0, %v660_v43 }
 0x71b   :  { %1218 = vmatpush.bf16.msrb.mxu3 %v1697_v16 }
 0x71f   :  { %1219 = vmatpush.bf16.msrb.mxu3 %v1705_v17 }
 0x74f   :  { %v651_v42 = vpop.f32.mrf.mxu2 }
 0x750   :  { %v655_v46 = vadd.f32 %v651_v42, %v115_v37  ;;  %v766_v37 = vsel %vm764_vm6, 1, %v1604_v13  ;;  %v1952_v42 = vsel %vm624_vm7, %v1889_v15, %v1886_v11  ;;  %v1965_v11 = vsel %vm631_vm10, %v1902_v20, %v1899_v50 }
 0x752   :  { %1498 = vtanh.f32 %v655_v46  ;;  %v1413_v52 = vmul.f32 -1.442695, %v655_v46 }
 0x757   :  { %v653_v49 = vpop.f32.mrf.mxu2 }
 0x758   :  { %v1499_v51 = vpop.eup %1498 }
 0x759   :  { %700 = vrot.lane.b32.xlu1 %v1499_v51, %s1605_s0 }
 0x79d   :  { %v673_v2 = vpop.f32.mrf.mxu3 }
 0x79e   :  { %v677_v9 = vadd.f32 %v673_v2, %v1752_v41 }
 0x7a0   :  { %1500 = vtanh.f32 %v677_v9  ;;  %v1414_v10 = vmul.f32 -1.442695, %v677_v9 }
 0x7a1   :  { %1502 = vpow2.f32 %v1413_v52 }
 0x7a5   :  { %v675_v55 = vpop.f32.mrf.mxu3 }
 0x7a6   :  { %v1501_v16 = vpop.eup %1500 }
 0x7a7   :  { %737 = vrot.lane.b32.xlu2 %v1501_v16, %s1605_s0  ;;  %v1503_v17 = vpop.eup %1502 }
 0x7a8   :  { %v681_v56 = vadd.f32 1.0, %v1503_v17 }
 0x7aa   :  { %1504 = vrcp.f32 %v681_v56  ;;  %v693_v3 = vand.u32 2147483648, %v681_v56  ;;  %vm687_vm14 = vweird.f32 %v681_v56  ;;  %v691_v40 = vand.u32 2147483647, %v681_v56 }
 0x7ab   :  { %1506 = vpow2.f32 %v1414_v10 }
 0x7ac   :  { %v694_v6 = vor.u32 1.1754944e-38, %v693_v3  ;;  %vm692_vm1 = vcmp.eq.f32.partialorder %v691_v40, 8.507059e+37  ;;  %v117_v3 = vpop.f32.mrf.mxu0 }
 0x7b0   :  { %v1505_v57 = vpop.eup %1504 }
 0x7b1   :  { %v683_v58 = vmul.f32 %v1505_v57, %v681_v56  ;;  %vm688_vm13 = vweird.f32 %v1505_v57  ;;  %v1507_v12 = vpop.eup %1506 }
 0x7b2   :  { %vm689_vm15 = vmor %vm687_vm14, %vm688_vm13  ;;  %v718_v14 = vadd.f32 1.0, %v1507_v12  ;;  %vm765_vm13 = vcmp.gt.s32.totalorder %v1762_v53, 4 }
 0x7b3   :  { %v684_v60 = vsub.f32 1.0, %v683_v58  ;;  %v773_v9 = vsel %vm765_vm13, 1, %v1604_v13 }
 0x7b4   :  { %1508 = vrcp.f32 %v718_v14  ;;  %v730_v24 = vand.u32 2147483648, %v718_v14  ;;  %vm724_vm3 = vweird.f32 %v718_v14  ;;  %v728_v59 = vand.u32 2147483647, %v718_v14  ;;  %v2002_v40 = vpop.f32.mrf.mxu0 }
 0x7b5   :  { %v685_v62 = vmul.f32 %v1505_v57, %v684_v60 }
 0x7b6   :  { %v731_v33 = vor.u32 1.1754944e-38, %v730_v24  ;;  %vm729_vm5 = vcmp.eq.f32.partialorder %v728_v59, 8.507059e+37 }
 0x7b7   :  { %v686_v0 = vadd.f32 %v1505_v57, %v685_v62 }
 0x7b9   :  { %v690_v41 = vsel %vm689_vm15, %v1505_v57, %v686_v0 }
 0x7ba   :  { %v695_v48 = vsel %vm692_vm1, %v694_v6, %v690_v41  ;;  %v1509_v45 = vpop.eup %1508 }
 0x7bb   :  { %v720_v18 = vmul.f32 %v1509_v45, %v718_v14  ;;  %vm725_vm2 = vweird.f32 %v1509_v45  ;;  %v698_v46 = vmul.f32 %v695_v48, %v1952_v42 }
 0x7bc   :  { %vm726_vm4 = vmor %vm724_vm3, %vm725_vm2  ;;  %v2004_v41 = vpop.f32.mrf.mxu0 }
 0x7bd   :  { %v721_v54 = vsub.f32 1.0, %v720_v18 }
 0x7bf   :  { %v722_v19 = vmul.f32 %v1509_v45, %v721_v54 }
 0x7c1   :  { %v723_v21 = vadd.f32 %v1509_v45, %v722_v19 }
 0x7c3   :  { %v727_v29 = vsel %vm726_vm4, %v1509_v45, %v723_v21 }
 0x7c4   :  { %v732_v43 = vsel %vm729_vm5, %v731_v33, %v727_v29  ;;  %v2006_v6 = vpop.f32.mrf.mxu0 }
 0x7c5   :  { %v735_v15 = vmul.f32 %v732_v43, %v1965_v11 }
 0x7cb   :  { %v701_v7 = vpop.permute.xlu1 %700 }
 0x7cc   :  { %v703_v8 = vmul.f32 %v701_v7, %v695_v48 }
 0x7ce   :  { %705 = vrot.lane.b32.xlu0 %v703_v8, %s1606_s1 }
 0x801   :  { %v738_v34 = vpop.permute.xlu2 %737 }
 0x802   :  { %v740_v5 = vmul.f32 %v738_v34, %v732_v43 }
 0x804   :  { %742 = vrot.lane.b32.xlu1 %v740_v5, %s1606_s1 }
 0x80c   :  { %768 = vperm.xlu1 %1448, %v766_v37  }
 0x840   :  { %v706_v49 = vpop.permute.xlu0 %705 }
 0x841   :  { %v1955_v51 = vadd.f32 %v706_v49, %v698_v46 }
 0x843   :  { %1510 = vtanh.f32 %v1955_v51 }
 0x849   :  { %v1511_v2 = vpop.eup %1510 }
 0x84a   :  { %711 = vrot.lane.b32.xlu2 %v1511_v2, %s1605_s0 }
 0x852   :  { %775 = vperm.xlu2 %1449, %v773_v9  }
 0x876   :  { %v743_v52 = vpop.permute.xlu1 %742 }
 0x877   :  { %v1968_v55 = vadd.f32 %v743_v52, %v735_v15 }
 0x879   :  { %1512 = vtanh.f32 %v1968_v55 }
 0x87e   :  { %v1972_v53 = vpop.permute.xlu1 %768 }
 0x87f   :  { %v1513_v16 = vpop.eup %1512  ;;  %vm770_vm14 = vcmp.eq.s32.totalorder %v1972_v53, 1 }
 0x880   :  { %748 = vrot.lane.b32.xlu0 %v1513_v16, %s1605_s0 }
 0x8a4   :  { %v712_v13 = vpop.permute.xlu2 %711 }
 0x8a5   :  { %v1974_v17 = vmul.f32 %v712_v13, %v695_v48 }
 0x8a7   :  { %v1981_v50 = vsel %vm770_vm14, %v1974_v17, %v1915_v28 }
 0x8a8   :  { %v781_v20 = vpack.c.bf16 %v1981_v50, %v1981_v50 }
 0x8aa   :  { %783 = vrot.lane.b32.xlu0 %v781_v20, %s1606_s1 }
 0x8ac   :  { %v1986_v56 = vpop.permute.xlu2 %775 }
 0x8ad   :  { %vm777_vm15 = vcmp.eq.s32.totalorder %v1986_v56, 1 }
 0x8f2   :  { %v749_v57 = vpop.permute.xlu0 %748 }
 0x8f3   :  { %v1988_v58 = vmul.f32 %v749_v57, %v732_v43 }
 0x8f5   :  { %v1995_v60 = vsel %vm777_vm15, %v1988_v58, %v1929_v32  ;;  %v118_v32 = vadd.f32 %v117_v3, %v1740_v23 }
 0x8f6   :  { %v803_v28 = vpack.c.bf16 %v1995_v60, %v1995_v60 }
 0x8f8   :  { %805 = vrot.lane.b32.xlu1 %v803_v28, %s1606_s1 }
 0x91c   :  { %v784_v62 = vpop.permute.xlu0 %783 }
 0x91d   :  { %1415 = vmatmul.msk.bf16.vlgmr.msrb.gmra.mxu0 %vm85_vm0, %v784_v62 }
 0x96a   :  { %v806_v0 = vpop.permute.xlu1 %805 }
 0x96b   :  { %1416 = vmatmul.msk.bf16.vlgmr.msrb.gmra.mxu1 %vm85_vm0, %v806_v0 }
 0x99a   :  { %v797_v7 = vpop.f32.mrf.mxu0 }
 0x99b   :  { %v801_v48 = vadd.f32 %v797_v7, %v118_v32 }
 0x99d   :  { %1514 = vtanh.f32 %v801_v48  ;;  %v1417_v12 = vmul.f32 -1.442695, %v801_v48 }
 0x99f   :  { %1516 = vpow2.f32 %v1417_v12 }
 0x9a2   :  { %v799_v8 = vpop.f32.mrf.mxu0 }
 0x9a3   :  { %v1515_v10 = vpop.eup %1514 }
 0x9a4   :  { %846 = vrot.lane.b32.xlu2 %v1515_v10, %s1605_s0  ;;  %v2018_v10 = vsel %vm770_vm14, %v1955_v51, %v1952_v42 }
 0x9a5   :  { %v1517_v14 = vpop.eup %1516 }
 0x9a6   :  { %v827_v45 = vadd.f32 1.0, %v1517_v14 }
 0x9a8   :  { %1518 = vrcp.f32 %v827_v45  ;;  %v839_v43 = vand.u32 2147483648, %v827_v45  ;;  %vm833_vm2 = vweird.f32 %v827_v45  ;;  %v837_v5 = vand.u32 2147483647, %v827_v45 }
 0x9aa   :  { %v840_v46 = vor.u32 1.1754944e-38, %v839_v43  ;;  %vm838_vm4 = vcmp.eq.f32.partialorder %v837_v5, 8.507059e+37 }
 0x9ae   :  { %v1519_v54 = vpop.eup %1518 }
 0x9af   :  { %v829_v21 = vmul.f32 %v1519_v54, %v827_v45  ;;  %vm834_vm1 = vweird.f32 %v1519_v54 }
 0x9b0   :  { %vm835_vm3 = vmor %vm833_vm2, %vm834_vm1 }
 0x9b1   :  { %v830_v59 = vsub.f32 1.0, %v829_v21 }
 0x9b3   :  { %v831_v33 = vmul.f32 %v1519_v54, %v830_v59 }
 0x9b5   :  { %v832_v34 = vadd.f32 %v1519_v54, %v831_v33 }
 0x9b7   :  { %v836_v37 = vsel %vm835_vm3, %v1519_v54, %v832_v34  ;;  %v2029_v54 = vsel %vm777_vm15, %v1968_v55, %v1965_v11 }
 0x9b8   :  { %v841_v49 = vsel %vm838_vm4, %v840_v46, %v836_v37  ;;  %v120_v37 = vadd.f32 %v2002_v40, %v1740_v23 }
 0x9b9   :  { %v844_v12 = vmul.f32 %v841_v49, %v2018_v10 }
 0x9e8   :  { %v819_v18 = vpop.f32.mrf.mxu1 }
 0x9e9   :  { %v823_v19 = vadd.f32 %v819_v18, %v1750_v38 }
 0x9eb   :  { %1520 = vtanh.f32 %v823_v19  ;;  %v1418_v9 = vmul.f32 -1.442695, %v823_v19 }
 0x9ed   :  { %1522 = vpow2.f32 %v1418_v9 }
 0x9f0   :  { %v821_v24 = vpop.f32.mrf.mxu1 }
 0x9f1   :  { %v1521_v29 = vpop.eup %1520 }
 0x9f2   :  { %883 = vrot.lane.b32.xlu0 %v1521_v29, %s1605_s0 }
 0x9f3   :  { %v1523_v15 = vpop.eup %1522 }
 0x9f4   :  { %v864_v52 = vadd.f32 1.0, %v1523_v15 }
 0x9f6   :  { %1524 = vrcp.f32 %v864_v52  ;;  %v876_v62 = vand.u32 2147483648, %v864_v52  ;;  %vm870_vm6 = vweird.f32 %v864_v52  ;;  %v874_v0 = vand.u32 2147483647, %v864_v52 }
 0x9f8   :  { %v877_v32 = vor.u32 1.1754944e-38, %v876_v62  ;;  %vm875_vm1 = vcmp.eq.f32.partialorder %v874_v0, 8.507059e+37 }
 0x9fc   :  { %v1525_v16 = vpop.eup %1524 }
 0x9fd   :  { %v866_v13 = vmul.f32 %v1525_v16, %v864_v52  ;;  %vm871_vm5 = vweird.f32 %v1525_v16 }
 0x9fe   :  { %v847_v2 = vpop.permute.xlu2 %846  ;;  %vm872_vm13 = vmor %vm870_vm6, %vm871_vm5 }
 0x9ff   :  { %v849_v38 = vmul.f32 %v847_v2, %v841_v49  ;;  %v867_v20 = vsub.f32 1.0, %v866_v13 }
 0xa01   :  { %851 = vrot.lane.b32.xlu1 %v849_v38, %s1606_s1  ;;  %v868_v57 = vmul.f32 %v1525_v16, %v867_v20 }
 0xa03   :  { %v869_v28 = vadd.f32 %v1525_v16, %v868_v57 }
 0xa05   :  { %v873_v3 = vsel %vm872_vm13, %v1525_v16, %v869_v28 }
 0xa06   :  { %v878_v48 = vsel %vm875_vm1, %v877_v32, %v873_v3 }
 0xa07   :  { %v881_v19 = vmul.f32 %v878_v48, %v2029_v54 }
 0xa64   :  { %v884_v7 = vpop.permute.xlu0 %883 }
 0xa65   :  { %v886_v8 = vmul.f32 %v884_v7, %v878_v48 }
 0xa67   :  { %888 = vrot.lane.b32.xlu2 %v886_v8, %s1606_s1 }
 0xa73   :  { %v852_v14 = vpop.permute.xlu1 %851 }
 0xa74   :  { %v2021_v45 = vadd.f32 %v852_v14, %v844_v12 }
 0xa76   :  { %1526 = vtanh.f32 %v2021_v45 }
 0xa7c   :  { %v1527_v18 = vpop.eup %1526 }
 0xa7d   :  { %857 = vrot.lane.b32.xlu0 %v1527_v18, %s1605_s0 }
 0xac1   :  { %v889_v42 = vpop.permute.xlu2 %888 }
 0xac2   :  { %v2032_v51 = vadd.f32 %v889_v42, %v881_v19 }
 0xac4   :  { %1528 = vtanh.f32 %v2032_v51 }
 0xaca   :  { %v1529_v21 = vpop.eup %1528 }
 0xacb   :  { %894 = vrot.lane.b32.xlu1 %v1529_v21, %s1605_s0 }
 0xaef   :  { %v858_v24 = vpop.permute.xlu0 %857 }
 0xaf0   :  { %v2036_v59 = vmul.f32 %v858_v24, %v841_v49 }
 0xaf2   :  { %v2042_v29 = vsel %vm777_vm15, %v2036_v59, %v1981_v50  ;;  %v898_v47 = vpack.c.bf16 %v2036_v59, %v2036_v59 }
 0xaf3   :  { %v915_v11 = vpack.c.bf16 %v2042_v29, %v2042_v29 }
 0xaf5   :  { %917 = vrot.lane.b32.xlu2 %v915_v11, %s1606_s1 }
 0xb3d   :  { %v895_v55 = vpop.permute.xlu1 %894 }
 0xb3e   :  { %v2047_v33 = vmul.f32 %v895_v55, %v878_v48 }
 0xb40   :  { %v2053_v34 = vsel %vm770_vm14, %v2047_v33, %v1995_v60  ;;  %v904_v63 = vpack.c.bf16 %v2047_v33, %v2047_v33 }
 0xb41   :  { %v937_v43 = vpack.c.bf16 %v2053_v34, %v2053_v34 }
 0xb43   :  { %939 = vrot.lane.b32.xlu0 %v937_v43, %s1606_s1 }
 0xb4f   :  { %v918_v50 = vpop.permute.xlu2 %917 }
 0xb50   :  { %1419 = vmatmul.msk.bf16.vlgmr.msra.gmra.mxu2 %vm85_vm0, %v918_v50 }
 0xbb5   :  { %v940_v5 = vpop.permute.xlu0 %939 }
 0xbb6   :  { %1420 = vmatmul.msk.bf16.vlgmr.msra.gmra.mxu3 %vm85_vm0, %v940_v5 }
 0xbd3   :  { %v931_v46 = vpop.f32.mrf.mxu2 }
 0xbd4   :  { %v935_v49 = vadd.f32 %v931_v46, %v120_v37 }
 0xbd6   :  { %1530 = vtanh.f32 %v935_v49  ;;  %v1421_v38 = vmul.f32 -1.442695, %v935_v49 }
 0xbd8   :  { %1532 = vpow2.f32 %v1421_v38 }
 0xbdb   :  { %v933_v2 = vpop.f32.mrf.mxu2 }
 0xbdc   :  { %v1531_v60 = vpop.eup %1530 }
 0xbdd   :  { %980 = vrot.lane.b32.xlu1 %v1531_v60, %s1605_s0  ;;  %v2071_v60 = vsel %vm777_vm15, %v2021_v45, %v2018_v10 }
 0xbde   :  { %v1533_v9 = vpop.eup %1532 }
 0xbdf   :  { %v961_v15 = vadd.f32 1.0, %v1533_v9 }
 0xbe1   :  { %1534 = vrcp.f32 %v961_v15  ;;  %v973_v3 = vand.u32 2147483648, %v961_v15  ;;  %vm967_vm3 = vweird.f32 %v961_v15  ;;  %v971_v32 = vand.u32 2147483647, %v961_v15 }
 0xbe3   :  { %v974_v48 = vor.u32 1.1754944e-38, %v973_v3  ;;  %vm972_vm5 = vcmp.eq.f32.partialorder %v971_v32, 8.507059e+37  ;;  %v123_v3 = vadd.f32 %v2004_v41, %v1740_v23 }
 0xbe7   :  { %v1535_v16 = vpop.eup %1534 }
 0xbe8   :  { %v963_v20 = vmul.f32 %v1535_v16, %v961_v15  ;;  %vm968_vm2 = vweird.f32 %v1535_v16 }
 0xbe9   :  { %vm969_vm4 = vmor %vm967_vm3, %vm968_vm2 }
 0xbea   :  { %v964_v40 = vsub.f32 1.0, %v963_v20 }
 0xbec   :  { %v965_v62 = vmul.f32 %v1535_v16, %v964_v40 }
 0xbee   :  { %v966_v0 = vadd.f32 %v1535_v16, %v965_v62 }
 0xbf0   :  { %v970_v7 = vsel %vm969_vm4, %v1535_v16, %v966_v0  ;;  %v2082_v16 = vsel %vm770_vm14, %v2032_v51, %v2029_v54 }
 0xbf1   :  { %v975_v12 = vsel %vm972_vm5, %v974_v48, %v970_v7 }
 0xbf2   :  { %v978_v38 = vmul.f32 %v975_v12, %v2071_v60 }
 0xc39   :  { %v953_v52 = vpop.f32.mrf.mxu3 }
 0xc3a   :  { %v957_v13 = vadd.f32 %v953_v52, %v1748_v35 }
 0xc3c   :  { %1536 = vtanh.f32 %v957_v13  ;;  %v1422_v14 = vmul.f32 -1.442695, %v957_v13 }
 0xc3e   :  { %1538 = vpow2.f32 %v1422_v14 }
 0xc41   :  { %v955_v57 = vpop.f32.mrf.mxu3 }
 0xc42   :  { %v1537_v28 = vpop.eup %1536 }
 0xc43   :  { %1017 = vrot.lane.b32.xlu2 %v1537_v28, %s1605_s0 }
 0xc44   :  { %v1539_v18 = vpop.eup %1538 }
 0xc45   :  { %v998_v19 = vadd.f32 1.0, %v1539_v18 }
 0xc47   :  { %1540 = vrcp.f32 %v998_v19  ;;  %v1010_v43 = vand.u32 2147483648, %v998_v19  ;;  %vm1004_vm13 = vweird.f32 %v998_v19  ;;  %v1008_v50 = vand.u32 2147483647, %v998_v19 }
 0xc49   :  { %v1011_v37 = vor.u32 1.1754944e-38, %v1010_v43  ;;  %vm1009_vm2 = vcmp.eq.f32.partialorder %v1008_v50, 8.507059e+37 }
 0xc4d   :  { %v1541_v42 = vpop.eup %1540 }
 0xc4e   :  { %v1000_v21 = vmul.f32 %v1541_v42, %v998_v19  ;;  %vm1005_vm6 = vweird.f32 %v1541_v42 }
 0xc4f   :  { %v981_v8 = vpop.permute.xlu1 %980  ;;  %vm1006_vm1 = vmor %vm1004_vm13, %vm1005_vm6 }
 0xc50   :  { %v983_v35 = vmul.f32 %v981_v8, %v975_v12  ;;  %v1001_v24 = vsub.f32 1.0, %v1000_v21 }
 0xc52   :  { %985 = vrot.lane.b32.xlu0 %v983_v35, %s1606_s1  ;;  %v1002_v11 = vmul.f32 %v1541_v42, %v1001_v24 }
 0xc54   :  { %v1003_v55 = vadd.f32 %v1541_v42, %v1002_v11 }
 0xc56   :  { %v1007_v5 = vsel %vm1006_vm1, %v1541_v42, %v1003_v55 }
 0xc57   :  { %v1012_v46 = vsel %vm1009_vm2, %v1011_v37, %v1007_v5 }
 0xc58   :  { %v1015_v56 = vmul.f32 %v1012_v46, %v2082_v16 }
 0xc9d   :  { %v1018_v49 = vpop.permute.xlu2 %1017 }
 0xc9e   :  { %v1020_v2 = vmul.f32 %v1018_v49, %v1012_v46 }
 0xca0   :  { %1022 = vrot.lane.b32.xlu1 %v1020_v2, %s1606_s1 }
 0xcc4   :  { %v986_v9 = vpop.permute.xlu0 %985 }
 0xcc5   :  { %v2074_v15 = vadd.f32 %v986_v9, %v978_v38 }
 0xcc7   :  { %1542 = vtanh.f32 %v2074_v15 }
 0xccd   :  { %v1543_v52 = vpop.eup %1542 }
 0xcce   :  { %991 = vrot.lane.b32.xlu2 %v1543_v52, %s1605_s0 }
 0xd12   :  { %v1023_v10 = vpop.permute.xlu1 %1022 }
 0xd13   :  { %v2085_v45 = vadd.f32 %v1023_v10, %v1015_v56 }
 0xd15   :  { %1544 = vtanh.f32 %v2085_v45 }
 0xd1b   :  { %v1545_v13 = vpop.eup %1544 }
 0xd1c   :  { %1028 = vrot.lane.b32.xlu0 %v1545_v13, %s1605_s0 }
 0xd28   :  { %v992_v20 = vpop.permute.xlu2 %991 }
 0xd29   :  { %v2089_v57 = vmul.f32 %v992_v20, %v975_v12 }
 0xd2b   :  { %v2095_v53 = vsel %vm631_vm10, %v2089_v57, %v2042_v29 }
 0xd2c   :  { %v1049_v54 = vpack.c.bf16 %v2095_v53, %v2095_v53 }
 0xd2e   :  { %1051 = vrot.lane.b32.xlu1 %v1049_v54, %s1606_s1 }
 0xd8e   :  { %v1029_v51 = vpop.permute.xlu0 %1028 }
 0xd8f   :  { %v2100_v40 = vmul.f32 %v1029_v51, %v1012_v46 }
 0xd91   :  { %v2106_v28 = vsel %vm624_vm7, %v2100_v40, %v2053_v34 }
 0xd92   :  { %v1071_v62 = vpack.c.bf16 %v2106_v28, %v2106_v28 }
 0xd94   :  { %1073 = vrot.lane.b32.xlu2 %v1071_v62, %s1606_s1 }
 0xda0   :  { %v1052_v29 = vpop.permute.xlu1 %1051 }
 0xda1   :  { %1423 = vmatmul.msk.bf16.vlgmr.msra.gmra.mxu0 %vm85_vm0, %v1052_v29 }
 0xdee   :  { %v1074_v0 = vpop.permute.xlu2 %1073 }
 0xdef   :  { %1424 = vmatmul.msk.bf16.vlgmr.msra.gmra.mxu1 %vm85_vm0, %v1074_v0 }
 0xe1e   :  { %v1065_v32 = vpop.f32.mrf.mxu0 }
 0xe1f   :  { %v1069_v7 = vadd.f32 %v1065_v32, %v123_v3 }
 0xe21   :  { %1546 = vtanh.f32 %v1069_v7  ;;  %v1425_v35 = vmul.f32 -1.442695, %v1069_v7  ;;  %v2124_v7 = vsel %vm631_vm10, %v2074_v15, %v2071_v60 }
 0xe26   :  { %v1067_v48 = vpop.f32.mrf.mxu0 }
 0xe27   :  { %v1547_v34 = vpop.eup %1546 }
 0xe28   :  { %1114 = vrot.lane.b32.xlu0 %v1547_v34, %s1605_s0 }
 0xe6c   :  { %v1087_v8 = vpop.f32.mrf.mxu1 }
 0xe6d   :  { %v1091_v12 = vadd.f32 %v1087_v8, %v1745_v31 }
 0xe6f   :  { %1548 = vtanh.f32 %v1091_v12  ;;  %v1426_v2 = vmul.f32 -1.442695, %v1091_v12 }
 0xe70   :  { %1550 = vpow2.f32 %v1425_v35  ;;  %v2135_v35 = vsel %vm624_vm7, %v2085_v45, %v2082_v16 }
 0xe74   :  { %v1089_v14 = vpop.f32.mrf.mxu1 }
 0xe75   :  { %v1549_v18 = vpop.eup %1548 }
 0xe76   :  { %1151 = vrot.lane.b32.xlu1 %v1549_v18, %s1605_s0  ;;  %v1551_v19 = vpop.eup %1550 }
 0xe77   :  { %v1095_v42 = vadd.f32 1.0, %v1551_v19 }
 0xe79   :  { %1552 = vrcp.f32 %v1095_v42  ;;  %v1107_v43 = vand.u32 2147483648, %v1095_v42  ;;  %vm1101_vm15 = vweird.f32 %v1095_v42  ;;  %v1105_v50 = vand.u32 2147483647, %v1095_v42 }
 0xe7a   :  { %1554 = vpow2.f32 %v1426_v2 }
 0xe7b   :  { %v1108_v5 = vor.u32 1.1754944e-38, %v1107_v43  ;;  %vm1106_vm4 = vcmp.eq.f32.partialorder %v1105_v50, 8.507059e+37 }
 0xe7f   :  { %v1553_v41 = vpop.eup %1552 }
 0xe80   :  { %v1097_v21 = vmul.f32 %v1553_v41, %v1095_v42  ;;  %vm1102_vm14 = vweird.f32 %v1553_v41  ;;  %v1555_v38 = vpop.eup %1554 }
 0xe81   :  { %vm1103_vm3 = vmor %vm1101_vm15, %vm1102_vm14  ;;  %v1132_v9 = vadd.f32 1.0, %v1555_v38 }
 0xe82   :  { %v1098_v24 = vsub.f32 1.0, %v1097_v21 }
 0xe83   :  { %1556 = vrcp.f32 %v1132_v9  ;;  %v1144_v54 = vand.u32 2147483648, %v1132_v9  ;;  %vm1138_vm6 = vweird.f32 %v1132_v9  ;;  %v1142_v51 = vand.u32 2147483647, %v1132_v9 }
 0xe84   :  { %v1099_v11 = vmul.f32 %v1553_v41, %v1098_v24 }
 0xe85   :  { %v1145_v29 = vor.u32 1.1754944e-38, %v1144_v54  ;;  %vm1143_vm1 = vcmp.eq.f32.partialorder %v1142_v51, 8.507059e+37 }
 0xe86   :  { %v1100_v55 = vadd.f32 %v1553_v41, %v1099_v11  ;;  %v125_v11 = vadd.f32 %v2006_v6, %v1740_v23 }
 0xe88   :  { %v1104_v31 = vsel %vm1103_vm3, %v1553_v41, %v1100_v55 }
 0xe89   :  { %v1109_v46 = vsel %vm1106_vm4, %v1108_v5, %v1104_v31  ;;  %v1557_v52 = vpop.eup %1556 }
 0xe8a   :  { %v1134_v56 = vmul.f32 %v1557_v52, %v1132_v9  ;;  %vm1139_vm5 = vweird.f32 %v1557_v52  ;;  %v1112_v48 = vmul.f32 %v1109_v46, %v2124_v7 }
 0xe8b   :  { %vm1140_vm13 = vmor %vm1138_vm6, %vm1139_vm5  ;;  %vm324_vm6 = vcmask 519424  }
 0xe8c   :  { %v1135_v10 = vsub.f32 1.0, %v1134_v56 }
 0xe8e   :  { %v1136_v13 = vmul.f32 %v1557_v52, %v1135_v10 }
 0xe90   :  { %v1137_v20 = vadd.f32 %v1557_v52, %v1136_v13 }
 0xe92   :  { %v1141_v62 = vsel %vm1140_vm13, %v1557_v52, %v1137_v20 }
 0xe93   :  { %v1146_v3 = vsel %vm1143_vm1, %v1145_v29, %v1141_v62 }
 0xe94   :  { %v1149_v27 = vmul.f32 %v1146_v3, %v2135_v35 }
 0xe9a   :  { %v1115_v37 = vpop.permute.xlu0 %1114 }
 0xe9b   :  { %v1117_v49 = vmul.f32 %v1115_v37, %v1109_v46 }
 0xe9d   :  { %1119 = vrot.lane.b32.xlu2 %v1117_v49, %s1606_s1 }
 0xee8   :  { %v1152_v0 = vpop.permute.xlu1 %1151 }
 0xee9   :  { %v1154_v32 = vmul.f32 %v1152_v0, %v1146_v3 }
 0xeeb   :  { %1156 = vrot.lane.b32.xlu0 %v1154_v32, %s1606_s1 }
 0xef7   :  { %v1120_v34 = vpop.permute.xlu2 %1119 }
 0xef8   :  { %v2127_v8 = vadd.f32 %v1120_v34, %v1112_v48 }
 0xefa   :  { %1558 = vtanh.f32 %v2127_v8 }
 0xf00   :  { %v1559_v12 = vpop.eup %1558 }
 0xf01   :  { %1125 = vrot.lane.b32.xlu1 %v1559_v12, %s1605_s0 }
 0xf5d   :  { %v1157_v60 = vpop.permute.xlu0 %1156 }
 0xf5e   :  { %v2138_v15 = vadd.f32 %v1157_v60, %v1149_v27 }
 0xf60   :  { %1560 = vtanh.f32 %v2138_v15 }
 0xf66   :  { %v1561_v14 = vpop.eup %1560 }
 0xf67   :  { %1162 = vrot.lane.b32.xlu2 %v1561_v14, %s1605_s0 }
 0xf73   :  { %v1126_v18 = vpop.permute.xlu1 %1125 }
 0xf74   :  { %v2142_v19 = vmul.f32 %v1126_v18, %v1109_v46 }
 0xf76   :  { %v2148_v22 = vsel %vm485_vm9, %v2142_v19, %v2095_v53 }
 0xf77   :  { %v1183_v16 = vpack.c.bf16 %v2148_v22, %v2148_v22 }
 0xf79   :  { %1185 = vrot.lane.b32.xlu0 %v1183_v16, %s1606_s1 }
 0xfc1   :  { %v1163_v45 = vpop.permute.xlu2 %1162 }
 0xfc2   :  { %v2153_v42 = vmul.f32 %v1163_v45, %v1146_v3 }
 0xfc4   :  { %v2159_v41 = vsel %vm478_vm8, %v2153_v42, %v2106_v28 }
 0xfc5   :  { %v1205_v21 = vpack.c.bf16 %v2159_v41, %v2159_v41 }
 0xfc7   :  { %1207 = vrot.lane.b32.xlu1 %v1205_v21, %s1606_s1 }
 0xfeb   :  { %v1186_v53 = vpop.permute.xlu0 %1185 }
 0xfec   :  { %1427 = vmatmul.msk.bf16.vlgmr.msrb.gmra.mxu2 %vm85_vm0, %v1186_v53 }
0x1039   :  { %v1208_v24 = vpop.permute.xlu1 %1207 }
0x103a   :  { %1428 = vmatmul.msk.bf16.vlgmr.msrb.gmra.mxu3 %vm85_vm0, %v1208_v24  ;;  %v312_v24 = vpack.c.bf16 %v1780_v39, %v1780_v39  ;;  %v612_v39 = vpack.c.bf16 %v1922_v30, %v1922_v30  ;;  %v752_v30 = vpack.c.bf16 %v1974_v17, %v1974_v17 }
0x106f   :  { %v1199_v55 = vpop.f32.mrf.mxu2 }
0x1070   :  { %v1203_v43 = vadd.f32 %v1199_v55, %v125_v11  ;;  %v1179_v11 = vsel %vm485_vm9, %v2127_v8, %v2124_v7  ;;  %v1032_v7 = vpack.c.bf16 %v2089_v57, %v2089_v57  ;;  %v1038_v57 = vpack.c.bf16 %v2100_v40, %v2100_v40 }
0x1071   :  { %vm317_vm9 = vcmask 257024  }
0x1072   :  { %1562 = vtanh.f32 %v1203_v43  ;;  %v1429_v31 = vmul.f32 -1.442695, %v1203_v43 }
0x1074   :  { %1564 = vpow2.f32 %v1429_v31 }
0x1077   :  { %v1201_v50 = vpop.f32.mrf.mxu2 }
0x1078   :  { %v1563_v28 = vpop.eup %1562  ;;  %v466_v50 = vpack.c.bf16 %v1856_v4, %v1856_v4  ;;  %v606_v4 = vpack.c.bf16 %v1908_v26, %v1908_v26  ;;  %v1181_v26 = vsel %vm478_vm8, %v2138_v15, %v2135_v35  ;;  %v758_v35 = vpack.c.bf16 %v1988_v58, %v1988_v58 }
0x1079   :  { %1248 = vrot.lane.b32.xlu2 %v1563_v28, %s1605_s0  ;;  %v1166_v58 = vpack.c.bf16 %v2142_v19, %v2142_v19 }
0x107a   :  { %v1565_v5 = vpop.eup %1564 }
0x107b   :  { %v1229_v37 = vadd.f32 1.0, %v1565_v5 }
0x107d   :  { %1566 = vrcp.f32 %v1229_v37  ;;  %v1241_v10 = vand.u32 2147483648, %v1229_v37  ;;  %vm1235_vm10 = vweird.f32 %v1229_v37  ;;  %v1239_v13 = vand.u32 2147483647, %v1229_v37 }
0x107f   :  { %v1242_v54 = vor.u32 1.1754944e-38, %v1241_v10  ;;  %vm1240_vm14 = vcmp.eq.f32.partialorder %v1239_v13, 8.507059e+37 }
0x1083   :  { %v1567_v49 = vpop.eup %1566 }
0x1084   :  { %v1231_v38 = vmul.f32 %v1567_v49, %v1229_v37  ;;  %vm1236_vm7 = vweird.f32 %v1567_v49 }
0x1085   :  { %vm1237_vm2 = vmor %vm1235_vm10, %vm1236_vm7 }
0x1086   :  { %v1232_v23 = vsub.f32 1.0, %v1231_v38 }
0x1088   :  { %v1233_v52 = vmul.f32 %v1567_v49, %v1232_v23 }
0x108a   :  { %v1234_v56 = vadd.f32 %v1567_v49, %v1233_v52 }
0x108c   :  { %v1238_v20 = vsel %vm1237_vm2, %v1567_v49, %v1234_v56 }
0x108d   :  { %v2171_v62 = vsel %vm1240_vm14, %v1242_v54, %v1238_v20  ;;  %v1172_v20 = vpack.c.bf16 %v2153_v42, %v2153_v42 }
0x108e   :  { %v1246_v55 = vmul.f32 %v2171_v62, %v1179_v11 }
0x10bd   :  { %v1221_v46 = vpop.f32.mrf.mxu3 }
0x10be   :  { %v1225_v2 = vadd.f32 %v1221_v46, %v1742_v25 }
0x10c0   :  { %1568 = vtanh.f32 %v1225_v2  ;;  %v1430_v29 = vmul.f32 -1.442695, %v1225_v2 }
0x10c2   :  { %1570 = vpow2.f32 %v1430_v29 }
0x10c5   :  { %v1223_v9 = vpop.f32.mrf.mxu3 }
0x10c6   :  { %v1569_v6 = vpop.eup %1568 }
0x10c7   :  { %1285 = vrot.lane.b32.xlu0 %v1569_v6, %s1605_s0 }
0x10c8   :  { %v1571_v0 = vpop.eup %1570 }
0x10c9   :  { %v1266_v3 = vadd.f32 1.0, %v1571_v0 }
0x10cb   :  { %1572 = vrcp.f32 %v1266_v3  ;;  %v1278_v60 = vand.u32 2147483648, %v1266_v3  ;;  %vm1272_vm3 = vweird.f32 %v1266_v3  ;;  %v1276_v14 = vand.u32 2147483647, %v1266_v3 }
0x10cd   :  { %v1279_v16 = vor.u32 1.1754944e-38, %v1278_v60  ;;  %vm1277_vm5 = vcmp.eq.f32.partialorder %v1276_v14, 8.507059e+37 }
0x10d1   :  { %v1573_v32 = vpop.eup %1572 }
0x10d2   :  { %v1268_v48 = vmul.f32 %v1573_v32, %v1266_v3  ;;  %vm1273_vm15 = vweird.f32 %v1573_v32 }
0x10d3   :  { %v1249_v51 = vpop.permute.xlu2 %1248  ;;  %vm1274_vm4 = vmor %vm1272_vm3, %vm1273_vm15 }
0x10d4   :  { %v1251_v25 = vmul.f32 %v1249_v51, %v2171_v62  ;;  %v1269_v34 = vsub.f32 1.0, %v1268_v48 }
0x10d6   :  { %1253 = vrot.lane.b32.xlu1 %v1251_v25, %s1606_s1  ;;  %v1270_v12 = vmul.f32 %v1573_v32, %v1269_v34 }
0x10d8   :  { %v1271_v27 = vadd.f32 %v1573_v32, %v1270_v12 }
0x10da   :  { %v1275_v18 = vsel %vm1274_vm4, %v1573_v32, %v1271_v27 }
0x10db   :  { %v2175_v21 = vsel %vm1277_vm5, %v1279_v16, %v1275_v18 }
0x10dc   :  { %v1283_v8 = vmul.f32 %v2175_v21, %v1181_v26 }
0x1139   :  { %v1286_v45 = vpop.permute.xlu0 %1285 }
0x113a   :  { %v1288_v53 = vmul.f32 %v1286_v45, %v2175_v21 }
0x113c   :  { %1290 = vrot.lane.b32.xlu2 %v1288_v53, %s1606_s1 }
0x1144   :  { %314 = vrot.lane.b32.xlu2 %v312_v24, %s1606_s1 }
0x1148   :  { %v1254_v43 = vpop.permute.xlu1 %1253 }
0x1149   :  { %v1256_v28 = vadd.f32 %v1254_v43, %v1246_v55 }
0x114b   :  { %1574 = vtanh.f32 %v1256_v28 }
0x114c   :  { %468 = vrot.lane.b32.xlu2 %v466_v50, %s1605_s0 }
0x1151   :  { %v1575_v31 = vpop.eup %1574 }
0x1152   :  { %1259 = vrot.lane.b32.xlu0 %v1575_v31, %s1605_s0 }
0x1154   :  { %614 = vrot.lane.b32.xlu2 %v612_v39, %s1605_s0 }
0x115a   :  { %321 = vrot.lane.b32.xlu0 %v319_v1, %s1605_s0 }
0x115c   :  { %1034 = vrot.lane.b32.xlu2 %v1032_v7, %s1606_s1 }
0x1162   :  { %608 = vrot.lane.b32.xlu0 %v606_v4, %s1606_s1 }
0x116a   :  { %754 = vrot.lane.b32.xlu0 %v752_v30, %s1606_s1 }
0x1172   :  { %900 = vrot.lane.b32.xlu0 %v898_v47, %s1606_s1 }
0x117a   :  { %1040 = vrot.lane.b32.xlu0 %v1038_v57, %s1605_s0 }
0x1196   :  { %v1291_v17 = vpop.permute.xlu2 %1290 }
0x1197   :  { %v1293_v5 = vadd.f32 %v1291_v17, %v1283_v8 }
0x1199   :  { %1576 = vtanh.f32 %v1293_v5 }
0x119e   :  { %v315_v37 = vpop.permute.xlu2 %314 }
0x119f   :  { %v1577_v59 = vpop.eup %1576  ;;  %318 = vst.msk [vmem:[%s2319_s6] sm:$0xf] %vm317_vm9, %v315_v37 }
0x11a0   :  { %1296 = vrot.lane.b32.xlu1 %v1577_v59, %s1605_s0 }
0x11a6   :  { %v469_v40 = vpop.permute.xlu2 %468 }
0x11a7   :  { %471 = vst.msk [vmem:[%s2319_s6 + $0x18] sm:$0xf] %vm324_vm6, %v469_v40 }
0x11a8   :  { %462 = vrot.lane.b32.xlu1 %v460_v61, %s1606_s1 }
0x11ae   :  { %v615_v15 = vpop.permute.xlu2 %614 }
0x11af   :  { %617 = vst.msk [vmem:[%s2319_s6 + $0x14] sm:$0xf] %vm324_vm6, %v615_v15 }
0x11b0   :  { %760 = vrot.lane.b32.xlu1 %v758_v35, %s1605_s0 }
0x11b6   :  { %v1035_v46 = vpop.permute.xlu2 %1034 }
0x11b7   :  { %1037 = vst.msk [vmem:[%s2319_s6 + $0x14] sm:$0xf] %vm317_vm9, %v1035_v46 }
0x11b8   :  { %906 = vrot.lane.b32.xlu1 %v904_v63, %s1605_s0 }
0x11c0   :  { %1168 = vrot.lane.b32.xlu1 %v1166_v58, %s1606_s1 }
0x11c4   :  { %v1260_v49 = vpop.permute.xlu0 %1259 }
0x11c5   :  { %v1262_v2 = vmul.f32 %v1260_v49, %v2171_v62 }
0x11c7   :  { %v1300_v38 = vpack.c.bf16 %v1262_v2, %v1262_v2  ;;  %v1312_v33 = vsel %vm339_vm12, %v1262_v2, %v2148_v22 }
0x11c8   :  { %1315 = vrot.lane.b32.xlu1 %v1312_v33, %s1606_s1 }
0x11c9   :  { %1302 = vrot.lane.b32.xlu0 %v1300_v38, %s1606_s1  ;;  %s1607_s1 = smov [#allocation3]  }
0x11ca   :  { %s1332_s10 = sshll.u32 %s1607_s1, 4  ;;  %s1333_s10 = int_to_ptr.vmem [resolvable:$true] %s1332_s10 }
0x11cc   :  { %v322_v9 = vpop.permute.xlu0 %321 }
0x11cd   :  { %325 = vst.msk [vmem:[%s2319_s6 + $0x1c] sm:$0xf] %vm324_vm6, %v322_v9 }
0x11d4   :  { %v609_v19 = vpop.permute.xlu0 %608 }
0x11d5   :  { %611 = vst.msk [vmem:[%s2319_s6 + $0x8] sm:$0xf] %vm317_vm9, %v609_v19 }
0x11dc   :  { %v755_v23 = vpop.permute.xlu0 %754 }
0x11dd   :  { %757 = vst.msk [vmem:[%s2319_s6 + $0xc] sm:$0xf] %vm317_vm9, %v755_v23 }
0x11e4   :  { %v901_v44 = vpop.permute.xlu0 %900 }
0x11ec   :  { %v1041_v22 = vpop.permute.xlu0 %1040 }
0x11ed   :  { %1043 = vst.msk [vmem:[%s2319_s6 + $0x8] sm:$0xf] %vm324_vm6, %v1041_v22 }
0x1212   :  { %v1297_v6 = vpop.permute.xlu1 %1296 }
0x1213   :  { %v1299_v52 = vmul.f32 %v1297_v6, %v2175_v21 }
0x1215   :  { %v1306_v56 = vpack.c.bf16 %v1299_v52, %v1299_v52  ;;  %v1313_v10 = vsel %vm332_vm11, %v1299_v52, %v2159_v41  ;;  %vm1323_vm11 = vcmask 523520  }
0x1216   :  { %1320 = vrot.lane.b32.xlu2 %v1313_v10, %s1605_s0 }
0x1217   :  { %1308 = vrot.lane.b32.xlu1 %v1306_v56, %s1605_s0 }
0x121a   :  { %v463_v13 = vpop.permute.xlu1 %462 }
0x121b   :  { %465 = vst.msk [vmem:[%s2319_s6 + $0x4] sm:$0xf] %vm317_vm9, %v463_v13 }
0x121e   :  { %1174 = vrot.lane.b32.xlu2 %v1172_v20, %s1605_s0 }
0x1222   :  { %v761_v54 = vpop.permute.xlu1 %760 }
0x1223   :  { %763 = vst.msk [vmem:[%s2319_s6 + $0x10] sm:$0xf] %vm324_vm6, %v761_v54 }
0x1224   :  { %903 = vst.msk [vmem:[%s2319_s6 + $0x10] sm:$0xf] %vm317_vm9, %v901_v44 }
0x122a   :  { %v907_v36 = vpop.permute.xlu1 %906 }
0x122b   :  { %909 = vst.msk [vmem:[%s2319_s6 + $0xc] sm:$0xf] %vm324_vm6, %v907_v36 }
0x1232   :  { %v1169_v42 = vpop.permute.xlu1 %1168 }
0x1233   :  { %1171 = vst.msk [vmem:[%s2319_s6 + $0x18] sm:$0xf] %vm317_vm9, %v1169_v42 }
0x123a   :  { %v1316_v41 = vpop.permute.xlu1 %1315 }
0x123b   :  { %1318 = vst.msk [vmem:[#allocation3] sm:$0xff] %vm85_vm0, %v1316_v41  ;;  %v1303_v51 = vpop.permute.xlu0 %1302 }
0x123c   :  { %1305 = vst.msk [vmem:[%s2319_s6 + $0x1c] sm:$0xf] %vm317_vm9, %v1303_v51 }
0x1270   :  { %v1321_v62 = vpop.permute.xlu2 %1320 }
0x1271   :  { %1324 = vst.msk [vmem:[#allocation3] sm:$0xff] %vm1323_vm11, %v1321_v62 }
0x1272   :  { %1337 = dma.vmem_to_hbm [thread:$0]  %s1333_s10, 128, %s1335_s13, [#allocation4]  }
0x1278   :  { %v1175_v25 = vpop.permute.xlu2 %1174 }
0x1279   :  { %1177 = vst.msk [vmem:[%s2319_s6 + $0x4] sm:$0xf] %vm324_vm6, %v1175_v25 }
0x1289   :  { %v1309_v29 = vpop.permute.xlu1 %1308 }
0x128a   :  { %1311 = vst.msk [vmem:[%s2319_s6] sm:$0xf] %vm324_vm6, %v1309_v29 }
0x128b   :  { %1602 = dma.done.wait [#allocation4], 128  }
0x128c   :  { %1603 = vsyncadd [#allocation4], 4294967168 }
0x128d   :  { %1344 = vsyncpa [#allocation4], 1 }

</bundles_post_ra>
